<compile_context>
chip_gen: v5e
topology: v5e:2x2
jax: 0.10.0
libtpu: 0.0.40
codegen_flags: <defaults>
</compile_context>

<pallas_src>
import functools

import jax
import jax.numpy as jnp
import numpy as np
from jax import lax
from jax.experimental import pallas as pl
from jax.experimental.pallas import tpu as pltpu


# --------------------------------------------------------------------------
# Small helpers
# --------------------------------------------------------------------------
def _round_up(x, m):
    return ((x + m - 1) // m) * m


def _nbytes(shape, dtype):
    return int(np.prod(shape)) * jnp.dtype(dtype).itemsize


def _pick_tile(total, preferred, align):
    """Largest divisor of `total` that is a multiple of `align` and <= preferred.
    `total` must already be a multiple of `align` (callers pad first), so this
    always succeeds with a bounded, lane/sublane-aligned tile."""
    start = max((min(preferred, total) // align) * align, align)
    for cand in range(start, 0, -align):
        if total % cand == 0:
            return cand
    return align


def _vmem_capacity_bytes():
    try:
        return int(pltpu.get_tpu_info().vmem_capacity_bytes)
    except Exception:
        return 64 << 20   # conservative fallback (v7x per-TensorCore VMEM)


# --------------------------------------------------------------------------
# Kernel A: one LSTM layer per grid step (weights streamed layer-by-layer)
# --------------------------------------------------------------------------
def _lstm_layer_kernel(seq_len, batch, nhid, ninp, in_max,
                       x_ref, h0_ref, c0_ref, wih_ref, whh_ref, bias_ref,
                       out_ref, hn_ref, cn_ref, gates_scr):
    """grid = (nlayers,).  Per grid step:
         x_ref    : (seq, batch, ninp)   bf16   (constant block -> fetched once)
         h0/c0    : (1, batch, H)        f32    (layer slice)
         wih_ref  : (1, in_max, 4H)      bf16   (layer slice, double-buffered)
         whh_ref  : (1, H, 4H)           bf16   (layer slice, double-buffered)
         bias_ref : (1, 1, 4H)           f32    (b_ih + b_hh)
         out_ref  : (seq, batch, H)      bf16   (constant block -> resident;
                                                 doubles as inter-layer buffer)
         hn/cn    : (1, batch, H)        f32
         gates_scr: (seq, batch, 4H)     f32    scratch (persists, overwritten)
    """
    H = nhid
    rows = seq_len * batch
    layer = pl.program_id(0)
    bias = bias_ref[0]                                        # (1, 4H) f32

    # ---- hoisted input projection: one big MXU matmul per layer ------------
    @pl.when(layer == 0)
    def _():
        w = wih_ref[0] if in_max == ninp else wih_ref[0, :ninp, :]
        x2 = x_ref[...].reshape(rows, ninp)                   # bf16
        gx = jnp.dot(x2, w, preferred_element_type=jnp.float32) + bias
        gates_scr[...] = gx.reshape(seq_len, batch, 4 * H)

    @pl.when(layer > 0)
    def _():
        w = wih_ref[0] if in_max == H else wih_ref[0, :H, :]
        prev = out_ref[...].reshape(rows, H)                  # prev layer's hidden seq, bf16
        gx = jnp.dot(prev, w, preferred_element_type=jnp.float32) + bias
        gates_scr[...] = gx.reshape(seq_len, batch, 4 * H)

    # ---- serial recurrence: only h @ Whh is on the dependency chain --------
    def step(t, carry):
        h, c = carry                                          # (batch, H) f32, vreg-resident
        gates = gates_scr[t] + jnp.dot(h.astype(jnp.bfloat16), whh_ref[0],
                                       preferred_element_type=jnp.float32)
        i = jax.nn.sigmoid(gates[:, 0 * H:1 * H])
        f = jax.nn.sigmoid(gates[:, 1 * H:2 * H])
        g = jnp.tanh(gates[:, 2 * H:3 * H])
        o = jax.nn.sigmoid(gates[:, 3 * H:4 * H])
        c_new = f * c + i * g
        h_new = o * jnp.tanh(c_new)
        out_ref[t] = h_new.astype(out_ref.dtype)              # time-indexed, tile-aligned
        return (h_new, c_new)

    unroll = True if seq_len <= 16 else 8
    h_fin, c_fin = lax.fori_loop(0, seq_len, step,
                                 (h0_ref[0], c0_ref[0]), unroll=unroll)
    hn_ref[0] = h_fin
    cn_ref[0] = c_fin


# --------------------------------------------------------------------------
# Kernel B: decoder Linear(nhid, ntoken) -- big matmul, vocab-outer tiling
# --------------------------------------------------------------------------
def _decoder_kernel(h_ref, w_ref, b_ref, out_ref):
    out_ref[...] = (
        jnp.dot(h_ref[...], w_ref[...], preferred_element_type=jnp.float32)
        + b_ref[...]).astype(out_ref.dtype)


# --------------------------------------------------------------------------
# One-time parameter packing (do this at model-setup time, not per call)
# --------------------------------------------------------------------------
def prepare_params(layer_params, w_dec, b_dec, ninp, nhid):
    in_max = max(ninp, nhid)
    wihs, whhs, biases = [], [], []
    for (w_ih, w_hh, b_ih, b_hh) in layer_params:
        w = jnp.asarray(w_ih).T.astype(jnp.bfloat16)               # (in_size, 4H)
        if w.shape[0] < in_max:
            w = jnp.pad(w, ((0, in_max - w.shape[0]), (0, 0)))
        wihs.append(w)
        whhs.append(jnp.asarray(w_hh).T.astype(jnp.bfloat16))      # (H, 4H)
        biases.append((jnp.asarray(b_ih) + jnp.asarray(b_hh))
                      .reshape(1, 4 * nhid).astype(jnp.float32))
    wih_stack = jnp.stack(wihs)         # (L, in_max, 4H) bf16
    whh_stack = jnp.stack(whhs)         # (L, H, 4H)      bf16
    bias_stack = jnp.stack(biases)      # (L, 1, 4H)      f32

    ntoken = int(w_dec.shape[0])
    Vp = _round_up(ntoken, 128)                                    # lane-align vocab
    w_dec_T = jnp.asarray(w_dec).T.astype(jnp.bfloat16)            # (H, V)
    b_dec2 = jnp.asarray(b_dec).astype(jnp.float32)
    if Vp != ntoken:
        w_dec_T = jnp.pad(w_dec_T, ((0, 0), (0, Vp - ntoken)))
        b_dec2 = jnp.pad(b_dec2, (0, Vp - ntoken))
    b_dec2 = b_dec2.reshape(1, Vp)

    return dict(wih=wih_stack, whh=whh_stack, bias=bias_stack,
                w_dec=w_dec_T, b_dec=b_dec2, ntoken=ntoken, in_max=in_max)


# --------------------------------------------------------------------------
# Forward wrapper
# --------------------------------------------------------------------------
def lstm_lm_forward(x, h0, c0, params):
    """Pallas-backed RNNModel.forward (LSTM, eval mode)."""
    seq_len, batch, ninp = x.shape
    nlayers, _, nhid = h0.shape
    in_max = params["in_max"]
    ntoken = params["ntoken"]
    rows = seq_len * batch

    vmem_cap = _vmem_capacity_bytes()
    vmem_budget = int(min(vmem_cap * 0.85, 112 << 20))

    # ---- stacked LSTM: grid over layers, per-layer weight streaming --------
    x_bf = x.astype(jnp.bfloat16)
    h0f = h0.astype(jnp.float32)
    c0f = c0.astype(jnp.float32)

    lstm_need = (
        _nbytes((seq_len, batch, ninp), jnp.bfloat16)              # x (single block)
        + _nbytes((seq_len, batch, nhid), jnp.bfloat16)            # resident out block
        + _nbytes((seq_len, batch, 4 * nhid), jnp.float32)         # gates scratch
        + 2 * (_nbytes((in_max, 4 * nhid), jnp.bfloat16)           # double-buffered weights
               + _nbytes((nhid, 4 * nhid), jnp.bfloat16)
               + _nbytes((1, 4 * nhid), jnp.float32))
        + 8 * _nbytes((batch, nhid), jnp.float32))                 # h0/c0/hn/cn buffers
    lstm_vmem = int(min(max(2 * lstm_need, 8 << 20) + (4 << 20), vmem_budget))

    kernel = functools.partial(_lstm_layer_kernel, seq_len, batch, nhid, ninp, in_max)
    rnn_out, h_n, c_n = pl.pallas_call(
        kernel,
        out_shape=(
            jax.ShapeDtypeStruct((seq_len, batch, nhid), jnp.bfloat16),   # final-layer hidden seq
            jax.ShapeDtypeStruct((nlayers, batch, nhid), jnp.float32),    # h_n
            jax.ShapeDtypeStruct((nlayers, batch, nhid), jnp.float32),    # c_n
        ),
        grid_spec=pltpu.PrefetchScalarGridSpec(
            num_scalar_prefetch=0,
            grid=(nlayers,),
            in_specs=[
                pl.BlockSpec((seq_len, batch, ninp), lambda l: (0, 0, 0)),   # x (constant)
                pl.BlockSpec((1, batch, nhid), lambda l: (l, 0, 0)),         # h0[l]
                pl.BlockSpec((1, batch, nhid), lambda l: (l, 0, 0)),         # c0[l]
                pl.BlockSpec((1, in_max, 4 * nhid), lambda l: (l, 0, 0)),    # Wih[l]
                pl.BlockSpec((1, nhid, 4 * nhid), lambda l: (l, 0, 0)),      # Whh[l]
                pl.BlockSpec((1, 1, 4 * nhid), lambda l: (l, 0, 0)),         # bias[l]
            ],
            out_specs=(
                pl.BlockSpec((seq_len, batch, nhid), lambda l: (0, 0, 0)),   # resident seq buf
                pl.BlockSpec((1, batch, nhid), lambda l: (l, 0, 0)),         # h_n[l]
                pl.BlockSpec((1, batch, nhid), lambda l: (l, 0, 0)),         # c_n[l]
            ),
            scratch_shapes=[pltpu.VMEM((seq_len, batch, 4 * nhid), jnp.float32)],
        ),
        compiler_params=pltpu.CompilerParams(
            dimension_semantics=("arbitrary",),          # layers are sequentially dependent
            vmem_limit_bytes=lstm_vmem),
    )(x_bf, h0f, c0f, params["wih"], params["whh"], params["bias"])

    # ---- decoder: (rows, H) @ (H, Vp), vocab-OUTER grid for weight reuse ---
    if vmem_cap >= (96 << 20):          # v5e / v6e: 128 MiB VMEM -> bigger tiles
        pref_rows, pref_cols = 512, 1024
    else:                               # v7x: 64 MiB per TensorCore
        pref_rows, pref_cols = 256, 512

    h_flat = rnn_out.reshape(rows, nhid)
    rows_p = _round_up(rows, 16)
    if rows_p != rows:
        h_flat = jnp.pad(h_flat, ((0, rows_p - rows), (0, 0)))
    Vp = params["w_dec"].shape[1]

    tile_rows = _pick_tile(rows_p, pref_rows, 16)
    tile_cols = _pick_tile(Vp, pref_cols, 128)
    grid = (Vp // tile_cols, rows_p // tile_rows)       # vocab outer, rows inner

    dec_need = 2 * (_nbytes((tile_rows, nhid), jnp.bfloat16)
                    + _nbytes((nhid, tile_cols), jnp.bfloat16)
                    + _nbytes((1, tile_cols), jnp.float32)
                    + _nbytes((tile_rows, tile_cols), jnp.float32))
    dec_vmem = int(min(max(2 * dec_need, 8 << 20) + (4 << 20), vmem_budget))

    decoded_pad = pl.pallas_call(
        _decoder_kernel,
        out_shape=jax.ShapeDtypeStruct((rows_p, Vp), jnp.float32),
        grid_spec=pltpu.PrefetchScalarGridSpec(
            num_scalar_prefetch=0,
            grid=grid,
            in_specs=[
                pl.BlockSpec((tile_rows, nhid), lambda j, i: (i, 0)),   # activations (re-streamed)
                pl.BlockSpec((nhid, tile_cols), lambda j, i: (0, j)),   # W column tile (reused)
                pl.BlockSpec((1, tile_cols), lambda j, i: (0, j)),      # bias tile (reused)
            ],
            out_specs=pl.BlockSpec((tile_rows, tile_cols), lambda j, i: (i, j)),
        ),
        compiler_params=pltpu.CompilerParams(
            dimension_semantics=("parallel", "parallel"),
            vmem_limit_bytes=dec_vmem),
    )(h_flat, params["w_dec"], params["b_dec"])

    decoded = decoded_pad[:rows, :ntoken].reshape(seq_len, batch, ntoken)
    return decoded, h_n, c_n


# --------------------------------------------------------------------------
# Pure-JAX reference (f32) matching torch.nn.LSTM + Linear (eval mode)
# --------------------------------------------------------------------------
def reference_forward(x, h0, c0, layer_params, w_dec, b_dec):
    seq_len = x.shape[0]
    nlayers, _, H = h0.shape
    inp = x
    hn, cn = [], []
    for layer, (w_ih, w_hh, b_ih, b_hh) in enumerate(layer_params):
        h, c = h0[layer], c0[layer]
        outs = []
        for t in range(seq_len):
            gates = (inp[t] @ w_ih.T + b_ih + h @ w_hh.T + b_hh)
            i = jax.nn.sigmoid(gates[:, 0 * H:1 * H])
            f = jax.nn.sigmoid(gates[:, 1 * H:2 * H])
            g = jnp.tanh(gates[:, 2 * H:3 * H])
            o = jax.nn.sigmoid(gates[:, 3 * H:4 * H])
            c = f * c + i * g
            h = o * jnp.tanh(c)
            outs.append(h)
        inp = jnp.stack(outs, axis=0)
        hn.append(h)
        cn.append(c)
    decoded = inp @ w_dec.T + b_dec
    return decoded, jnp.stack(hn), jnp.stack(cn)


if __name__ == "__main__":
    # Small, TPU-friendly shapes consistent with the module's forward.
    seq_len, batch = 8, 8
    ninp = nhid = 128          # emsize == nhid (what tie_weights would need)
    ntoken = 200               # non-multiple of 128 -> exercises vocab padding path
    nlayers = 2

    key = jax.random.PRNGKey(0)
    k_x, k_h, k_c, k_dec, k_layers = jax.random.split(key, 5)

    # "Embedded" input sequence (encoder is never applied in forward).
    x = jax.random.normal(k_x, (seq_len, batch, ninp), dtype=jnp.float32)
    h0 = 0.1 * jax.random.normal(k_h, (nlayers, batch, nhid), dtype=jnp.float32)
    c0 = 0.1 * jax.random.normal(k_c, (nlayers, batch, nhid), dtype=jnp.float32)

    # LSTM parameters: PyTorch default init uniform(-1/sqrt(nhid), 1/sqrt(nhid)).
    stdv = 1.0 / float(np.sqrt(nhid))
    layer_params = []
    lkeys = jax.random.split(k_layers, nlayers * 4)
    for layer in range(nlayers):
        in_size = ninp if layer == 0 else nhid
        kw_ih, kw_hh, kb_ih, kb_hh = lkeys[4 * layer:4 * layer + 4]
        w_ih = jax.random.uniform(kw_ih, (4 * nhid, in_size), jnp.float32, -stdv, stdv)
        w_hh = jax.random.uniform(kw_hh, (4 * nhid, nhid), jnp.float32, -stdv, stdv)
        b_ih = jax.random.uniform(kb_ih, (4 * nhid,), jnp.float32, -stdv, stdv)
        b_hh = jax.random.uniform(kb_hh, (4 * nhid,), jnp.float32, -stdv, stdv)
        layer_params.append((w_ih, w_hh, b_ih, b_hh))

    # Decoder: init_weights() -> weight uniform(-0.1, 0.1), bias zeros.
    w_dec = jax.random.uniform(k_dec, (ntoken, nhid), jnp.float32, -0.1, 0.1)
    b_dec = jnp.zeros((ntoken,), dtype=jnp.float32)

    # One-time parameter packing (transpose / cast / stack / pad).
    params = prepare_params(layer_params, w_dec, b_dec, ninp, nhid)

    decoded, h_n, c_n = lstm_lm_forward(x, h0, c0, params)
    jax.block_until_ready((decoded, h_n, c_n))

    # Correctness check against a pure-f32 reference. Kernel matmuls run with
    # bf16 operands (f32 accumulation), so allow a slightly wider tolerance.
    ref_dec, ref_h, ref_c = reference_forward(x, h0, c0, layer_params, w_dec, b_dec)
    np.testing.assert_allclose(np.asarray(decoded), np.asarray(ref_dec), rtol=2e-2, atol=2e-2)
    np.testing.assert_allclose(np.asarray(h_n), np.asarray(ref_h), rtol=2e-2, atol=2e-2)
    np.testing.assert_allclose(np.asarray(c_n), np.asarray(ref_c), rtol=2e-2, atol=2e-2)

    print("KERNEL_OK")
</pallas_src>

<mosaic_0001>
module attributes {stable_mosaic.version = 11 : i64} {
  func.func @_lstm_layer_kernel(%arg0: i32, %arg1: memref<8x8x128xbf16, #tpu.memory_space<vmem>>, %arg2: memref<1x8x128xf32, #tpu.memory_space<vmem>>, %arg3: memref<1x8x128xf32, #tpu.memory_space<vmem>>, %arg4: memref<1x128x512xbf16, #tpu.memory_space<vmem>>, %arg5: memref<1x128x512xbf16, #tpu.memory_space<vmem>>, %arg6: memref<1x1x512xf32, #tpu.memory_space<vmem>>, %arg7: memref<8x8x128xbf16, #tpu.memory_space<vmem>>, %arg8: memref<1x8x128xf32, #tpu.memory_space<vmem>>, %arg9: memref<1x8x128xf32, #tpu.memory_space<vmem>>, %arg10: memref<8x8x512xf32, #tpu.memory_space<vmem>>) attributes {dimension_semantics = [#tpu.dimension_semantics<arbitrary>], iteration_bounds = array<i64: 2>, scalar_prefetch = 0 : i64, scratch_operands = 1 : i64, tpu.core_type = #tpu.core_type<tc>, window_params = [{pipeline_mode = #tpu.pipeline_mode<synchronous>, transform_indices = @transform_0, window_bounds = array<i64: 8, 8, 128>}, {transform_indices = @transform_1, window_bounds = array<i64: 1, 8, 128>}, {transform_indices = @transform_2, window_bounds = array<i64: 1, 8, 128>}, {transform_indices = @transform_3, window_bounds = array<i64: 1, 128, 512>}, {transform_indices = @transform_4, window_bounds = array<i64: 1, 128, 512>}, {transform_indices = @transform_5, window_bounds = array<i64: 1, 1, 512>}, {pipeline_mode = #tpu.pipeline_mode<synchronous>, transform_indices = @transform_6, window_bounds = array<i64: 8, 8, 128>}, {transform_indices = @transform_7, window_bounds = array<i64: 1, 8, 128>}, {transform_indices = @transform_8, window_bounds = array<i64: 1, 8, 128>}]} {
    %c0 = arith.constant 0 : index
    %c0_0 = arith.constant 0 : index
    %c0_1 = arith.constant 0 : index
    %0 = vector.load %arg6[%c0, %c0_0, %c0_1] : memref<1x1x512xf32, #tpu.memory_space<vmem>>, vector<1x1x512xf32>
    %1 = vector.shape_cast %0 : vector<1x1x512xf32> to vector<1x512xf32>
    %c0_i32 = arith.constant 0 : i32
    %2 = arith.cmpi eq, %arg0, %c0_i32 : i32
    %3 = arith.extui %2 : i1 to i32
    %c0_i32_2 = arith.constant 0 : i32
    %4 = arith.cmpi ne, %3, %c0_i32_2 : i32
    scf.if %4 {
      %c0_105 = arith.constant 0 : index
      %c0_106 = arith.constant 0 : index
      %c0_107 = arith.constant 0 : index
      %322 = vector.load %arg4[%c0_105, %c0_106, %c0_107] : memref<1x128x512xbf16, #tpu.memory_space<vmem>>, vector<1x128x512xbf16>
      %323 = vector.shape_cast %322 : vector<1x128x512xbf16> to vector<128x512xbf16>
      %c0_108 = arith.constant 0 : index
      %c0_109 = arith.constant 0 : index
      %c0_110 = arith.constant 0 : index
      %324 = vector.load %arg1[%c0_108, %c0_109, %c0_110] : memref<8x8x128xbf16, #tpu.memory_space<vmem>>, vector<8x8x128xbf16>
      %325 = vector.shape_cast %324 : vector<8x8x128xbf16> to vector<64x128xbf16>
      %cst_111 = arith.constant dense<0.000000e+00> : vector<64x512xf32>
      %326 = tpu.matmul %325, %323, %cst_111 {dimension_numbers = #tpu.dot_dimension_numbers<[1], [0], [0], [1], [0, 0, 1, 1], [], []>} : vector<64x128xbf16>, vector<128x512xbf16>, vector<64x512xf32> -> vector<64x512xf32>
      %327 = vector.broadcast %1 : vector<1x512xf32> to vector<64x512xf32>
      %328 = arith.addf %326, %327 : vector<64x512xf32>
      %329 = vector.shape_cast %328 : vector<64x512xf32> to vector<8x8x512xf32>
      %c0_112 = arith.constant 0 : index
      %c0_113 = arith.constant 0 : index
      %c0_114 = arith.constant 0 : index
      %330 = vector.load %arg10[%c0_112, %c0_113, %c0_114] : memref<8x8x512xf32, #tpu.memory_space<vmem>>, vector<8x8x512xf32>
      tpu.vector_store %arg10[%c0_112, %c0_113, %c0_114], %329 {strides = array<i32>} : memref<8x8x512xf32, #tpu.memory_space<vmem>>, vector<8x8x512xf32>,
    } else {
    }
    %c0_i32_3 = arith.constant 0 : i32
    %5 = arith.cmpi sgt, %arg0, %c0_i32_3 : i32
    %6 = arith.extui %5 : i1 to i32
    %c0_i32_4 = arith.constant 0 : i32
    %7 = arith.cmpi ne, %6, %c0_i32_4 : i32
    scf.if %7 {
      %c0_105 = arith.constant 0 : index
      %c0_106 = arith.constant 0 : index
      %c0_107 = arith.constant 0 : index
      %322 = vector.load %arg4[%c0_105, %c0_106, %c0_107] : memref<1x128x512xbf16, #tpu.memory_space<vmem>>, vector<1x128x512xbf16>
      %323 = vector.shape_cast %322 : vector<1x128x512xbf16> to vector<128x512xbf16>
      %c0_108 = arith.constant 0 : index
      %c0_109 = arith.constant 0 : index
      %c0_110 = arith.constant 0 : index
      %324 = vector.load %arg7[%c0_108, %c0_109, %c0_110] : memref<8x8x128xbf16, #tpu.memory_space<vmem>>, vector<8x8x128xbf16>
      %325 = vector.shape_cast %324 : vector<8x8x128xbf16> to vector<64x128xbf16>
      %cst_111 = arith.constant dense<0.000000e+00> : vector<64x512xf32>
      %326 = tpu.matmul %325, %323, %cst_111 {dimension_numbers = #tpu.dot_dimension_numbers<[1], [0], [0], [1], [0, 0, 1, 1], [], []>} : vector<64x128xbf16>, vector<128x512xbf16>, vector<64x512xf32> -> vector<64x512xf32>
      %327 = vector.broadcast %1 : vector<1x512xf32> to vector<64x512xf32>
      %328 = arith.addf %326, %327 : vector<64x512xf32>
      %329 = vector.shape_cast %328 : vector<64x512xf32> to vector<8x8x512xf32>
      %c0_112 = arith.constant 0 : index
      %c0_113 = arith.constant 0 : index
      %c0_114 = arith.constant 0 : index
      %330 = vector.load %arg10[%c0_112, %c0_113, %c0_114] : memref<8x8x512xf32, #tpu.memory_space<vmem>>, vector<8x8x512xf32>
      tpu.vector_store %arg10[%c0_112, %c0_113, %c0_114], %329 {strides = array<i32>} : memref<8x8x512xf32, #tpu.memory_space<vmem>>, vector<8x8x512xf32>,
    } else {
    }
    %c0_5 = arith.constant 0 : index
    %c0_6 = arith.constant 0 : index
    %c0_7 = arith.constant 0 : index
    %8 = vector.load %arg2[%c0_5, %c0_6, %c0_7] : memref<1x8x128xf32, #tpu.memory_space<vmem>>, vector<1x8x128xf32>
    %9 = vector.shape_cast %8 : vector<1x8x128xf32> to vector<8x128xf32>
    %c0_8 = arith.constant 0 : index
    %c0_9 = arith.constant 0 : index
    %c0_10 = arith.constant 0 : index
    %10 = vector.load %arg3[%c0_8, %c0_9, %c0_10] : memref<1x8x128xf32, #tpu.memory_space<vmem>>, vector<1x8x128xf32>
    %11 = vector.shape_cast %10 : vector<1x8x128xf32> to vector<8x128xf32>
    %c0_i32_11 = arith.constant 0 : i32
    %12 = arith.index_cast %c0_i32_11 : i32 to index
    %c0_12 = arith.constant 0 : index
    %c0_13 = arith.constant 0 : index
    %13 = vector.load %arg10[%12, %c0_12, %c0_13] : memref<8x8x512xf32, #tpu.memory_space<vmem>>, vector<1x8x512xf32>
    %14 = vector.shape_cast %13 : vector<1x8x512xf32> to vector<8x512xf32>
    %15 = arith.truncf %9 : vector<8x128xf32> to vector<8x128xbf16>
    %c0_14 = arith.constant 0 : index
    %c0_15 = arith.constant 0 : index
    %c0_16 = arith.constant 0 : index
    %16 = vector.load %arg5[%c0_14, %c0_15, %c0_16] : memref<1x128x512xbf16, #tpu.memory_space<vmem>>, vector<1x128x512xbf16>
    %17 = vector.shape_cast %16 : vector<1x128x512xbf16> to vector<128x512xbf16>
    %cst = arith.constant dense<0.000000e+00> : vector<8x512xf32>
    %18 = tpu.matmul %15, %17, %cst {dimension_numbers = #tpu.dot_dimension_numbers<[1], [0], [0], [1], [0, 0, 1, 1], [], []>} : vector<8x128xbf16>, vector<128x512xbf16>, vector<8x512xf32> -> vector<8x512xf32>
    %19 = arith.addf %14, %18 : vector<8x512xf32>
    %20 = vector.extract_strided_slice %19 {offsets = [0, 0], sizes = [8, 128], strides = [1, 1]} : vector<8x512xf32> to vector<8x128xf32>
    %21 = arith.negf %20 : vector<8x128xf32>
    %22 = math.exp %21 : vector<8x128xf32>
    %cst_17 = arith.constant 1.000000e+00 : f32
    %23 = vector.broadcast %cst_17 : f32 to vector<8x128xf32>
    %24 = arith.addf %23, %22 : vector<8x128xf32>
    %25 = arith.divf %23, %24 : vector<8x128xf32>
    %26 = vector.extract_strided_slice %19 {offsets = [0, 128], sizes = [8, 128], strides = [1, 1]} : vector<8x512xf32> to vector<8x128xf32>
    %27 = arith.negf %26 : vector<8x128xf32>
    %28 = math.exp %27 : vector<8x128xf32>
    %cst_18 = arith.constant 1.000000e+00 : f32
    %29 = vector.broadcast %cst_18 : f32 to vector<8x128xf32>
    %30 = arith.addf %29, %28 : vector<8x128xf32>
    %31 = arith.divf %29, %30 : vector<8x128xf32>
    %32 = vector.extract_strided_slice %19 {offsets = [0, 256], sizes = [8, 128], strides = [1, 1]} : vector<8x512xf32> to vector<8x128xf32>
    %33 = math.tanh %32 : vector<8x128xf32>
    %34 = vector.extract_strided_slice %19 {offsets = [0, 384], sizes = [8, 128], strides = [1, 1]} : vector<8x512xf32> to vector<8x128xf32>
    %35 = arith.negf %34 : vector<8x128xf32>
    %36 = math.exp %35 : vector<8x128xf32>
    %cst_19 = arith.constant 1.000000e+00 : f32
    %37 = vector.broadcast %cst_19 : f32 to vector<8x128xf32>
    %38 = arith.addf %37, %36 : vector<8x128xf32>
    %39 = arith.divf %37, %38 : vector<8x128xf32>
    %40 = arith.mulf %31, %11 : vector<8x128xf32>
    %41 = arith.mulf %25, %33 : vector<8x128xf32>
    %42 = arith.addf %40, %41 : vector<8x128xf32>
    %43 = math.tanh %42 : vector<8x128xf32>
    %44 = arith.mulf %39, %43 : vector<8x128xf32>
    %45 = arith.truncf %44 : vector<8x128xf32> to vector<8x128xbf16>
    %46 = arith.index_cast %c0_i32_11 : i32 to index
    %c0_20 = arith.constant 0 : index
    %c0_21 = arith.constant 0 : index
    %47 = vector.load %arg7[%46, %c0_20, %c0_21] : memref<8x8x128xbf16, #tpu.memory_space<vmem>>, vector<1x8x128xbf16>
    %48 = vector.shape_cast %47 : vector<1x8x128xbf16> to vector<8x128xbf16>
    %49 = vector.shape_cast %45 : vector<8x128xbf16> to vector<1x8x128xbf16>
    tpu.vector_store %arg7[%46, %c0_20, %c0_21], %49 {strides = array<i32>} : memref<8x8x128xbf16, #tpu.memory_space<vmem>>, vector<1x8x128xbf16>,
    %c1_i32 = arith.constant 1 : i32
    %50 = arith.index_cast %c1_i32 : i32 to index
    %c0_22 = arith.constant 0 : index
    %c0_23 = arith.constant 0 : index
    %51 = vector.load %arg10[%50, %c0_22, %c0_23] : memref<8x8x512xf32, #tpu.memory_space<vmem>>, vector<1x8x512xf32>
    %52 = vector.shape_cast %51 : vector<1x8x512xf32> to vector<8x512xf32>
    %53 = arith.truncf %44 : vector<8x128xf32> to vector<8x128xbf16>
    %c0_24 = arith.constant 0 : index
    %c0_25 = arith.constant 0 : index
    %c0_26 = arith.constant 0 : index
    %54 = vector.load %arg5[%c0_24, %c0_25, %c0_26] : memref<1x128x512xbf16, #tpu.memory_space<vmem>>, vector<1x128x512xbf16>
    %55 = vector.shape_cast %54 : vector<1x128x512xbf16> to vector<128x512xbf16>
    %cst_27 = arith.constant dense<0.000000e+00> : vector<8x512xf32>
    %56 = tpu.matmul %53, %55, %cst_27 {dimension_numbers = #tpu.dot_dimension_numbers<[1], [0], [0], [1], [0, 0, 1, 1], [], []>} : vector<8x128xbf16>, vector<128x512xbf16>, vector<8x512xf32> -> vector<8x512xf32>
    %57 = arith.addf %52, %56 : vector<8x512xf32>
    %58 = vector.extract_strided_slice %57 {offsets = [0, 0], sizes = [8, 128], strides = [1, 1]} : vector<8x512xf32> to vector<8x128xf32>
    %59 = arith.negf %58 : vector<8x128xf32>
    %60 = math.exp %59 : vector<8x128xf32>
    %cst_28 = arith.constant 1.000000e+00 : f32
    %61 = vector.broadcast %cst_28 : f32 to vector<8x128xf32>
    %62 = arith.addf %61, %60 : vector<8x128xf32>
    %63 = arith.divf %61, %62 : vector<8x128xf32>
    %64 = vector.extract_strided_slice %57 {offsets = [0, 128], sizes = [8, 128], strides = [1, 1]} : vector<8x512xf32> to vector<8x128xf32>
    %65 = arith.negf %64 : vector<8x128xf32>
    %66 = math.exp %65 : vector<8x128xf32>
    %cst_29 = arith.constant 1.000000e+00 : f32
    %67 = vector.broadcast %cst_29 : f32 to vector<8x128xf32>
    %68 = arith.addf %67, %66 : vector<8x128xf32>
    %69 = arith.divf %67, %68 : vector<8x128xf32>
    %70 = vector.extract_strided_slice %57 {offsets = [0, 256], sizes = [8, 128], strides = [1, 1]} : vector<8x512xf32> to vector<8x128xf32>
    %71 = math.tanh %70 : vector<8x128xf32>
    %72 = vector.extract_strided_slice %57 {offsets = [0, 384], sizes = [8, 128], strides = [1, 1]} : vector<8x512xf32> to vector<8x128xf32>
    %73 = arith.negf %72 : vector<8x128xf32>
    %74 = math.exp %73 : vector<8x128xf32>
    %cst_30 = arith.constant 1.000000e+00 : f32
    %75 = vector.broadcast %cst_30 : f32 to vector<8x128xf32>
    %76 = arith.addf %75, %74 : vector<8x128xf32>
    %77 = arith.divf %75, %76 : vector<8x128xf32>
    %78 = arith.mulf %69, %42 : vector<8x128xf32>
    %79 = arith.mulf %63, %71 : vector<8x128xf32>
    %80 = arith.addf %78, %79 : vector<8x128xf32>
    %81 = math.tanh %80 : vector<8x128xf32>
    %82 = arith.mulf %77, %81 : vector<8x128xf32>
    %83 = arith.truncf %82 : vector<8x128xf32> to vector<8x128xbf16>
    %84 = arith.index_cast %c1_i32 : i32 to index
    %c0_31 = arith.constant 0 : index
    %c0_32 = arith.constant 0 : index
    %85 = vector.load %arg7[%84, %c0_31, %c0_32] : memref<8x8x128xbf16, #tpu.memory_space<vmem>>, vector<1x8x128xbf16>
    %86 = vector.shape_cast %85 : vector<1x8x128xbf16> to vector<8x128xbf16>
    %87 = vector.shape_cast %83 : vector<8x128xbf16> to vector<1x8x128xbf16>
    tpu.vector_store %arg7[%84, %c0_31, %c0_32], %87 {strides = array<i32>} : memref<8x8x128xbf16, #tpu.memory_space<vmem>>, vector<1x8x128xbf16>,
    %c2_i32 = arith.constant 2 : i32
    %88 = arith.index_cast %c2_i32 : i32 to index
    %c0_33 = arith.constant 0 : index
    %c0_34 = arith.constant 0 : index
    %89 = vector.load %arg10[%88, %c0_33, %c0_34] : memref<8x8x512xf32, #tpu.memory_space<vmem>>, vector<1x8x512xf32>
    %90 = vector.shape_cast %89 : vector<1x8x512xf32> to vector<8x512xf32>
    %91 = arith.truncf %82 : vector<8x128xf32> to vector<8x128xbf16>
    %c0_35 = arith.constant 0 : index
    %c0_36 = arith.constant 0 : index
    %c0_37 = arith.constant 0 : index
    %92 = vector.load %arg5[%c0_35, %c0_36, %c0_37] : memref<1x128x512xbf16, #tpu.memory_space<vmem>>, vector<1x128x512xbf16>
    %93 = vector.shape_cast %92 : vector<1x128x512xbf16> to vector<128x512xbf16>
    %cst_38 = arith.constant dense<0.000000e+00> : vector<8x512xf32>
    %94 = tpu.matmul %91, %93, %cst_38 {dimension_numbers = #tpu.dot_dimension_numbers<[1], [0], [0], [1], [0, 0, 1, 1], [], []>} : vector<8x128xbf16>, vector<128x512xbf16>, vector<8x512xf32> -> vector<8x512xf32>
    %95 = arith.addf %90, %94 : vector<8x512xf32>
    %96 = vector.extract_strided_slice %95 {offsets = [0, 0], sizes = [8, 128], strides = [1, 1]} : vector<8x512xf32> to vector<8x128xf32>
    %97 = arith.negf %96 : vector<8x128xf32>
    %98 = math.exp %97 : vector<8x128xf32>
    %cst_39 = arith.constant 1.000000e+00 : f32
    %99 = vector.broadcast %cst_39 : f32 to vector<8x128xf32>
    %100 = arith.addf %99, %98 : vector<8x128xf32>
    %101 = arith.divf %99, %100 : vector<8x128xf32>
    %102 = vector.extract_strided_slice %95 {offsets = [0, 128], sizes = [8, 128], strides = [1, 1]} : vector<8x512xf32> to vector<8x128xf32>
    %103 = arith.negf %102 : vector<8x128xf32>
    %104 = math.exp %103 : vector<8x128xf32>
    %cst_40 = arith.constant 1.000000e+00 : f32
    %105 = vector.broadcast %cst_40 : f32 to vector<8x128xf32>
    %106 = arith.addf %105, %104 : vector<8x128xf32>
    %107 = arith.divf %105, %106 : vector<8x128xf32>
    %108 = vector.extract_strided_slice %95 {offsets = [0, 256], sizes = [8, 128], strides = [1, 1]} : vector<8x512xf32> to vector<8x128xf32>
    %109 = math.tanh %108 : vector<8x128xf32>
    %110 = vector.extract_strided_slice %95 {offsets = [0, 384], sizes = [8, 128], strides = [1, 1]} : vector<8x512xf32> to vector<8x128xf32>
    %111 = arith.negf %110 : vector<8x128xf32>
    %112 = math.exp %111 : vector<8x128xf32>
    %cst_41 = arith.constant 1.000000e+00 : f32
    %113 = vector.broadcast %cst_41 : f32 to vector<8x128xf32>
    %114 = arith.addf %113, %112 : vector<8x128xf32>
    %115 = arith.divf %113, %114 : vector<8x128xf32>
    %116 = arith.mulf %107, %80 : vector<8x128xf32>
    %117 = arith.mulf %101, %109 : vector<8x128xf32>
    %118 = arith.addf %116, %117 : vector<8x128xf32>
    %119 = math.tanh %118 : vector<8x128xf32>
    %120 = arith.mulf %115, %119 : vector<8x128xf32>
    %121 = arith.truncf %120 : vector<8x128xf32> to vector<8x128xbf16>
    %122 = arith.index_cast %c2_i32 : i32 to index
    %c0_42 = arith.constant 0 : index
    %c0_43 = arith.constant 0 : index
    %123 = vector.load %arg7[%122, %c0_42, %c0_43] : memref<8x8x128xbf16, #tpu.memory_space<vmem>>, vector<1x8x128xbf16>
    %124 = vector.shape_cast %123 : vector<1x8x128xbf16> to vector<8x128xbf16>
    %125 = vector.shape_cast %121 : vector<8x128xbf16> to vector<1x8x128xbf16>
    tpu.vector_store %arg7[%122, %c0_42, %c0_43], %125 {strides = array<i32>} : memref<8x8x128xbf16, #tpu.memory_space<vmem>>, vector<1x8x128xbf16>,
    %c3_i32 = arith.constant 3 : i32
    %126 = arith.index_cast %c3_i32 : i32 to index
    %c0_44 = arith.constant 0 : index
    %c0_45 = arith.constant 0 : index
    %127 = vector.load %arg10[%126, %c0_44, %c0_45] : memref<8x8x512xf32, #tpu.memory_space<vmem>>, vector<1x8x512xf32>
    %128 = vector.shape_cast %127 : vector<1x8x512xf32> to vector<8x512xf32>
    %129 = arith.truncf %120 : vector<8x128xf32> to vector<8x128xbf16>
    %c0_46 = arith.constant 0 : index
    %c0_47 = arith.constant 0 : index
    %c0_48 = arith.constant 0 : index
    %130 = vector.load %arg5[%c0_46, %c0_47, %c0_48] : memref<1x128x512xbf16, #tpu.memory_space<vmem>>, vector<1x128x512xbf16>
    %131 = vector.shape_cast %130 : vector<1x128x512xbf16> to vector<128x512xbf16>
    %cst_49 = arith.constant dense<0.000000e+00> : vector<8x512xf32>
    %132 = tpu.matmul %129, %131, %cst_49 {dimension_numbers = #tpu.dot_dimension_numbers<[1], [0], [0], [1], [0, 0, 1, 1], [], []>} : vector<8x128xbf16>, vector<128x512xbf16>, vector<8x512xf32> -> vector<8x512xf32>
    %133 = arith.addf %128, %132 : vector<8x512xf32>
    %134 = vector.extract_strided_slice %133 {offsets = [0, 0], sizes = [8, 128], strides = [1, 1]} : vector<8x512xf32> to vector<8x128xf32>
    %135 = arith.negf %134 : vector<8x128xf32>
    %136 = math.exp %135 : vector<8x128xf32>
    %cst_50 = arith.constant 1.000000e+00 : f32
    %137 = vector.broadcast %cst_50 : f32 to vector<8x128xf32>
    %138 = arith.addf %137, %136 : vector<8x128xf32>
    %139 = arith.divf %137, %138 : vector<8x128xf32>
    %140 = vector.extract_strided_slice %133 {offsets = [0, 128], sizes = [8, 128], strides = [1, 1]} : vector<8x512xf32> to vector<8x128xf32>
    %141 = arith.negf %140 : vector<8x128xf32>
    %142 = math.exp %141 : vector<8x128xf32>
    %cst_51 = arith.constant 1.000000e+00 : f32
    %143 = vector.broadcast %cst_51 : f32 to vector<8x128xf32>
    %144 = arith.addf %143, %142 : vector<8x128xf32>
    %145 = arith.divf %143, %144 : vector<8x128xf32>
    %146 = vector.extract_strided_slice %133 {offsets = [0, 256], sizes = [8, 128], strides = [1, 1]} : vector<8x512xf32> to vector<8x128xf32>
    %147 = math.tanh %146 : vector<8x128xf32>
    %148 = vector.extract_strided_slice %133 {offsets = [0, 384], sizes = [8, 128], strides = [1, 1]} : vector<8x512xf32> to vector<8x128xf32>
    %149 = arith.negf %148 : vector<8x128xf32>
    %150 = math.exp %149 : vector<8x128xf32>
    %cst_52 = arith.constant 1.000000e+00 : f32
    %151 = vector.broadcast %cst_52 : f32 to vector<8x128xf32>
    %152 = arith.addf %151, %150 : vector<8x128xf32>
    %153 = arith.divf %151, %152 : vector<8x128xf32>
    %154 = arith.mulf %145, %118 : vector<8x128xf32>
    %155 = arith.mulf %139, %147 : vector<8x128xf32>
    %156 = arith.addf %154, %155 : vector<8x128xf32>
    %157 = math.tanh %156 : vector<8x128xf32>
    %158 = arith.mulf %153, %157 : vector<8x128xf32>
    %159 = arith.truncf %158 : vector<8x128xf32> to vector<8x128xbf16>
    %160 = arith.index_cast %c3_i32 : i32 to index
    %c0_53 = arith.constant 0 : index
    %c0_54 = arith.constant 0 : index
    %161 = vector.load %arg7[%160, %c0_53, %c0_54] : memref<8x8x128xbf16, #tpu.memory_space<vmem>>, vector<1x8x128xbf16>
    %162 = vector.shape_cast %161 : vector<1x8x128xbf16> to vector<8x128xbf16>
    %163 = vector.shape_cast %159 : vector<8x128xbf16> to vector<1x8x128xbf16>
    tpu.vector_store %arg7[%160, %c0_53, %c0_54], %163 {strides = array<i32>} : memref<8x8x128xbf16, #tpu.memory_space<vmem>>, vector<1x8x128xbf16>,
    %c4_i32 = arith.constant 4 : i32
    %164 = arith.index_cast %c4_i32 : i32 to index
    %c0_55 = arith.constant 0 : index
    %c0_56 = arith.constant 0 : index
    %165 = vector.load %arg10[%164, %c0_55, %c0_56] : memref<8x8x512xf32, #tpu.memory_space<vmem>>, vector<1x8x512xf32>
    %166 = vector.shape_cast %165 : vector<1x8x512xf32> to vector<8x512xf32>
    %167 = arith.truncf %158 : vector<8x128xf32> to vector<8x128xbf16>
    %c0_57 = arith.constant 0 : index
    %c0_58 = arith.constant 0 : index
    %c0_59 = arith.constant 0 : index
    %168 = vector.load %arg5[%c0_57, %c0_58, %c0_59] : memref<1x128x512xbf16, #tpu.memory_space<vmem>>, vector<1x128x512xbf16>
    %169 = vector.shape_cast %168 : vector<1x128x512xbf16> to vector<128x512xbf16>
    %cst_60 = arith.constant dense<0.000000e+00> : vector<8x512xf32>
    %170 = tpu.matmul %167, %169, %cst_60 {dimension_numbers = #tpu.dot_dimension_numbers<[1], [0], [0], [1], [0, 0, 1, 1], [], []>} : vector<8x128xbf16>, vector<128x512xbf16>, vector<8x512xf32> -> vector<8x512xf32>
    %171 = arith.addf %166, %170 : vector<8x512xf32>
    %172 = vector.extract_strided_slice %171 {offsets = [0, 0], sizes = [8, 128], strides = [1, 1]} : vector<8x512xf32> to vector<8x128xf32>
    %173 = arith.negf %172 : vector<8x128xf32>
    %174 = math.exp %173 : vector<8x128xf32>
    %cst_61 = arith.constant 1.000000e+00 : f32
    %175 = vector.broadcast %cst_61 : f32 to vector<8x128xf32>
    %176 = arith.addf %175, %174 : vector<8x128xf32>
    %177 = arith.divf %175, %176 : vector<8x128xf32>
    %178 = vector.extract_strided_slice %171 {offsets = [0, 128], sizes = [8, 128], strides = [1, 1]} : vector<8x512xf32> to vector<8x128xf32>
    %179 = arith.negf %178 : vector<8x128xf32>
    %180 = math.exp %179 : vector<8x128xf32>
    %cst_62 = arith.constant 1.000000e+00 : f32
    %181 = vector.broadcast %cst_62 : f32 to vector<8x128xf32>
    %182 = arith.addf %181, %180 : vector<8x128xf32>
    %183 = arith.divf %181, %182 : vector<8x128xf32>
    %184 = vector.extract_strided_slice %171 {offsets = [0, 256], sizes = [8, 128], strides = [1, 1]} : vector<8x512xf32> to vector<8x128xf32>
    %185 = math.tanh %184 : vector<8x128xf32>
    %186 = vector.extract_strided_slice %171 {offsets = [0, 384], sizes = [8, 128], strides = [1, 1]} : vector<8x512xf32> to vector<8x128xf32>
    %187 = arith.negf %186 : vector<8x128xf32>
    %188 = math.exp %187 : vector<8x128xf32>
    %cst_63 = arith.constant 1.000000e+00 : f32
    %189 = vector.broadcast %cst_63 : f32 to vector<8x128xf32>
    %190 = arith.addf %189, %188 : vector<8x128xf32>
    %191 = arith.divf %189, %190 : vector<8x128xf32>
    %192 = arith.mulf %183, %156 : vector<8x128xf32>
    %193 = arith.mulf %177, %185 : vector<8x128xf32>
    %194 = arith.addf %192, %193 : vector<8x128xf32>
    %195 = math.tanh %194 : vector<8x128xf32>
    %196 = arith.mulf %191, %195 : vector<8x128xf32>
    %197 = arith.truncf %196 : vector<8x128xf32> to vector<8x128xbf16>
    %198 = arith.index_cast %c4_i32 : i32 to index
    %c0_64 = arith.constant 0 : index
    %c0_65 = arith.constant 0 : index
    %199 = vector.load %arg7[%198, %c0_64, %c0_65] : memref<8x8x128xbf16, #tpu.memory_space<vmem>>, vector<1x8x128xbf16>
    %200 = vector.shape_cast %199 : vector<1x8x128xbf16> to vector<8x128xbf16>
    %201 = vector.shape_cast %197 : vector<8x128xbf16> to vector<1x8x128xbf16>
    tpu.vector_store %arg7[%198, %c0_64, %c0_65], %201 {strides = array<i32>} : memref<8x8x128xbf16, #tpu.memory_space<vmem>>, vector<1x8x128xbf16>,
    %c5_i32 = arith.constant 5 : i32
    %202 = arith.index_cast %c5_i32 : i32 to index
    %c0_66 = arith.constant 0 : index
    %c0_67 = arith.constant 0 : index
    %203 = vector.load %arg10[%202, %c0_66, %c0_67] : memref<8x8x512xf32, #tpu.memory_space<vmem>>, vector<1x8x512xf32>
    %204 = vector.shape_cast %203 : vector<1x8x512xf32> to vector<8x512xf32>
    %205 = arith.truncf %196 : vector<8x128xf32> to vector<8x128xbf16>
    %c0_68 = arith.constant 0 : index
    %c0_69 = arith.constant 0 : index
    %c0_70 = arith.constant 0 : index
    %206 = vector.load %arg5[%c0_68, %c0_69, %c0_70] : memref<1x128x512xbf16, #tpu.memory_space<vmem>>, vector<1x128x512xbf16>
    %207 = vector.shape_cast %206 : vector<1x128x512xbf16> to vector<128x512xbf16>
    %cst_71 = arith.constant dense<0.000000e+00> : vector<8x512xf32>
    %208 = tpu.matmul %205, %207, %cst_71 {dimension_numbers = #tpu.dot_dimension_numbers<[1], [0], [0], [1], [0, 0, 1, 1], [], []>} : vector<8x128xbf16>, vector<128x512xbf16>, vector<8x512xf32> -> vector<8x512xf32>
    %209 = arith.addf %204, %208 : vector<8x512xf32>
    %210 = vector.extract_strided_slice %209 {offsets = [0, 0], sizes = [8, 128], strides = [1, 1]} : vector<8x512xf32> to vector<8x128xf32>
    %211 = arith.negf %210 : vector<8x128xf32>
    %212 = math.exp %211 : vector<8x128xf32>
    %cst_72 = arith.constant 1.000000e+00 : f32
    %213 = vector.broadcast %cst_72 : f32 to vector<8x128xf32>
    %214 = arith.addf %213, %212 : vector<8x128xf32>
    %215 = arith.divf %213, %214 : vector<8x128xf32>
    %216 = vector.extract_strided_slice %209 {offsets = [0, 128], sizes = [8, 128], strides = [1, 1]} : vector<8x512xf32> to vector<8x128xf32>
    %217 = arith.negf %216 : vector<8x128xf32>
    %218 = math.exp %217 : vector<8x128xf32>
    %cst_73 = arith.constant 1.000000e+00 : f32
    %219 = vector.broadcast %cst_73 : f32 to vector<8x128xf32>
    %220 = arith.addf %219, %218 : vector<8x128xf32>
    %221 = arith.divf %219, %220 : vector<8x128xf32>
    %222 = vector.extract_strided_slice %209 {offsets = [0, 256], sizes = [8, 128], strides = [1, 1]} : vector<8x512xf32> to vector<8x128xf32>
    %223 = math.tanh %222 : vector<8x128xf32>
    %224 = vector.extract_strided_slice %209 {offsets = [0, 384], sizes = [8, 128], strides = [1, 1]} : vector<8x512xf32> to vector<8x128xf32>
    %225 = arith.negf %224 : vector<8x128xf32>
    %226 = math.exp %225 : vector<8x128xf32>
    %cst_74 = arith.constant 1.000000e+00 : f32
    %227 = vector.broadcast %cst_74 : f32 to vector<8x128xf32>
    %228 = arith.addf %227, %226 : vector<8x128xf32>
    %229 = arith.divf %227, %228 : vector<8x128xf32>
    %230 = arith.mulf %221, %194 : vector<8x128xf32>
    %231 = arith.mulf %215, %223 : vector<8x128xf32>
    %232 = arith.addf %230, %231 : vector<8x128xf32>
    %233 = math.tanh %232 : vector<8x128xf32>
    %234 = arith.mulf %229, %233 : vector<8x128xf32>
    %235 = arith.truncf %234 : vector<8x128xf32> to vector<8x128xbf16>
    %236 = arith.index_cast %c5_i32 : i32 to index
    %c0_75 = arith.constant 0 : index
    %c0_76 = arith.constant 0 : index
    %237 = vector.load %arg7[%236, %c0_75, %c0_76] : memref<8x8x128xbf16, #tpu.memory_space<vmem>>, vector<1x8x128xbf16>
    %238 = vector.shape_cast %237 : vector<1x8x128xbf16> to vector<8x128xbf16>
    %239 = vector.shape_cast %235 : vector<8x128xbf16> to vector<1x8x128xbf16>
    tpu.vector_store %arg7[%236, %c0_75, %c0_76], %239 {strides = array<i32>} : memref<8x8x128xbf16, #tpu.memory_space<vmem>>, vector<1x8x128xbf16>,
    %c6_i32 = arith.constant 6 : i32
    %240 = arith.index_cast %c6_i32 : i32 to index
    %c0_77 = arith.constant 0 : index
    %c0_78 = arith.constant 0 : index
    %241 = vector.load %arg10[%240, %c0_77, %c0_78] : memref<8x8x512xf32, #tpu.memory_space<vmem>>, vector<1x8x512xf32>
    %242 = vector.shape_cast %241 : vector<1x8x512xf32> to vector<8x512xf32>
    %243 = arith.truncf %234 : vector<8x128xf32> to vector<8x128xbf16>
    %c0_79 = arith.constant 0 : index
    %c0_80 = arith.constant 0 : index
    %c0_81 = arith.constant 0 : index
    %244 = vector.load %arg5[%c0_79, %c0_80, %c0_81] : memref<1x128x512xbf16, #tpu.memory_space<vmem>>, vector<1x128x512xbf16>
    %245 = vector.shape_cast %244 : vector<1x128x512xbf16> to vector<128x512xbf16>
    %cst_82 = arith.constant dense<0.000000e+00> : vector<8x512xf32>
    %246 = tpu.matmul %243, %245, %cst_82 {dimension_numbers = #tpu.dot_dimension_numbers<[1], [0], [0], [1], [0, 0, 1, 1], [], []>} : vector<8x128xbf16>, vector<128x512xbf16>, vector<8x512xf32> -> vector<8x512xf32>
    %247 = arith.addf %242, %246 : vector<8x512xf32>
    %248 = vector.extract_strided_slice %247 {offsets = [0, 0], sizes = [8, 128], strides = [1, 1]} : vector<8x512xf32> to vector<8x128xf32>
    %249 = arith.negf %248 : vector<8x128xf32>
    %250 = math.exp %249 : vector<8x128xf32>
    %cst_83 = arith.constant 1.000000e+00 : f32
    %251 = vector.broadcast %cst_83 : f32 to vector<8x128xf32>
    %252 = arith.addf %251, %250 : vector<8x128xf32>
    %253 = arith.divf %251, %252 : vector<8x128xf32>
    %254 = vector.extract_strided_slice %247 {offsets = [0, 128], sizes = [8, 128], strides = [1, 1]} : vector<8x512xf32> to vector<8x128xf32>
    %255 = arith.negf %254 : vector<8x128xf32>
    %256 = math.exp %255 : vector<8x128xf32>
    %cst_84 = arith.constant 1.000000e+00 : f32
    %257 = vector.broadcast %cst_84 : f32 to vector<8x128xf32>
    %258 = arith.addf %257, %256 : vector<8x128xf32>
    %259 = arith.divf %257, %258 : vector<8x128xf32>
    %260 = vector.extract_strided_slice %247 {offsets = [0, 256], sizes = [8, 128], strides = [1, 1]} : vector<8x512xf32> to vector<8x128xf32>
    %261 = math.tanh %260 : vector<8x128xf32>
    %262 = vector.extract_strided_slice %247 {offsets = [0, 384], sizes = [8, 128], strides = [1, 1]} : vector<8x512xf32> to vector<8x128xf32>
    %263 = arith.negf %262 : vector<8x128xf32>
    %264 = math.exp %263 : vector<8x128xf32>
    %cst_85 = arith.constant 1.000000e+00 : f32
    %265 = vector.broadcast %cst_85 : f32 to vector<8x128xf32>
    %266 = arith.addf %265, %264 : vector<8x128xf32>
    %267 = arith.divf %265, %266 : vector<8x128xf32>
    %268 = arith.mulf %259, %232 : vector<8x128xf32>
    %269 = arith.mulf %253, %261 : vector<8x128xf32>
    %270 = arith.addf %268, %269 : vector<8x128xf32>
    %271 = math.tanh %270 : vector<8x128xf32>
    %272 = arith.mulf %267, %271 : vector<8x128xf32>
    %273 = arith.truncf %272 : vector<8x128xf32> to vector<8x128xbf16>
    %274 = arith.index_cast %c6_i32 : i32 to index
    %c0_86 = arith.constant 0 : index
    %c0_87 = arith.constant 0 : index
    %275 = vector.load %arg7[%274, %c0_86, %c0_87] : memref<8x8x128xbf16, #tpu.memory_space<vmem>>, vector<1x8x128xbf16>
    %276 = vector.shape_cast %275 : vector<1x8x128xbf16> to vector<8x128xbf16>
    %277 = vector.shape_cast %273 : vector<8x128xbf16> to vector<1x8x128xbf16>
    tpu.vector_store %arg7[%274, %c0_86, %c0_87], %277 {strides = array<i32>} : memref<8x8x128xbf16, #tpu.memory_space<vmem>>, vector<1x8x128xbf16>,
    %c7_i32 = arith.constant 7 : i32
    %278 = arith.index_cast %c7_i32 : i32 to index
    %c0_88 = arith.constant 0 : index
    %c0_89 = arith.constant 0 : index
    %279 = vector.load %arg10[%278, %c0_88, %c0_89] : memref<8x8x512xf32, #tpu.memory_space<vmem>>, vector<1x8x512xf32>
    %280 = vector.shape_cast %279 : vector<1x8x512xf32> to vector<8x512xf32>
    %281 = arith.truncf %272 : vector<8x128xf32> to vector<8x128xbf16>
    %c0_90 = arith.constant 0 : index
    %c0_91 = arith.constant 0 : index
    %c0_92 = arith.constant 0 : index
    %282 = vector.load %arg5[%c0_90, %c0_91, %c0_92] : memref<1x128x512xbf16, #tpu.memory_space<vmem>>, vector<1x128x512xbf16>
    %283 = vector.shape_cast %282 : vector<1x128x512xbf16> to vector<128x512xbf16>
    %cst_93 = arith.constant dense<0.000000e+00> : vector<8x512xf32>
    %284 = tpu.matmul %281, %283, %cst_93 {dimension_numbers = #tpu.dot_dimension_numbers<[1], [0], [0], [1], [0, 0, 1, 1], [], []>} : vector<8x128xbf16>, vector<128x512xbf16>, vector<8x512xf32> -> vector<8x512xf32>
    %285 = arith.addf %280, %284 : vector<8x512xf32>
    %286 = vector.extract_strided_slice %285 {offsets = [0, 0], sizes = [8, 128], strides = [1, 1]} : vector<8x512xf32> to vector<8x128xf32>
    %287 = arith.negf %286 : vector<8x128xf32>
    %288 = math.exp %287 : vector<8x128xf32>
    %cst_94 = arith.constant 1.000000e+00 : f32
    %289 = vector.broadcast %cst_94 : f32 to vector<8x128xf32>
    %290 = arith.addf %289, %288 : vector<8x128xf32>
    %291 = arith.divf %289, %290 : vector<8x128xf32>
    %292 = vector.extract_strided_slice %285 {offsets = [0, 128], sizes = [8, 128], strides = [1, 1]} : vector<8x512xf32> to vector<8x128xf32>
    %293 = arith.negf %292 : vector<8x128xf32>
    %294 = math.exp %293 : vector<8x128xf32>
    %cst_95 = arith.constant 1.000000e+00 : f32
    %295 = vector.broadcast %cst_95 : f32 to vector<8x128xf32>
    %296 = arith.addf %295, %294 : vector<8x128xf32>
    %297 = arith.divf %295, %296 : vector<8x128xf32>
    %298 = vector.extract_strided_slice %285 {offsets = [0, 256], sizes = [8, 128], strides = [1, 1]} : vector<8x512xf32> to vector<8x128xf32>
    %299 = math.tanh %298 : vector<8x128xf32>
    %300 = vector.extract_strided_slice %285 {offsets = [0, 384], sizes = [8, 128], strides = [1, 1]} : vector<8x512xf32> to vector<8x128xf32>
    %301 = arith.negf %300 : vector<8x128xf32>
    %302 = math.exp %301 : vector<8x128xf32>
    %cst_96 = arith.constant 1.000000e+00 : f32
    %303 = vector.broadcast %cst_96 : f32 to vector<8x128xf32>
    %304 = arith.addf %303, %302 : vector<8x128xf32>
    %305 = arith.divf %303, %304 : vector<8x128xf32>
    %306 = arith.mulf %297, %270 : vector<8x128xf32>
    %307 = arith.mulf %291, %299 : vector<8x128xf32>
    %308 = arith.addf %306, %307 : vector<8x128xf32>
    %309 = math.tanh %308 : vector<8x128xf32>
    %310 = arith.mulf %305, %309 : vector<8x128xf32>
    %311 = arith.truncf %310 : vector<8x128xf32> to vector<8x128xbf16>
    %312 = arith.index_cast %c7_i32 : i32 to index
    %c0_97 = arith.constant 0 : index
    %c0_98 = arith.constant 0 : index
    %313 = vector.load %arg7[%312, %c0_97, %c0_98] : memref<8x8x128xbf16, #tpu.memory_space<vmem>>, vector<1x8x128xbf16>
    %314 = vector.shape_cast %313 : vector<1x8x128xbf16> to vector<8x128xbf16>
    %315 = vector.shape_cast %311 : vector<8x128xbf16> to vector<1x8x128xbf16>
    tpu.vector_store %arg7[%312, %c0_97, %c0_98], %315 {strides = array<i32>} : memref<8x8x128xbf16, #tpu.memory_space<vmem>>, vector<1x8x128xbf16>,
    %c8_i32 = arith.constant 8 : i32
    %c0_99 = arith.constant 0 : index
    %c0_100 = arith.constant 0 : index
    %c0_101 = arith.constant 0 : index
    %316 = vector.load %arg8[%c0_99, %c0_100, %c0_101] : memref<1x8x128xf32, #tpu.memory_space<vmem>>, vector<1x8x128xf32>
    %317 = vector.shape_cast %316 : vector<1x8x128xf32> to vector<8x128xf32>
    %318 = vector.shape_cast %310 : vector<8x128xf32> to vector<1x8x128xf32>
    tpu.vector_store %arg8[%c0_99, %c0_100, %c0_101], %318 {strides = array<i32>} : memref<1x8x128xf32, #tpu.memory_space<vmem>>, vector<1x8x128xf32>,
    %c0_102 = arith.constant 0 : index
    %c0_103 = arith.constant 0 : index
    %c0_104 = arith.constant 0 : index
    %319 = vector.load %arg9[%c0_102, %c0_103, %c0_104] : memref<1x8x128xf32, #tpu.memory_space<vmem>>, vector<1x8x128xf32>
    %320 = vector.shape_cast %319 : vector<1x8x128xf32> to vector<8x128xf32>
    %321 = vector.shape_cast %308 : vector<8x128xf32> to vector<1x8x128xf32>
    tpu.vector_store %arg9[%c0_102, %c0_103, %c0_104], %321 {strides = array<i32>} : memref<1x8x128xf32, #tpu.memory_space<vmem>>, vector<1x8x128xf32>,
    return
  }
  func.func @transform_0(%arg0: i32) -> (i32, i32, i32) {
    %c0_i32 = arith.constant 0 : i32
    %c0_i32_0 = arith.constant 0 : i32
    %c0_i32_1 = arith.constant 0 : i32
    %c0_i32_2 = arith.constant 0 : i32
    return %c0_i32, %c0_i32_0, %c0_i32_1 : i32, i32, i32
  }
  func.func @transform_1(%arg0: i32) -> (i32, i32, i32) {
    %c0_i32 = arith.constant 0 : i32
    %c0_i32_0 = arith.constant 0 : i32
    %c0_i32_1 = arith.constant 0 : i32
    return %arg0, %c0_i32, %c0_i32_0 : i32, i32, i32
  }
  func.func @transform_2(%arg0: i32) -> (i32, i32, i32) {
    %c0_i32 = arith.constant 0 : i32
    %c0_i32_0 = arith.constant 0 : i32
    %c0_i32_1 = arith.constant 0 : i32
    return %arg0, %c0_i32, %c0_i32_0 : i32, i32, i32
  }
  func.func @transform_3(%arg0: i32) -> (i32, i32, i32) {
    %c0_i32 = arith.constant 0 : i32
    %c0_i32_0 = arith.constant 0 : i32
    %c0_i32_1 = arith.constant 0 : i32
    return %arg0, %c0_i32, %c0_i32_0 : i32, i32, i32
  }
  func.func @transform_4(%arg0: i32) -> (i32, i32, i32) {
    %c0_i32 = arith.constant 0 : i32
    %c0_i32_0 = arith.constant 0 : i32
    %c0_i32_1 = arith.constant 0 : i32
    return %arg0, %c0_i32, %c0_i32_0 : i32, i32, i32
  }
  func.func @transform_5(%arg0: i32) -> (i32, i32, i32) {
    %c0_i32 = arith.constant 0 : i32
    %c0_i32_0 = arith.constant 0 : i32
    %c0_i32_1 = arith.constant 0 : i32
    return %arg0, %c0_i32, %c0_i32_0 : i32, i32, i32
  }
  func.func @transform_6(%arg0: i32) -> (i32, i32, i32) {
    %c0_i32 = arith.constant 0 : i32
    %c0_i32_0 = arith.constant 0 : i32
    %c0_i32_1 = arith.constant 0 : i32
    %c0_i32_2 = arith.constant 0 : i32
    return %c0_i32, %c0_i32_0, %c0_i32_1 : i32, i32, i32
  }
  func.func @transform_7(%arg0: i32) -> (i32, i32, i32) {
    %c0_i32 = arith.constant 0 : i32
    %c0_i32_0 = arith.constant 0 : i32
    %c0_i32_1 = arith.constant 0 : i32
    return %arg0, %c0_i32, %c0_i32_0 : i32, i32, i32
  }
  func.func @transform_8(%arg0: i32) -> (i32, i32, i32) {
    %c0_i32 = arith.constant 0 : i32
    %c0_i32_0 = arith.constant 0 : i32
    %c0_i32_1 = arith.constant 0 : i32
    return %arg0, %c0_i32, %c0_i32_0 : i32, i32, i32
  }
}

</mosaic_0001>

<bundles_post_ra>
// kernel: tpu_custom_call.1
= control target key start
LH: loop header
LB: loop body
LE: loop exit
PB: predicated region body
PF: predicated region fallthrough
CT: control target
= control target key end

     0   :  { %s7473_s0 = inlined_call_operand.hbm [shape: bf16[8,8,128], index: 0, kind: input, shape index: {}]   ;;  %s7474_s1 = inlined_call_operand.hbm [shape: f32[2,8,128], index: 1, kind: input, shape index: {}]   ;;  %s7475_s2 = inlined_call_operand.hbm [shape: f32[2,8,128], index: 2, kind: input, shape index: {}]   ;;  %s7476_s3 = inlined_call_operand.hbm [shape: bf16[2,128,512], index: 3, kind: input, shape index: {}]   ;;  %s7477_s4 = inlined_call_operand.hbm [shape: bf16[2,128,512], index: 4, kind: input, shape index: {}]   ;;  %s7478_s5 = inlined_call_operand.hbm [shape: f32[2,1,512], index: 5, kind: input, shape index: {}]   ;;  %s7479_s6 = inlined_call_operand.hbm [shape: bf16[8,8,128], index: 6, kind: output, shape index: {0}]   ;;  %s7480_s7 = inlined_call_operand.hbm [shape: f32[2,8,128], index: 7, kind: output, shape index: {1}]   ;;  %s7481_s8 = inlined_call_operand.hbm [shape: f32[2,8,128], index: 8, kind: output, shape index: {2}]  }
   0x1   :  { %7496 = sst [smem:[#allocation29_spill]] %s7473_s0 }
   0x2   :  { %7497 = sst [smem:[#allocation30_spill]] %s7474_s1 }
   0x3   :  { %7498 = sst [smem:[#allocation31_spill]] %s7476_s3 }
   0x4   :  { %7499 = sst [smem:[#allocation32_spill]] %s7479_s6 }
   0x5   :  { %7500 = sst [smem:[#allocation33_spill]] %s7481_s8 }
   0x6   :  { %14 = vsyncpa [#allocation4], 0 }
   0x7   :  { %15 = vsyncpa [#allocation7], 0 }
   0x8   :  { %17 = vsyncpa [#allocation7 + $0x1], 0 }
   0x9   :  { %18 = vsyncpa [#allocation10], 0 }
   0xa   :  { %20 = vsyncpa [#allocation10 + $0x1], 0 }
   0xb   :  { %21 = vsyncpa [#allocation13], 0 }
   0xc   :  { %23 = vsyncpa [#allocation13 + $0x1], 0 }
   0xd   :  { %24 = vsyncpa [#allocation5], 0 }
   0xe   :  { %25 = vsyncpa [#allocation16], 0 }
   0xf   :  { %27 = vsyncpa [#allocation16 + $0x1], 0  ;;  %s6386_s27 = smov 0   ;;  %s6388_s28 = smov 0  }
  0x10   :  { %s6390_s29 = smov 0   ;;  %s6392_s30 = smov 0  }
  0x11 LB: > { %7501 = sst [smem:[#allocation24_spill]] %s6327_s29  ;;  %s6407_s9 = sadd.s32 1, %s6331_s30   ;;  %s6331_s30 = sphi %s6392_s30, %s7533_s30   ;;  %s6327_s29 = sphi %s6390_s29, %s7535_s29   ;;  %s6323_s28 = sphi %s6388_s28, %s7537_s28   ;;  %s6319_s27 = sphi %s6386_s27, %s7536_s27  }
  0x12   : > { %7502 = sst [smem:[#allocation25_spill]] %s6407_s9  ;;  %s61_s10 = sadd.s32 1, %s6327_s29 }
  0x13   : > { %s58_s11 = ssub.s32 %s6331_s30, %s6407_s9  ;;  %p68_p0 = scmp.ne.s32.totalorder %s6327_s29, %s6323_s28 }
  0x14   : > { %p59_p1 = scmp.eq.s32.totalorder %s58_s11, 0  ;;  %p69_p2 = scmp.eq.s32.totalorder %s6331_s30, 0 }
  0x15   : > { %p5840_p4 = scmp.lt.s32.totalorder %s6331_s30, 2  ;;  %s7483_s13 = sand.u32 1, %s6331_s30  }
  0x16   : > { %s6418_s12 = scalar_select %p59_p1, %s6327_s29, %s61_s10  }
  0x17   : > { %p70_p5 = por %p69_p2, %p68_p0  ;;  %s6425_s14 = sand.u32 1, %s6327_s29  }
  0x18   : > { %7503 = sst [smem:[#allocation26_spill]] %s6418_s12  ;;  %s7482_s15 = sshll.u32 %s6425_s14, 3 }
  0x19   : > { %s4094_s16 = sshll.u32 %s6331_s30, 3  ;;  %s7504_s1 = sld [smem:[#allocation30_spill]] }
  0x1a   : > { %s293_s21 = scalar_lea.vmem [#allocation6], %s7482_s15  ;;  %p6436_p6 = pnand %p5840_p4, %p70_p5 }
  0x1b   : > { %s301_s22 = sshll.u32 %s293_s21, 4  ;;  %s6443_s26 = scalar_lea.hbm %s7475_s2, %s4094_s16  ;;  %s302_s22 = int_to_ptr.vmem [resolvable:$true] %s301_s22 }
  0x1c   : > { %s6448_s11 = scalar_lea.sflag [#allocation7], %s7483_s13  ;;  %p6452_p8 = pneg %p6436_p6 }
  0x1f   : > { %s297_s19 = scalar_lea.hbm %s7504_s1, %s4094_s16  ;;  %s6020_s24 = scalar_lea.hbm %s7504_s1, 16 }
  0x20   : > { %s299_s20 = sshll.u32 %s297_s19, 4  ;;  %s300_s20 = int_to_ptr.hbm [resolvable:$true] %s299_s20 }
  0x21   : > { %s6013_s17 = sshra.s32 %s300_s20, 4  ;;  %s6014_s17 = int_to_ptr.hbm [resolvable:$true] %s6013_s17 }
  0x22   : > { %s6015_s18 = scalar_lea.hbm %s6014_s17, 8  ;;  %p6021_p11 = scmp.lt.s32.totalorder %s6014_s17, %s7504_s1 }
  0x23   : > { %p6016_p7 = scmp.ne.s32.totalorder %s6014_s17, %s6015_s18  ;;  %p6022_p12 = scmp.lt.s32.totalorder %s6020_s24, %s6015_s18 }
  0x25   : > { %p6018_p9 = pnand %p6452_p8, %p6016_p7  ;;  %p6023_p13 = por %p6022_p12, %p6021_p11 }
  0x27   : > { %p6019_p10 = pneg %p6018_p9 }
  0x29   : > { %p6024_p1 = pnand %p6023_p13, %p6019_p10 }
  0x2b   : > { %6027 = shalt.err (!%p6024_p1)
}
  0x2c   : > { %5819 = dma.hbm_to_vmem [thread:$0]  (!%p6436_p6), %s300_s20, 128, %s302_s22, %s6448_s11  }
  0x2d   : > { %s5460_s13 = sshll.u32 %s6331_s30, 8  ;;  %s7507_s3 = sld [smem:[#allocation31_spill]] }
  0x2e   : > { %s7508_s12 = sshll.u32 %s6425_s14, 8  ;;  %s7509_s24 = sand.u32 1, %s6331_s30  }
  0x2f   : > { %s331_s15 = scalar_lea.vmem [#allocation9], %s7508_s12  ;;  %s6475_s25 = scalar_lea.sflag [#allocation10], %s7509_s24 }
  0x30   : > { %s339_s17 = sshll.u32 %s331_s15, 4  ;;  %s340_s17 = int_to_ptr.vmem [resolvable:$true] %s339_s17 }
  0x33   : > { %s336_s16 = scalar_lea.hbm %s7507_s3, %s5460_s13  ;;  %s6050_s10 = scalar_lea.hbm %s7507_s3, 512 }
  0x34   : > { %s337_s18 = sshll.u32 %s336_s16, 4  ;;  %s338_s18 = int_to_ptr.hbm [resolvable:$true] %s337_s18 }
  0x35   : > { %s6043_s1 = sshra.s32 %s338_s18, 4  ;;  %s6044_s1 = int_to_ptr.hbm [resolvable:$true] %s6043_s1 }
  0x36   : > { %s6045_s9 = scalar_lea.hbm %s6044_s1, 256  ;;  %p6051_p7 = scmp.lt.s32.totalorder %s6044_s1, %s7507_s3 }
  0x37   : > { %p6046_p2 = scmp.ne.s32.totalorder %s6044_s1, %s6045_s9  ;;  %p6052_p9 = scmp.lt.s32.totalorder %s6050_s10, %s6045_s9 }
  0x39   : > { %p6048_p4 = pnand %p6046_p2, %p6452_p8  ;;  %p6053_p10 = por %p6052_p9, %p6051_p7 }
  0x3b   : > { %p6049_p5 = pneg %p6048_p4 }
  0x3d   : > { %p6054_p11 = pnand %p6053_p10, %p6049_p5 }
  0x3f   : > { %6057 = shalt.err (!%p6054_p11)
}
  0x40   : > { %s7487_s16 = smov 256   ;;  %s7488_s15 = smov 16  }
  0x41   : > { %5825 = dma.hbm_to_vmem [thread:$0]  (!%p6436_p6), %s338_s18, 4096, %s340_s17, %s6475_s25, %s7487_s16, %s7487_s16, %s7488_s15  }
  0x42   : > { %s358_s24 = scalar_lea.hbm %s7477_s4, %s5460_s13  ;;  %s7510_s20 = sshll.u32 %s6425_s14, 8 }
  0x43   : > { %s353_s22 = scalar_lea.vmem [#allocation11], %s7510_s20  ;;  %s359_s21 = sshll.u32 %s358_s24, 4  ;;  %s6498_s21 = int_to_ptr.hbm [resolvable:$true] %s359_s21 }
  0x44   : > { %s361_s10 = sshll.u32 %s353_s22, 4  ;;  %s6501_s12 = sadd.s32 4294967295, %s6331_s30   ;;  %s6496_s10 = int_to_ptr.vmem [resolvable:$true] %s361_s10 }
  0x45   : > { %s7486_s17 = sadd.s32 4294967294, %s6331_s30   ;;  %p74_p12 = scmp.ne.s32.totalorder %s6323_s28, %s6319_s27 }
  0x46   : > { %p7495_p13 = scmp.eq.s32.totalorder %s6501_s12, 0  ;;  %p7494_p1 = scmp.eq.s32.totalorder %s6501_s12, 1 }
  0x47   : > { %p229_p2 = scmp.eq.s32.totalorder %s7486_s17, 1  ;;  %p4090_p4 = scmp.ge.s32.totalorder %s6331_s30, 1 }
  0x48   : > { %p6513_p5 = por %p7495_p13, %p74_p12  ;;  %p6522_p7 = por %p7494_p1, %p68_p0 }
  0x49   : > { %p6526_p9 = por %p229_p2, %p74_p12  ;;  %p262_p10 = scmp.lt.s32.totalorder %s6331_s30, 3 }
  0x4a   : > { %s7512_s18 = scalar_select %p6522_p7, 1, 0 }
  0x4b   : > { %s7514_s27 = scalar_select %p6526_p9, 1, 0 }
  0x4c   : > { %7513 = sst [smem:[#allocation27_spill]] %s7512_s18  ;;  %p6535_p3 = pnand %p4090_p4, %p262_p10 }
  0x4d   : > { %7515 = sst [smem:[#allocation28_spill]] %s7514_s27  ;;  %s6335_s22 = smov [#allocation3]  }
  0x4e   : > { %s7516_s0 = sld [smem:[#allocation29_spill]]  ;;  %p5812_p0 = pneg %p6535_p3 }
  0x4f   : > { %s275_s17 = sshll.u32 %s6335_s22, 4  ;;  %s318_s16 = sshll.u32 %s6443_s26, 4  ;;  %s276_s17 = int_to_ptr.vmem [resolvable:$true] %s275_s17  ;;  %s319_s16 = int_to_ptr.hbm [resolvable:$true] %s318_s16 }
  0x50   : > { %p5813_p12 = pnand %p5812_p0, %p7495_p13  ;;  %s7518_s15 = sshll.u32 %s6425_s14, 3 }
  0x51   : > { %s312_s3 = scalar_lea.vmem [#allocation8], %s7518_s15  ;;  %s6336_s9 = smov 64  }
  0x52   : > { %s320_s1 = sshll.u32 %s312_s3, 4  ;;  %s6103_s29 = sshra.s32 %s319_s16, 4  ;;  %s321_s1 = int_to_ptr.vmem [resolvable:$true] %s320_s1  ;;  %s6104_s29 = int_to_ptr.hbm [resolvable:$true] %s6103_s29 }
  0x53   : > { %s6105_s27 = scalar_lea.hbm %s6104_s29, 8  ;;  %s6110_s6 = scalar_lea.hbm %s7475_s2, 16 }
  0x54   : > { %s273_s24 = sshll.u32 %s7516_s0, 4  ;;  %s6337_s0 = smov 4   ;;  %s274_s24 = int_to_ptr.hbm [resolvable:$true] %s273_s24 }
  0x55   : > { %5815 = dma.hbm_to_vmem [thread:$0]  (!%p5813_p12), %s274_s24, 512, %s276_s17, [#allocation4], %s6336_s9, %s6336_s9, %s6337_s0  }
  0x56   : > { %p6106_p2 = scmp.ne.s32.totalorder %s6104_s29, %s6105_s27  ;;  %p6111_p0 = scmp.lt.s32.totalorder %s6104_s29, %s7475_s2 }
  0x57   : > { %p6112_p1 = scmp.lt.s32.totalorder %s6110_s6, %s6105_s27 }
  0x58   : > { %p6108_p4 = pnand %p6106_p2, %p6452_p8 }
  0x59   : > { %p6113_p11 = por %p6112_p1, %p6111_p0 }
  0x5a   : > { %p6109_p10 = pneg %p6108_p4 }
  0x5c   : > { %p6114_p13 = pnand %p6113_p11, %p6109_p10 }
  0x5e   : > { %6117 = shalt.err (!%p6114_p13)
}
  0x5f   : > { %5822 = dma.hbm_to_vmem [thread:$0]  (!%p6436_p6), %s319_s16, 128, %s321_s1, %s6448_s11  }
  0x60   : > { %s6133_s0 = sshra.s32 %s6498_s21, 4  ;;  %s6140_s6 = scalar_lea.hbm %s7477_s4, 512  ;;  %s6134_s0 = int_to_ptr.hbm [resolvable:$true] %s6133_s0 }
  0x61   : > { %s6135_s3 = scalar_lea.hbm %s6134_s0, 256  ;;  %p6141_p13 = scmp.lt.s32.totalorder %s6134_s0, %s7477_s4 }
  0x62   : > { %p6136_p12 = scmp.ne.s32.totalorder %s6134_s0, %s6135_s3  ;;  %p6142_p1 = scmp.lt.s32.totalorder %s6140_s6, %s6135_s3 }
  0x64   : > { %p6138_p2 = pnand %p6136_p12, %p6452_p8  ;;  %p6143_p11 = por %p6142_p1, %p6141_p13 }
  0x66   : > { %p6139_p4 = pneg %p6138_p2 }
  0x68   : > { %p6144_p10 = pnand %p6143_p11, %p6139_p4 }
  0x6a   : > { %6147 = shalt.err (!%p6144_p10)
}
  0x6b   : > { %s7519_s11 = smov 16   ;;  %s7520_s16 = smov 256  }
  0x6c   : > { %5828 = dma.hbm_to_vmem [thread:$0]  (!%p6436_p6), %s6498_s21, 4096, %s6496_s10, %s6475_s25, %s7520_s16, %s7520_s16, %s7519_s11  }
  0x6d   : > { %s4103_s18 = sshll.u32 %s6425_s14, 2  ;;  %s4104_s27 = sshll.u32 %s6331_s30, 2 }
  0x6e   : > { %s379_s9 = scalar_lea.hbm %s7478_s5, %s4104_s27  ;;  %s375_s22 = scalar_lea.vmem [#allocation12], %s4103_s18 }
  0x6f   : > { %s383_s26 = sshll.u32 %s375_s22, 4  ;;  %s381_s0 = sshll.u32 %s379_s9, 4  ;;  %s384_s26 = int_to_ptr.vmem [resolvable:$true] %s383_s26  ;;  %s382_s0 = int_to_ptr.hbm [resolvable:$true] %s381_s0 }
  0x70   : > { %s372_s3 = scalar_lea.sflag [#allocation13], %s6425_s14  ;;  %s6163_s15 = sshra.s32 %s382_s0, 4  ;;  %s6164_s15 = int_to_ptr.hbm [resolvable:$true] %s6163_s15 }
  0x71   : > { %s6165_s8 = scalar_lea.hbm %s6164_s15, 4  ;;  %s6170_s21 = scalar_lea.hbm %s7478_s5, 8 }
  0x72   : > { %p6166_p0 = scmp.ne.s32.totalorder %s6164_s15, %s6165_s8  ;;  %p6171_p4 = scmp.lt.s32.totalorder %s6164_s15, %s7478_s5 }
  0x73   : > { %p6172_p13 = scmp.lt.s32.totalorder %s6170_s21, %s6165_s8 }
  0x74   : > { %p6168_p12 = pnand %p6166_p0, %p6452_p8 }
  0x75   : > { %p6173_p1 = por %p6172_p13, %p6171_p4 }
  0x76   : > { %p6169_p2 = pneg %p6168_p12 }
  0x78   : > { %p6174_p11 = pnand %p6173_p1, %p6169_p2 }
  0x7a   : > { %6177 = shalt.err (!%p6174_p11)
}
  0x7b   : > { %5831 = dma.hbm_to_vmem [thread:$0]  (!%p6436_p6), %s382_s0, 64, %s384_s26, %s372_s3  }
  0x7c   : > { %392 = sbr.rel (%p6535_p3) target bundleno = 2041 (0x7f9), region = 44  ;;  %p7521_p8 = scmp.eq.s32.totalorder (!%p6535_p3), %s6501_s12, 0 }
  0x81   : > { %6294 = dma.done.wait (%p7521_p8), [#allocation4], 512   ;;  %p7522_p10 = pmov %p7521_p8 }
  0x82   : > { %s6597_s14 = sand.u32 1, %s6501_s12   ;;  %s401_s19 = sand.u32 1, %s6323_s28  }
  0x83   : > { %6296 = vsyncadd (%p7522_p10), [#allocation4], 4294966784  ;;  %s6600_s17 = sshll.u32 %s401_s19, 3  ;;  %s400_s23 = scalar_lea.sflag [#allocation7], %s6597_s14 }
  0x84   : > { %s403_s11 = scalar_lea.vmem [#allocation6], %s6600_s17 }
  0x85   : > { %6298 = dma.done.wait (%p6513_p5), %s400_s23, 256  }
  0x86   : > { %6300 = vsyncadd (%p6513_p5), %s400_s23, 4294967040  ;;  %s4109_s20 = sshll.u32 %s401_s19, 8  ;;  %s413_s16 = scalar_lea.vmem [#allocation8], %s6600_s17 }
  0x87   : > { %s420_s18 = scalar_lea.sflag [#allocation10], %s6597_s14  ;;  %s6610_s27 = scalar_lea.vmem [#allocation9], %s4109_s20 }
  0x88   : > { %6302 = dma.done.wait (%p6513_p5), %s420_s18, 8192  }
  0x89   : > { %6304 = vsyncadd (%p6513_p5), %s420_s18, 4294959104  ;;  %s4111_s24 = sshll.u32 %s401_s19, 2  ;;  %s6616_s1 = scalar_lea.vmem [#allocation11], %s4109_s20 }
  0x8a   : > { %s440_s9 = scalar_lea.sflag [#allocation13], %s401_s19  ;;  %s443_s22 = scalar_lea.vmem [#allocation12], %s4111_s24 }
  0x8b   : > { %6306 = dma.done.wait (%p6513_p5), %s440_s9, 64  }
  0x8c   : > { %6308 = vsyncadd (%p6513_p5), %s440_s9, 4294967232  ;;  %v6622_v0 = vld [vmem:[%s443_s22] sm:$0xf]  ;;  %s494_s26 = scalar_lea.vmem [#allocation15], %s6600_s17  ;;  %s501_s0 = scalar_lea.vmem [#allocation17], %s6600_s17 }
  0x8d   : > { %p7523_p3 = scmp.ne.s32.totalorder %s6501_s12, 0 }
  0x8f   : > { %506 = sbr.rel (%p7523_p3) target bundleno = 375 (0x177), region = 72 }
  0x94   : > { %v4245_v1 = vld [vmem:[%s6610_s27 + $0xe0] sm:$0xf]  ;;  %v5492_v2 = vld [vmem:[%s6610_s27 + $0xec] sm:$0xf0]  ;;  %v5490_v3 = vld [vmem:[%s6610_s27 + $0xe4] sm:$0xf] }
  0x95   : > { %v4246_v4 = vor.u32 %v5492_v2, %v4245_v1  ;;  %v4247_v5 = vld [vmem:[%s6610_s27 + $0xf0] sm:$0xf0]  ;;  %v4253_v6 = vld [vmem:[%s6610_s27 + $0xe8] sm:$0xf]  ;;  %v5493_v7 = vld [vmem:[%s6610_s27 + $0xf4] sm:$0xf0] }
  0x96   : > { %v4250_v8 = vor.u32 %v5490_v3, %v4247_v5  ;;  %v4254_v9 = vor.u32 %v5493_v7, %v4253_v6  ;;  %v5491_v10 = vld [vmem:[%s6610_s27 + $0xec] sm:$0xf]  ;;  %v4255_v11 = vld [vmem:[%s6610_s27 + $0xf8] sm:$0xf0]  ;;  %v4229_v12 = vld [vmem:[%s6610_s27 + $0xc0] sm:$0xf] }
  0x97   : > { %740 = vmatpush.bf16.msra.mxu0 %v4246_v4  ;;  %v4258_v13 = vor.u32 %v5491_v10, %v4255_v11  ;;  %v5488_v14 = vld [vmem:[%s6610_s27 + $0xcc] sm:$0xf0]  ;;  %v5486_v15 = vld [vmem:[%s6610_s27 + $0xc4] sm:$0xf]  ;;  %v4231_v16 = vld [vmem:[%s6610_s27 + $0xd0] sm:$0xf0] }
  0x98   : > { %769 = vmatpush.bf16.msra.mxu1 %v4250_v8  ;;  %798 = vmatpush.bf16.msra.mxu2 %v4254_v9  ;;  %v4230_v17 = vor.u32 %v5488_v14, %v4229_v12  ;;  %v4234_v18 = vor.u32 %v5486_v15, %v4231_v16  ;;  %v4237_v19 = vld [vmem:[%s6610_s27 + $0xc8] sm:$0xf]  ;;  %v5489_v20 = vld [vmem:[%s6610_s27 + $0xd4] sm:$0xf0]  ;;  %v5487_v21 = vld [vmem:[%s6610_s27 + $0xcc] sm:$0xf] }
  0x99   : > { %827 = vmatpush.bf16.msra.mxu3 %v4258_v13  ;;  %v4238_v22 = vor.u32 %v5489_v20, %v4237_v19  ;;  %v4239_v23 = vld [vmem:[%s6610_s27 + $0xd8] sm:$0xf0]  ;;  %v4213_v24 = vld [vmem:[%s6610_s27 + $0xa0] sm:$0xf]  ;;  %v5484_v25 = vld [vmem:[%s6610_s27 + $0xac] sm:$0xf0] }
  0x9a   : > { %v4242_v26 = vor.u32 %v5487_v21, %v4239_v23  ;;  %v5482_v27 = vld [vmem:[%s6610_s27 + $0xa4] sm:$0xf]  ;;  %v4215_v28 = vld [vmem:[%s6610_s27 + $0xb0] sm:$0xf0]  ;;  %v4221_v29 = vld [vmem:[%s6610_s27 + $0xa8] sm:$0xf]  ;;  %v4214_v30 = vor.u32 %v5484_v25, %v4213_v24 }
  0x9b   : > { %741 = vmatpush.bf16.msra.mxu0 %v4230_v17  ;;  %v5485_v31 = vld [vmem:[%s6610_s27 + $0xb4] sm:$0xf0]  ;;  %v5483_v32 = vld [vmem:[%s6610_s27 + $0xac] sm:$0xf]  ;;  %v4223_v33 = vld [vmem:[%s6610_s27 + $0xb8] sm:$0xf0]  ;;  %v4218_v34 = vor.u32 %v5482_v27, %v4215_v28 }
  0x9c   : > { %770 = vmatpush.bf16.msra.mxu1 %v4234_v18  ;;  %799 = vmatpush.bf16.msra.mxu2 %v4238_v22  ;;  %v4222_v35 = vor.u32 %v5485_v31, %v4221_v29  ;;  %v4197_v36 = vld [vmem:[%s6610_s27 + $0x80] sm:$0xf]  ;;  %v5480_v37 = vld [vmem:[%s6610_s27 + $0x8c] sm:$0xf0]  ;;  %v5478_v38 = vld [vmem:[%s6610_s27 + $0x84] sm:$0xf]  ;;  %v4226_v39 = vor.u32 %v5483_v32, %v4223_v33 }
  0x9d   : > { %828 = vmatpush.bf16.msra.mxu3 %v4242_v26  ;;  %v4199_v40 = vld [vmem:[%s6610_s27 + $0x90] sm:$0xf0]  ;;  %v4205_v41 = vld [vmem:[%s6610_s27 + $0x88] sm:$0xf]  ;;  %v5481_v42 = vld [vmem:[%s6610_s27 + $0x94] sm:$0xf0]  ;;  %v4198_v45 = vor.u32 %v5480_v37, %v4197_v36 }
  0x9e   : > { %v5479_v43 = vld [vmem:[%s6610_s27 + $0x8c] sm:$0xf]  ;;  %v4207_v44 = vld [vmem:[%s6610_s27 + $0x98] sm:$0xf0]  ;;  %v4202_v46 = vor.u32 %v5478_v38, %v4199_v40  ;;  %v4206_v47 = vor.u32 %v5481_v42, %v4205_v41  ;;  %v4181_v48 = vld [vmem:[%s6610_s27 + $0x60] sm:$0xf] }
  0x9f   : > { %742 = vmatpush.bf16.msra.mxu0 %v4214_v30  ;;  %v5476_v49 = vld [vmem:[%s6610_s27 + $0x6c] sm:$0xf0]  ;;  %v5474_v50 = vld [vmem:[%s6610_s27 + $0x64] sm:$0xf]  ;;  %v4210_v51 = vor.u32 %v5479_v43, %v4207_v44  ;;  %v4183_v52 = vld [vmem:[%s6610_s27 + $0x70] sm:$0xf0] }
  0xa0   : > { %771 = vmatpush.bf16.msra.mxu1 %v4218_v34  ;;  %800 = vmatpush.bf16.msra.mxu2 %v4222_v35  ;;  %v4189_v53 = vld [vmem:[%s6610_s27 + $0x68] sm:$0xf]  ;;  %v5477_v54 = vld [vmem:[%s6610_s27 + $0x74] sm:$0xf0]  ;;  %v5475_v55 = vld [vmem:[%s6610_s27 + $0x6c] sm:$0xf]  ;;  %v4182_v57 = vor.u32 %v5476_v49, %v4181_v48  ;;  %v4186_v58 = vor.u32 %v5474_v50, %v4183_v52 }
  0xa1   : > { %829 = vmatpush.bf16.msra.mxu3 %v4226_v39  ;;  %v4191_v56 = vld [vmem:[%s6610_s27 + $0x78] sm:$0xf0]  ;;  %v4190_v59 = vor.u32 %v5477_v54, %v4189_v53  ;;  %v4165_v60 = vld [vmem:[%s6610_s27 + $0x40] sm:$0xf]  ;;  %v5472_v61 = vld [vmem:[%s6610_s27 + $0x4c] sm:$0xf0] }
  0xa2   : > { %v5470_v62 = vld [vmem:[%s6610_s27 + $0x44] sm:$0xf]  ;;  %v4194_v63 = vor.u32 %v5475_v55, %v4191_v56  ;;  %v4167_v1 = vld [vmem:[%s6610_s27 + $0x50] sm:$0xf0]  ;;  %v4173_v2 = vld [vmem:[%s6610_s27 + $0x48] sm:$0xf]  ;;  %v4166_v6 = vor.u32 %v5472_v61, %v4165_v60 }
  0xa3   : > { %743 = vmatpush.bf16.msra.mxu0 %v4198_v45  ;;  %v5473_v3 = vld [vmem:[%s6610_s27 + $0x54] sm:$0xf0]  ;;  %v5471_v4 = vld [vmem:[%s6610_s27 + $0x4c] sm:$0xf]  ;;  %v4175_v5 = vld [vmem:[%s6610_s27 + $0x58] sm:$0xf0]  ;;  %v4170_v7 = vor.u32 %v5470_v62, %v4167_v1 }
  0xa4   : > { %772 = vmatpush.bf16.msra.mxu1 %v4202_v46  ;;  %801 = vmatpush.bf16.msra.mxu2 %v4206_v47  ;;  %v4174_v8 = vor.u32 %v5473_v3, %v4173_v2  ;;  %v4149_v9 = vld [vmem:[%s6610_s27 + $0x20] sm:$0xf]  ;;  %v5468_v10 = vld [vmem:[%s6610_s27 + $0x2c] sm:$0xf0]  ;;  %v5466_v11 = vld [vmem:[%s6610_s27 + $0x24] sm:$0xf]  ;;  %v4178_v12 = vor.u32 %v5471_v4, %v4175_v5 }
  0xa5   : > { %830 = vmatpush.bf16.msra.mxu3 %v4210_v51  ;;  %v4151_v13 = vld [vmem:[%s6610_s27 + $0x30] sm:$0xf0]  ;;  %v4157_v14 = vld [vmem:[%s6610_s27 + $0x28] sm:$0xf]  ;;  %v5469_v15 = vld [vmem:[%s6610_s27 + $0x34] sm:$0xf0]  ;;  %v4150_v18 = vor.u32 %v5468_v10, %v4149_v9 }
  0xa6   : > { %v5467_v16 = vld [vmem:[%s6610_s27 + $0x2c] sm:$0xf]  ;;  %v4159_v17 = vld [vmem:[%s6610_s27 + $0x38] sm:$0xf0]  ;;  %v4154_v19 = vor.u32 %v5466_v11, %v4151_v13  ;;  %v4158_v20 = vor.u32 %v5469_v15, %v4157_v14  ;;  %v4133_v21 = vld [vmem:[%s6610_s27] sm:$0xf] }
  0xa7   : > { %744 = vmatpush.bf16.msra.mxu0 %v4182_v57  ;;  %v5464_v22 = vld [vmem:[%s6610_s27 + $0xc] sm:$0xf0]  ;;  %v5462_v23 = vld [vmem:[%s6610_s27 + $0x4] sm:$0xf]  ;;  %v4162_v24 = vor.u32 %v5467_v16, %v4159_v17  ;;  %v4135_v25 = vld [vmem:[%s6610_s27 + $0x10] sm:$0xf0] }
  0xa8   : > { %773 = vmatpush.bf16.msra.mxu1 %v4186_v58  ;;  %802 = vmatpush.bf16.msra.mxu2 %v4190_v59  ;;  %v4141_v26 = vld [vmem:[%s6610_s27 + $0x8] sm:$0xf]  ;;  %v5465_v27 = vld [vmem:[%s6610_s27 + $0x14] sm:$0xf0]  ;;  %v5463_v28 = vld [vmem:[%s6610_s27 + $0xc] sm:$0xf]  ;;  %v4134_v30 = vor.u32 %v5464_v22, %v4133_v21  ;;  %v4138_v31 = vor.u32 %v5462_v23, %v4135_v25 }
  0xa9   : > { %831 = vmatpush.bf16.msra.mxu3 %v4194_v63  ;;  %v4143_v29 = vld [vmem:[%s6610_s27 + $0x18] sm:$0xf0]  ;;  %v4142_v32 = vor.u32 %v5465_v27, %v4141_v26  ;;  %v5494_v34 = vld [vmem:[#allocation3] sm:$0xff]  ;;  %v5495_v35 = vld [vmem:[#allocation3 + $0x8] sm:$0xff]  ;;  %v6693_v38 = vperm.slane %v6622_v0, 0  ;;  %v6696_v39 = vperm.slane %v6622_v0, 1 }
  0xaa   : > { %v4146_v33 = vor.u32 %v5463_v28, %v4143_v29  ;;  %v5496_v36 = vld [vmem:[#allocation3 + $0x10] sm:$0xff]  ;;  %v5497_v37 = vld [vmem:[#allocation3 + $0x18] sm:$0xff]  ;;  %v6701_v44 = vperm.slane %v6622_v0, 2  ;;  %v6704_v45 = vperm.slane %v6622_v0, 3 }
  0xab   : > { %745 = vmatpush.bf16.msra.mxu0 %v4166_v6 }
  0xac   : > { %774 = vmatpush.bf16.msra.mxu1 %v4170_v7  ;;  %803 = vmatpush.bf16.msra.mxu2 %v4174_v8 }
  0xad   : > { %832 = vmatpush.bf16.msra.mxu3 %v4178_v12 }
  0xaf   : > { %746 = vmatpush.bf16.msra.mxu0 %v4150_v18 }
  0xb0   : > { %775 = vmatpush.bf16.msra.mxu1 %v4154_v19  ;;  %804 = vmatpush.bf16.msra.mxu2 %v4158_v20 }
  0xb1   : > { %833 = vmatpush.bf16.msra.mxu3 %v4162_v24 }
  0xb3   : > { %747 = vmatpush.bf16.msra.mxu0 %v4134_v30 }
  0xb4   : > { %776 = vmatpush.bf16.msra.mxu1 %v4138_v31  ;;  %805 = vmatpush.bf16.msra.mxu2 %v4142_v32 }
  0xb5   : > { %834 = vmatpush.bf16.msra.mxu3 %v4146_v33 }
  0xb6   : > { %748 = vmatmul.bf16.vlgmr.msra.gmra.mxu0 %v5494_v34 }
  0xb7   : > { %777 = vmatmul.bf16.vlgmr.msra.gmra.mxu1 %v5494_v34  ;;  %806 = vmatmul.bf16.vlgmr.msra.gmra.mxu2 %v5494_v34 }
  0xb8   : > { %835 = vmatmul.bf16.vlgmr.msra.gmra.mxu3 %v5494_v34 }
  0xc6   : > { %753 = vmatmul.bf16.gmra.mxu0 %v5495_v35 }
  0xc7   : > { %782 = vmatmul.bf16.gmra.mxu1 %v5495_v35  ;;  %811 = vmatmul.bf16.gmra.mxu2 %v5495_v35 }
  0xc8   : > { %840 = vmatmul.bf16.gmra.mxu3 %v5495_v35 }
  0xd6   : > { %758 = vmatmul.bf16.gmra.mxu0 %v5496_v36 }
  0xd7   : > { %787 = vmatmul.bf16.gmra.mxu1 %v5496_v36  ;;  %816 = vmatmul.bf16.gmra.mxu2 %v5496_v36 }
  0xd8   : > { %845 = vmatmul.bf16.gmra.mxu3 %v5496_v36 }
  0xe6   : > { %763 = vmatmul.bf16.gmra.mxu0 %v5497_v37 }
  0xe7   : > { %792 = vmatmul.bf16.gmra.mxu1 %v5497_v37  ;;  %821 = vmatmul.bf16.gmra.mxu2 %v5497_v37 }
  0xe8   : > { %850 = vmatmul.bf16.gmra.mxu3 %v5497_v37 }
 0x133   : > { %v749_v40 = vpop.f32.mrf.mxu0 }
 0x134   : > { %v750_v41 = vadd.f32 %v749_v40, %v6693_v38  ;;  %v778_v42 = vpop.f32.mrf.mxu1 }
 0x135   : > { %v779_v43 = vadd.f32 %v778_v42, %v6696_v39 }
 0x136   : > { %856 = vst [vmem:[#allocation2 + $0xb0] sm:$0xff] %v750_v41 }
 0x137   : > { %857 = vst [vmem:[#allocation2] sm:$0xff] %v779_v43 }
 0x13a   : > { %v807_v46 = vpop.f32.mrf.mxu2 }
 0x13b   : > { %v808_v47 = vadd.f32 %v807_v46, %v6701_v44  ;;  %v836_v48 = vpop.f32.mrf.mxu3  ;;  %v751_v49 = vpop.f32.mrf.mxu0 }
 0x13c   : > { %v837_v50 = vadd.f32 %v836_v48, %v6704_v45  ;;  %v752_v51 = vadd.f32 %v751_v49, %v6693_v38  ;;  %v780_v52 = vpop.f32.mrf.mxu1 }
 0x13d   : > { %858 = vst [vmem:[#allocation2 + $0xd8] sm:$0xff] %v808_v47  ;;  %v781_v53 = vadd.f32 %v780_v52, %v6696_v39 }
 0x13e   : > { %859 = vst [vmem:[#allocation2 + $0x18] sm:$0xff] %v837_v50 }
 0x13f   : > { %860 = vst [vmem:[#allocation2 + $0x50] sm:$0xff] %v752_v51 }
 0x140   : > { %861 = vst [vmem:[#allocation2 + $0x68] sm:$0xff] %v781_v53 }
 0x142   : > { %v809_v54 = vpop.f32.mrf.mxu2 }
 0x143   : > { %v810_v55 = vadd.f32 %v809_v54, %v6701_v44  ;;  %v838_v56 = vpop.f32.mrf.mxu3  ;;  %v754_v57 = vpop.f32.mrf.mxu0 }
 0x144   : > { %v839_v58 = vadd.f32 %v838_v56, %v6704_v45  ;;  %v755_v59 = vadd.f32 %v754_v57, %v6693_v38  ;;  %v783_v60 = vpop.f32.mrf.mxu1 }
 0x145   : > { %862 = vst [vmem:[#allocation2 + $0x30] sm:$0xff] %v810_v55  ;;  %v784_v61 = vadd.f32 %v783_v60, %v6696_v39 }
 0x146   : > { %863 = vst [vmem:[#allocation2 + $0x48] sm:$0xff] %v839_v58 }
 0x147   : > { %864 = vst [vmem:[#allocation2 + $0x80] sm:$0xff] %v755_v59 }
 0x148   : > { %865 = vst [vmem:[#allocation2 + $0x88] sm:$0xff] %v784_v61 }
 0x14a   : > { %v812_v62 = vpop.f32.mrf.mxu2 }
 0x14b   : > { %v813_v63 = vadd.f32 %v812_v62, %v6701_v44  ;;  %v841_v1 = vpop.f32.mrf.mxu3  ;;  %v756_v2 = vpop.f32.mrf.mxu0 }
 0x14c   : > { %v842_v3 = vadd.f32 %v841_v1, %v6704_v45  ;;  %v757_v4 = vadd.f32 %v756_v2, %v6693_v38  ;;  %v785_v5 = vpop.f32.mrf.mxu1 }
 0x14d   : > { %866 = vst [vmem:[#allocation2 + $0xe8] sm:$0xff] %v813_v63  ;;  %v786_v6 = vadd.f32 %v785_v5, %v6696_v39 }
 0x14e   : > { %867 = vst [vmem:[#allocation2 + $0xb8] sm:$0xff] %v842_v3 }
 0x14f   : > { %868 = vst [vmem:[#allocation2 + $0x60] sm:$0xff] %v757_v4 }
 0x150   : > { %869 = vst [vmem:[#allocation2 + $0xf0] sm:$0xff] %v786_v6 }
 0x152   : > { %v814_v7 = vpop.f32.mrf.mxu2 }
 0x153   : > { %v815_v8 = vadd.f32 %v814_v7, %v6701_v44  ;;  %v843_v9 = vpop.f32.mrf.mxu3  ;;  %v759_v10 = vpop.f32.mrf.mxu0 }
 0x154   : > { %v844_v11 = vadd.f32 %v843_v9, %v6704_v45  ;;  %v760_v12 = vadd.f32 %v759_v10, %v6693_v38  ;;  %v788_v13 = vpop.f32.mrf.mxu1 }
 0x155   : > { %870 = vst [vmem:[#allocation2 + $0x8] sm:$0xff] %v815_v8  ;;  %v789_v14 = vadd.f32 %v788_v13, %v6696_v39 }
 0x156   : > { %871 = vst [vmem:[#allocation2 + $0x78] sm:$0xff] %v844_v11 }
 0x157   : > { %872 = vst [vmem:[#allocation2 + $0x38] sm:$0xff] %v760_v12 }
 0x158   : > { %873 = vst [vmem:[#allocation2 + $0x58] sm:$0xff] %v789_v14 }
 0x15a   : > { %v817_v15 = vpop.f32.mrf.mxu2 }
 0x15b   : > { %v818_v16 = vadd.f32 %v817_v15, %v6701_v44  ;;  %v846_v17 = vpop.f32.mrf.mxu3  ;;  %v761_v18 = vpop.f32.mrf.mxu0 }
 0x15c   : > { %v847_v19 = vadd.f32 %v846_v17, %v6704_v45  ;;  %v762_v20 = vadd.f32 %v761_v18, %v6693_v38  ;;  %v790_v21 = vpop.f32.mrf.mxu1 }
 0x15d   : > { %874 = vst [vmem:[#allocation2 + $0x40] sm:$0xff] %v818_v16  ;;  %v791_v22 = vadd.f32 %v790_v21, %v6696_v39 }
 0x15e   : > { %875 = vst [vmem:[#allocation2 + $0xc8] sm:$0xff] %v847_v19 }
 0x15f   : > { %876 = vst [vmem:[#allocation2 + $0xe0] sm:$0xff] %v762_v20 }
 0x160   : > { %877 = vst [vmem:[#allocation2 + $0x90] sm:$0xff] %v791_v22 }
 0x162   : > { %v819_v23 = vpop.f32.mrf.mxu2 }
 0x163   : > { %v820_v24 = vadd.f32 %v819_v23, %v6701_v44  ;;  %v848_v25 = vpop.f32.mrf.mxu3  ;;  %v764_v26 = vpop.f32.mrf.mxu0 }
 0x164   : > { %v849_v27 = vadd.f32 %v848_v25, %v6704_v45  ;;  %v765_v28 = vadd.f32 %v764_v26, %v6693_v38  ;;  %v793_v29 = vpop.f32.mrf.mxu1 }
 0x165   : > { %878 = vst [vmem:[#allocation2 + $0x70] sm:$0xff] %v820_v24  ;;  %v794_v30 = vadd.f32 %v793_v29, %v6696_v39 }
 0x166   : > { %879 = vst [vmem:[#allocation2 + $0xc0] sm:$0xff] %v849_v27 }
 0x167   : > { %880 = vst [vmem:[#allocation2 + $0xa8] sm:$0xff] %v765_v28 }
 0x168   : > { %881 = vst [vmem:[#allocation2 + $0xd0] sm:$0xff] %v794_v30 }
 0x16a   : > { %v822_v31 = vpop.f32.mrf.mxu2 }
 0x16b   : > { %v823_v32 = vadd.f32 %v822_v31, %v6701_v44  ;;  %v851_v33 = vpop.f32.mrf.mxu3  ;;  %v766_v34 = vpop.f32.mrf.mxu0 }
 0x16c   : > { %v852_v35 = vadd.f32 %v851_v33, %v6704_v45  ;;  %v767_v36 = vadd.f32 %v766_v34, %v6693_v38  ;;  %v795_v37 = vpop.f32.mrf.mxu1 }
 0x16d   : > { %882 = vst [vmem:[#allocation2 + $0x10] sm:$0xff] %v823_v32  ;;  %v796_v40 = vadd.f32 %v795_v37, %v6696_v39 }
 0x16e   : > { %883 = vst [vmem:[#allocation2 + $0x28] sm:$0xff] %v852_v35 }
 0x16f   : > { %884 = vst [vmem:[#allocation2 + $0xa0] sm:$0xff] %v767_v36 }
 0x170   : > { %885 = vst [vmem:[#allocation2 + $0xf8] sm:$0xff] %v796_v40 }
 0x172   : > { %v824_v41 = vpop.f32.mrf.mxu2 }
 0x173   : > { %v825_v42 = vadd.f32 %v824_v41, %v6701_v44  ;;  %v853_v43 = vpop.f32.mrf.mxu3 }
 0x174   : > { %v854_v46 = vadd.f32 %v853_v43, %v6704_v45 }
 0x175   : > { %886 = vst [vmem:[#allocation2 + $0x20] sm:$0xff] %v825_v42 }
 0x176   : > { %887 = vst [vmem:[#allocation2 + $0x98] sm:$0xff] %v854_v46 }
 0x177 PF: > { %p4259_p6 = scmp.le.s32.totalorder %s6501_s12, 0 }
 0x179   : > { %891 = sbr.rel (%p4259_p6) target bundleno = 609 (0x261), region = 76 }
 0x17e   : > { %v4390_v38 = vld [vmem:[%s6610_s27 + $0xe0] sm:$0xf]  ;;  %v5528_v39 = vld [vmem:[%s6610_s27 + $0xec] sm:$0xf0]  ;;  %v5526_v44 = vld [vmem:[%s6610_s27 + $0xe4] sm:$0xf] }
 0x17f   : > { %v4391_v45 = vor.u32 %v5528_v39, %v4390_v38  ;;  %v4392_v47 = vld [vmem:[%s6610_s27 + $0xf0] sm:$0xf0]  ;;  %v4398_v48 = vld [vmem:[%s6610_s27 + $0xe8] sm:$0xf]  ;;  %v5529_v49 = vld [vmem:[%s6610_s27 + $0xf4] sm:$0xf0] }
 0x180   : > { %v4395_v50 = vor.u32 %v5526_v44, %v4392_v47  ;;  %v4399_v51 = vor.u32 %v5529_v49, %v4398_v48  ;;  %v5527_v52 = vld [vmem:[%s6610_s27 + $0xec] sm:$0xf]  ;;  %v4400_v53 = vld [vmem:[%s6610_s27 + $0xf8] sm:$0xf0]  ;;  %v4374_v54 = vld [vmem:[%s6610_s27 + $0xc0] sm:$0xf] }
 0x181   : > { %1125 = vmatpush.bf16.msra.mxu0 %v4391_v45  ;;  %v4403_v55 = vor.u32 %v5527_v52, %v4400_v53  ;;  %v5524_v56 = vld [vmem:[%s6610_s27 + $0xcc] sm:$0xf0]  ;;  %v5522_v57 = vld [vmem:[%s6610_s27 + $0xc4] sm:$0xf]  ;;  %v4376_v58 = vld [vmem:[%s6610_s27 + $0xd0] sm:$0xf0] }
 0x182   : > { %1154 = vmatpush.bf16.msra.mxu1 %v4395_v50  ;;  %1183 = vmatpush.bf16.msra.mxu2 %v4399_v51  ;;  %v4375_v59 = vor.u32 %v5524_v56, %v4374_v54  ;;  %v4379_v60 = vor.u32 %v5522_v57, %v4376_v58  ;;  %v4382_v61 = vld [vmem:[%s6610_s27 + $0xc8] sm:$0xf]  ;;  %v5525_v62 = vld [vmem:[%s6610_s27 + $0xd4] sm:$0xf0]  ;;  %v5523_v63 = vld [vmem:[%s6610_s27 + $0xcc] sm:$0xf] }
 0x183   : > { %1212 = vmatpush.bf16.msra.mxu3 %v4403_v55  ;;  %v4383_v1 = vor.u32 %v5525_v62, %v4382_v61  ;;  %v4384_v2 = vld [vmem:[%s6610_s27 + $0xd8] sm:$0xf0]  ;;  %v4358_v3 = vld [vmem:[%s6610_s27 + $0xa0] sm:$0xf]  ;;  %v5520_v4 = vld [vmem:[%s6610_s27 + $0xac] sm:$0xf0] }
 0x184   : > { %v4387_v5 = vor.u32 %v5523_v63, %v4384_v2  ;;  %v5518_v6 = vld [vmem:[%s6610_s27 + $0xa4] sm:$0xf]  ;;  %v4360_v7 = vld [vmem:[%s6610_s27 + $0xb0] sm:$0xf0]  ;;  %v4366_v8 = vld [vmem:[%s6610_s27 + $0xa8] sm:$0xf]  ;;  %v4359_v9 = vor.u32 %v5520_v4, %v4358_v3 }
 0x185   : > { %1126 = vmatpush.bf16.msra.mxu0 %v4375_v59  ;;  %v5521_v10 = vld [vmem:[%s6610_s27 + $0xb4] sm:$0xf0]  ;;  %v5519_v11 = vld [vmem:[%s6610_s27 + $0xac] sm:$0xf]  ;;  %v4368_v12 = vld [vmem:[%s6610_s27 + $0xb8] sm:$0xf0]  ;;  %v4363_v13 = vor.u32 %v5518_v6, %v4360_v7 }
 0x186   : > { %1155 = vmatpush.bf16.msra.mxu1 %v4379_v60  ;;  %1184 = vmatpush.bf16.msra.mxu2 %v4383_v1  ;;  %v4367_v14 = vor.u32 %v5521_v10, %v4366_v8  ;;  %v4342_v15 = vld [vmem:[%s6610_s27 + $0x80] sm:$0xf]  ;;  %v5516_v16 = vld [vmem:[%s6610_s27 + $0x8c] sm:$0xf0]  ;;  %v5514_v17 = vld [vmem:[%s6610_s27 + $0x84] sm:$0xf]  ;;  %v4371_v18 = vor.u32 %v5519_v11, %v4368_v12 }
 0x187   : > { %1213 = vmatpush.bf16.msra.mxu3 %v4387_v5  ;;  %v4344_v19 = vld [vmem:[%s6610_s27 + $0x90] sm:$0xf0]  ;;  %v4350_v20 = vld [vmem:[%s6610_s27 + $0x88] sm:$0xf]  ;;  %v5517_v21 = vld [vmem:[%s6610_s27 + $0x94] sm:$0xf0]  ;;  %v4343_v24 = vor.u32 %v5516_v16, %v4342_v15 }
 0x188   : > { %v5515_v22 = vld [vmem:[%s6610_s27 + $0x8c] sm:$0xf]  ;;  %v4352_v23 = vld [vmem:[%s6610_s27 + $0x98] sm:$0xf0]  ;;  %v4347_v25 = vor.u32 %v5514_v17, %v4344_v19  ;;  %v4351_v26 = vor.u32 %v5517_v21, %v4350_v20  ;;  %v4326_v27 = vld [vmem:[%s6610_s27 + $0x60] sm:$0xf] }
 0x189   : > { %1127 = vmatpush.bf16.msra.mxu0 %v4359_v9  ;;  %v5512_v28 = vld [vmem:[%s6610_s27 + $0x6c] sm:$0xf0]  ;;  %v5510_v29 = vld [vmem:[%s6610_s27 + $0x64] sm:$0xf]  ;;  %v4355_v30 = vor.u32 %v5515_v22, %v4352_v23  ;;  %v4328_v31 = vld [vmem:[%s6610_s27 + $0x70] sm:$0xf0] }
 0x18a   : > { %1156 = vmatpush.bf16.msra.mxu1 %v4363_v13  ;;  %1185 = vmatpush.bf16.msra.mxu2 %v4367_v14  ;;  %v4334_v32 = vld [vmem:[%s6610_s27 + $0x68] sm:$0xf]  ;;  %v5513_v33 = vld [vmem:[%s6610_s27 + $0x74] sm:$0xf0]  ;;  %v5511_v34 = vld [vmem:[%s6610_s27 + $0x6c] sm:$0xf]  ;;  %v4327_v36 = vor.u32 %v5512_v28, %v4326_v27  ;;  %v4331_v37 = vor.u32 %v5510_v29, %v4328_v31 }
 0x18b   : > { %1214 = vmatpush.bf16.msra.mxu3 %v4371_v18  ;;  %v4336_v35 = vld [vmem:[%s6610_s27 + $0x78] sm:$0xf0]  ;;  %v4335_v40 = vor.u32 %v5513_v33, %v4334_v32  ;;  %v4310_v41 = vld [vmem:[%s6610_s27 + $0x40] sm:$0xf]  ;;  %v5508_v42 = vld [vmem:[%s6610_s27 + $0x4c] sm:$0xf0] }
 0x18c   : > { %v5506_v43 = vld [vmem:[%s6610_s27 + $0x44] sm:$0xf]  ;;  %v4339_v46 = vor.u32 %v5511_v34, %v4336_v35  ;;  %v4312_v38 = vld [vmem:[%s6610_s27 + $0x50] sm:$0xf0]  ;;  %v4318_v39 = vld [vmem:[%s6610_s27 + $0x48] sm:$0xf]  ;;  %v4311_v48 = vor.u32 %v5508_v42, %v4310_v41 }
 0x18d   : > { %1128 = vmatpush.bf16.msra.mxu0 %v4343_v24  ;;  %v5509_v44 = vld [vmem:[%s6610_s27 + $0x54] sm:$0xf0]  ;;  %v5507_v45 = vld [vmem:[%s6610_s27 + $0x4c] sm:$0xf]  ;;  %v4320_v47 = vld [vmem:[%s6610_s27 + $0x58] sm:$0xf0]  ;;  %v4315_v49 = vor.u32 %v5506_v43, %v4312_v38 }
 0x18e   : > { %1157 = vmatpush.bf16.msra.mxu1 %v4347_v25  ;;  %1186 = vmatpush.bf16.msra.mxu2 %v4351_v26  ;;  %v4319_v50 = vor.u32 %v5509_v44, %v4318_v39  ;;  %v4294_v51 = vld [vmem:[%s6610_s27 + $0x20] sm:$0xf]  ;;  %v5504_v52 = vld [vmem:[%s6610_s27 + $0x2c] sm:$0xf0]  ;;  %v5502_v53 = vld [vmem:[%s6610_s27 + $0x24] sm:$0xf]  ;;  %v4323_v54 = vor.u32 %v5507_v45, %v4320_v47 }
 0x18f   : > { %1215 = vmatpush.bf16.msra.mxu3 %v4355_v30  ;;  %v4296_v55 = vld [vmem:[%s6610_s27 + $0x30] sm:$0xf0]  ;;  %v4302_v56 = vld [vmem:[%s6610_s27 + $0x28] sm:$0xf]  ;;  %v5505_v57 = vld [vmem:[%s6610_s27 + $0x34] sm:$0xf0]  ;;  %v4295_v60 = vor.u32 %v5504_v52, %v4294_v51 }
 0x190   : > { %v5503_v58 = vld [vmem:[%s6610_s27 + $0x2c] sm:$0xf]  ;;  %v4304_v59 = vld [vmem:[%s6610_s27 + $0x38] sm:$0xf0]  ;;  %v4299_v61 = vor.u32 %v5502_v53, %v4296_v55  ;;  %v4303_v62 = vor.u32 %v5505_v57, %v4302_v56  ;;  %v4278_v63 = vld [vmem:[%s6610_s27] sm:$0xf] }
 0x191   : > { %1129 = vmatpush.bf16.msra.mxu0 %v4327_v36  ;;  %v5500_v1 = vld [vmem:[%s6610_s27 + $0xc] sm:$0xf0]  ;;  %v5498_v2 = vld [vmem:[%s6610_s27 + $0x4] sm:$0xf]  ;;  %v4307_v3 = vor.u32 %v5503_v58, %v4304_v59  ;;  %v4280_v4 = vld [vmem:[%s6610_s27 + $0x10] sm:$0xf0] }
 0x192   : > { %1158 = vmatpush.bf16.msra.mxu1 %v4331_v37  ;;  %1187 = vmatpush.bf16.msra.mxu2 %v4335_v40  ;;  %v4286_v5 = vld [vmem:[%s6610_s27 + $0x8] sm:$0xf]  ;;  %v5501_v6 = vld [vmem:[%s6610_s27 + $0x14] sm:$0xf0]  ;;  %v5499_v7 = vld [vmem:[%s6610_s27 + $0xc] sm:$0xf]  ;;  %v4279_v9 = vor.u32 %v5500_v1, %v4278_v63  ;;  %v4283_v10 = vor.u32 %v5498_v2, %v4280_v4 }
 0x193   : > { %1216 = vmatpush.bf16.msra.mxu3 %v4339_v46  ;;  %v4288_v8 = vld [vmem:[%s6610_s27 + $0x18] sm:$0xf0]  ;;  %v4287_v11 = vor.u32 %v5501_v6, %v4286_v5  ;;  %v5530_v13 = vld [vmem:[#allocation14] sm:$0xff]  ;;  %v5531_v14 = vld [vmem:[#allocation14 + $0x8] sm:$0xff]  ;;  %v6802_v17 = vperm.slane %v6622_v0, 0  ;;  %v6805_v18 = vperm.slane %v6622_v0, 1 }
 0x194   : > { %v4291_v12 = vor.u32 %v5499_v7, %v4288_v8  ;;  %v5532_v15 = vld [vmem:[#allocation14 + $0x10] sm:$0xff]  ;;  %v5533_v16 = vld [vmem:[#allocation14 + $0x18] sm:$0xff]  ;;  %v6810_v23 = vperm.slane %v6622_v0, 2  ;;  %v6813_v24 = vperm.slane %v6622_v0, 3 }
 0x195   : > { %1130 = vmatpush.bf16.msra.mxu0 %v4311_v48 }
 0x196   : > { %1159 = vmatpush.bf16.msra.mxu1 %v4315_v49  ;;  %1188 = vmatpush.bf16.msra.mxu2 %v4319_v50 }
 0x197   : > { %1217 = vmatpush.bf16.msra.mxu3 %v4323_v54 }
 0x199   : > { %1131 = vmatpush.bf16.msra.mxu0 %v4295_v60 }
 0x19a   : > { %1160 = vmatpush.bf16.msra.mxu1 %v4299_v61  ;;  %1189 = vmatpush.bf16.msra.mxu2 %v4303_v62 }
 0x19b   : > { %1218 = vmatpush.bf16.msra.mxu3 %v4307_v3 }
 0x19d   : > { %1132 = vmatpush.bf16.msra.mxu0 %v4279_v9 }
 0x19e   : > { %1161 = vmatpush.bf16.msra.mxu1 %v4283_v10  ;;  %1190 = vmatpush.bf16.msra.mxu2 %v4287_v11 }
 0x19f   : > { %1219 = vmatpush.bf16.msra.mxu3 %v4291_v12 }
 0x1a0   : > { %1133 = vmatmul.bf16.vlgmr.msra.gmra.mxu0 %v5530_v13 }
 0x1a1   : > { %1162 = vmatmul.bf16.vlgmr.msra.gmra.mxu1 %v5530_v13  ;;  %1191 = vmatmul.bf16.vlgmr.msra.gmra.mxu2 %v5530_v13 }
 0x1a2   : > { %1220 = vmatmul.bf16.vlgmr.msra.gmra.mxu3 %v5530_v13 }
 0x1b0   : > { %1138 = vmatmul.bf16.gmra.mxu0 %v5531_v14 }
 0x1b1   : > { %1167 = vmatmul.bf16.gmra.mxu1 %v5531_v14  ;;  %1196 = vmatmul.bf16.gmra.mxu2 %v5531_v14 }
 0x1b2   : > { %1225 = vmatmul.bf16.gmra.mxu3 %v5531_v14 }
 0x1c0   : > { %1143 = vmatmul.bf16.gmra.mxu0 %v5532_v15 }
 0x1c1   : > { %1172 = vmatmul.bf16.gmra.mxu1 %v5532_v15  ;;  %1201 = vmatmul.bf16.gmra.mxu2 %v5532_v15 }
 0x1c2   : > { %1230 = vmatmul.bf16.gmra.mxu3 %v5532_v15 }
 0x1d0   : > { %1148 = vmatmul.bf16.gmra.mxu0 %v5533_v16 }
 0x1d1   : > { %1177 = vmatmul.bf16.gmra.mxu1 %v5533_v16  ;;  %1206 = vmatmul.bf16.gmra.mxu2 %v5533_v16 }
 0x1d2   : > { %1235 = vmatmul.bf16.gmra.mxu3 %v5533_v16 }
 0x21d   : > { %v1134_v19 = vpop.f32.mrf.mxu0 }
 0x21e   : > { %v1135_v20 = vadd.f32 %v1134_v19, %v6802_v17  ;;  %v1163_v21 = vpop.f32.mrf.mxu1 }
 0x21f   : > { %v1164_v22 = vadd.f32 %v1163_v21, %v6805_v18 }
 0x220   : > { %1241 = vst [vmem:[#allocation2 + $0xb0] sm:$0xff] %v1135_v20 }
 0x221   : > { %1242 = vst [vmem:[#allocation2] sm:$0xff] %v1164_v22 }
 0x224   : > { %v1192_v25 = vpop.f32.mrf.mxu2 }
 0x225   : > { %v1193_v26 = vadd.f32 %v1192_v25, %v6810_v23  ;;  %v1221_v27 = vpop.f32.mrf.mxu3  ;;  %v1136_v28 = vpop.f32.mrf.mxu0 }
 0x226   : > { %v1222_v29 = vadd.f32 %v1221_v27, %v6813_v24  ;;  %v1137_v30 = vadd.f32 %v1136_v28, %v6802_v17  ;;  %v1165_v31 = vpop.f32.mrf.mxu1 }
 0x227   : > { %1243 = vst [vmem:[#allocation2 + $0xd8] sm:$0xff] %v1193_v26  ;;  %v1166_v32 = vadd.f32 %v1165_v31, %v6805_v18 }
 0x228   : > { %1244 = vst [vmem:[#allocation2 + $0x18] sm:$0xff] %v1222_v29 }
 0x229   : > { %1245 = vst [vmem:[#allocation2 + $0x50] sm:$0xff] %v1137_v30 }
 0x22a   : > { %1246 = vst [vmem:[#allocation2 + $0x68] sm:$0xff] %v1166_v32 }
 0x22c   : > { %v1194_v33 = vpop.f32.mrf.mxu2 }
 0x22d   : > { %v1195_v0 = vadd.f32 %v1194_v33, %v6810_v23  ;;  %v1223_v34 = vpop.f32.mrf.mxu3  ;;  %v1139_v35 = vpop.f32.mrf.mxu0 }
 0x22e   : > { %v1224_v36 = vadd.f32 %v1223_v34, %v6813_v24  ;;  %v1140_v37 = vadd.f32 %v1139_v35, %v6802_v17  ;;  %v1168_v40 = vpop.f32.mrf.mxu1 }
 0x22f   : > { %1247 = vst [vmem:[#allocation2 + $0x30] sm:$0xff] %v1195_v0  ;;  %v1169_v41 = vadd.f32 %v1168_v40, %v6805_v18 }
 0x230   : > { %1248 = vst [vmem:[#allocation2 + $0x48] sm:$0xff] %v1224_v36 }
 0x231   : > { %1249 = vst [vmem:[#allocation2 + $0x80] sm:$0xff] %v1140_v37 }
 0x232   : > { %1250 = vst [vmem:[#allocation2 + $0x88] sm:$0xff] %v1169_v41 }
 0x234   : > { %v1197_v42 = vpop.f32.mrf.mxu2 }
 0x235   : > { %v1198_v43 = vadd.f32 %v1197_v42, %v6810_v23  ;;  %v1226_v46 = vpop.f32.mrf.mxu3  ;;  %v1141_v38 = vpop.f32.mrf.mxu0 }
 0x236   : > { %v1227_v39 = vadd.f32 %v1226_v46, %v6813_v24  ;;  %v1142_v44 = vadd.f32 %v1141_v38, %v6802_v17  ;;  %v1170_v45 = vpop.f32.mrf.mxu1 }
 0x237   : > { %1251 = vst [vmem:[#allocation2 + $0xe8] sm:$0xff] %v1198_v43  ;;  %v1171_v47 = vadd.f32 %v1170_v45, %v6805_v18 }
 0x238   : > { %1252 = vst [vmem:[#allocation2 + $0xb8] sm:$0xff] %v1227_v39 }
 0x239   : > { %1253 = vst [vmem:[#allocation2 + $0x60] sm:$0xff] %v1142_v44 }
 0x23a   : > { %1254 = vst [vmem:[#allocation2 + $0xf0] sm:$0xff] %v1171_v47 }
 0x23c   : > { %v1199_v48 = vpop.f32.mrf.mxu2 }
 0x23d   : > { %v1200_v49 = vadd.f32 %v1199_v48, %v6810_v23  ;;  %v1228_v50 = vpop.f32.mrf.mxu3  ;;  %v1144_v51 = vpop.f32.mrf.mxu0 }
 0x23e   : > { %v1229_v52 = vadd.f32 %v1228_v50, %v6813_v24  ;;  %v1145_v53 = vadd.f32 %v1144_v51, %v6802_v17  ;;  %v1173_v54 = vpop.f32.mrf.mxu1 }
 0x23f   : > { %1255 = vst [vmem:[#allocation2 + $0x8] sm:$0xff] %v1200_v49  ;;  %v1174_v55 = vadd.f32 %v1173_v54, %v6805_v18 }
 0x240   : > { %1256 = vst [vmem:[#allocation2 + $0x78] sm:$0xff] %v1229_v52 }
 0x241   : > { %1257 = vst [vmem:[#allocation2 + $0x38] sm:$0xff] %v1145_v53 }
 0x242   : > { %1258 = vst [vmem:[#allocation2 + $0x58] sm:$0xff] %v1174_v55 }
 0x244   : > { %v1202_v56 = vpop.f32.mrf.mxu2 }
 0x245   : > { %v1203_v57 = vadd.f32 %v1202_v56, %v6810_v23  ;;  %v1231_v58 = vpop.f32.mrf.mxu3  ;;  %v1146_v59 = vpop.f32.mrf.mxu0 }
 0x246   : > { %v1232_v60 = vadd.f32 %v1231_v58, %v6813_v24  ;;  %v1147_v61 = vadd.f32 %v1146_v59, %v6802_v17  ;;  %v1175_v62 = vpop.f32.mrf.mxu1 }
 0x247   : > { %1259 = vst [vmem:[#allocation2 + $0x40] sm:$0xff] %v1203_v57  ;;  %v1176_v63 = vadd.f32 %v1175_v62, %v6805_v18 }
 0x248   : > { %1260 = vst [vmem:[#allocation2 + $0xc8] sm:$0xff] %v1232_v60 }
 0x249   : > { %1261 = vst [vmem:[#allocation2 + $0xe0] sm:$0xff] %v1147_v61 }
 0x24a   : > { %1262 = vst [vmem:[#allocation2 + $0x90] sm:$0xff] %v1176_v63 }
 0x24c   : > { %v1204_v1 = vpop.f32.mrf.mxu2 }
 0x24d   : > { %v1205_v2 = vadd.f32 %v1204_v1, %v6810_v23  ;;  %v1233_v3 = vpop.f32.mrf.mxu3  ;;  %v1149_v4 = vpop.f32.mrf.mxu0 }
 0x24e   : > { %v1234_v5 = vadd.f32 %v1233_v3, %v6813_v24  ;;  %v1150_v6 = vadd.f32 %v1149_v4, %v6802_v17  ;;  %v1178_v7 = vpop.f32.mrf.mxu1 }
 0x24f   : > { %1263 = vst [vmem:[#allocation2 + $0x70] sm:$0xff] %v1205_v2  ;;  %v1179_v8 = vadd.f32 %v1178_v7, %v6805_v18 }
 0x250   : > { %1264 = vst [vmem:[#allocation2 + $0xc0] sm:$0xff] %v1234_v5 }
 0x251   : > { %1265 = vst [vmem:[#allocation2 + $0xa8] sm:$0xff] %v1150_v6 }
 0x252   : > { %1266 = vst [vmem:[#allocation2 + $0xd0] sm:$0xff] %v1179_v8 }
 0x254   : > { %v1207_v9 = vpop.f32.mrf.mxu2 }
 0x255   : > { %v1208_v10 = vadd.f32 %v1207_v9, %v6810_v23  ;;  %v1236_v11 = vpop.f32.mrf.mxu3  ;;  %v1151_v12 = vpop.f32.mrf.mxu0 }
 0x256   : > { %v1237_v13 = vadd.f32 %v1236_v11, %v6813_v24  ;;  %v1152_v14 = vadd.f32 %v1151_v12, %v6802_v17  ;;  %v1180_v15 = vpop.f32.mrf.mxu1 }
 0x257   : > { %1267 = vst [vmem:[#allocation2 + $0x10] sm:$0xff] %v1208_v10  ;;  %v1181_v16 = vadd.f32 %v1180_v15, %v6805_v18 }
 0x258   : > { %1268 = vst [vmem:[#allocation2 + $0x28] sm:$0xff] %v1237_v13 }
 0x259   : > { %1269 = vst [vmem:[#allocation2 + $0xa0] sm:$0xff] %v1152_v14 }
 0x25a   : > { %1270 = vst [vmem:[#allocation2 + $0xf8] sm:$0xff] %v1181_v16 }
 0x25c   : > { %v1209_v19 = vpop.f32.mrf.mxu2 }
 0x25d   : > { %v1210_v20 = vadd.f32 %v1209_v19, %v6810_v23  ;;  %v1238_v21 = vpop.f32.mrf.mxu3 }
 0x25e   : > { %v1239_v22 = vadd.f32 %v1238_v21, %v6813_v24 }
 0x25f   : > { %1271 = vst [vmem:[#allocation2 + $0x20] sm:$0xff] %v1210_v20 }
 0x260   : > { %1272 = vst [vmem:[#allocation2 + $0x98] sm:$0xff] %v1239_v22 }
 0x261 PF: > { %v4518_v17 = vld [vmem:[%s6616_s1 + $0xe0] sm:$0xf]  ;;  %v5564_v18 = vld [vmem:[%s6616_s1 + $0xec] sm:$0xf0]  ;;  %v5562_v23 = vld [vmem:[%s6616_s1 + $0xe4] sm:$0xf] }
 0x262   : > { %v4519_v25 = vor.u32 %v5564_v18, %v4518_v17  ;;  %v4520_v24 = vld [vmem:[%s6616_s1 + $0xf0] sm:$0xf0]  ;;  %v5563_v26 = vld [vmem:[%s6616_s1 + $0xec] sm:$0xf]  ;;  %v4528_v27 = vld [vmem:[%s6616_s1 + $0xf8] sm:$0xf0] }
 0x263   : > { %v4523_v28 = vor.u32 %v5562_v23, %v4520_v24  ;;  %v4531_v29 = vor.u32 %v5563_v26, %v4528_v27  ;;  %v4502_v30 = vld [vmem:[%s6616_s1 + $0xc0] sm:$0xf]  ;;  %v5560_v31 = vld [vmem:[%s6616_s1 + $0xcc] sm:$0xf0]  ;;  %v5558_v32 = vld [vmem:[%s6616_s1 + $0xc4] sm:$0xf] }
 0x264   : > { %1472 = vmatpush.bf16.msra.mxu0 %v4519_v25  ;;  %v4503_v33 = vor.u32 %v5560_v31, %v4502_v30  ;;  %v4504_v0 = vld [vmem:[%s6616_s1 + $0xd0] sm:$0xf0]  ;;  %v5559_v34 = vld [vmem:[%s6616_s1 + $0xcc] sm:$0xf]  ;;  %v4512_v35 = vld [vmem:[%s6616_s1 + $0xd8] sm:$0xf0] }
 0x265   : > { %1485 = vmatpush.bf16.msra.mxu1 %v4523_v28  ;;  %1511 = vmatpush.bf16.msra.mxu3 %v4531_v29  ;;  %v4507_v36 = vor.u32 %v5558_v32, %v4504_v0  ;;  %v4515_v37 = vor.u32 %v5559_v34, %v4512_v35  ;;  %v4526_v40 = vld [vmem:[%s6616_s1 + $0xe8] sm:$0xf]  ;;  %v5565_v41 = vld [vmem:[%s6616_s1 + $0xf4] sm:$0xf0]  ;;  %v4486_v42 = vld [vmem:[%s6616_s1 + $0xa0] sm:$0xf] }
 0x266   : > { %v4527_v43 = vor.u32 %v5565_v41, %v4526_v40  ;;  %v5556_v46 = vld [vmem:[%s6616_s1 + $0xac] sm:$0xf0]  ;;  %v5554_v38 = vld [vmem:[%s6616_s1 + $0xa4] sm:$0xf]  ;;  %v4488_v39 = vld [vmem:[%s6616_s1 + $0xb0] sm:$0xf0] }
 0x267   : > { %v5555_v44 = vld [vmem:[%s6616_s1 + $0xac] sm:$0xf]  ;;  %v4496_v45 = vld [vmem:[%s6616_s1 + $0xb8] sm:$0xf0]  ;;  %v4510_v47 = vld [vmem:[%s6616_s1 + $0xc8] sm:$0xf]  ;;  %v4487_v48 = vor.u32 %v5556_v46, %v4486_v42  ;;  %v4491_v52 = vor.u32 %v5554_v38, %v4488_v39 }
 0x268   : > { %1473 = vmatpush.bf16.msra.mxu0 %v4503_v33  ;;  %1498 = vmatpush.bf16.msra.mxu2 %v4527_v43  ;;  %v5561_v49 = vld [vmem:[%s6616_s1 + $0xd4] sm:$0xf0]  ;;  %v4470_v50 = vld [vmem:[%s6616_s1 + $0x80] sm:$0xf]  ;;  %v5552_v51 = vld [vmem:[%s6616_s1 + $0x8c] sm:$0xf0]  ;;  %v4499_v53 = vor.u32 %v5555_v44, %v4496_v45 }
 0x269   : > { %1486 = vmatpush.bf16.msra.mxu1 %v4507_v36  ;;  %1512 = vmatpush.bf16.msra.mxu3 %v4515_v37  ;;  %v4511_v54 = vor.u32 %v5561_v49, %v4510_v47  ;;  %v5550_v55 = vld [vmem:[%s6616_s1 + $0x84] sm:$0xf]  ;;  %v4472_v56 = vld [vmem:[%s6616_s1 + $0x90] sm:$0xf0]  ;;  %v5551_v57 = vld [vmem:[%s6616_s1 + $0x8c] sm:$0xf]  ;;  %v4471_v61 = vor.u32 %v5552_v51, %v4470_v50 }
 0x26a   : > { %v4480_v58 = vld [vmem:[%s6616_s1 + $0x98] sm:$0xf0]  ;;  %v4494_v59 = vld [vmem:[%s6616_s1 + $0xa8] sm:$0xf]  ;;  %v5557_v60 = vld [vmem:[%s6616_s1 + $0xb4] sm:$0xf0]  ;;  %v4475_v2 = vor.u32 %v5550_v55, %v4472_v56 }
 0x26b   : > { %v4495_v62 = vor.u32 %v5557_v60, %v4494_v59  ;;  %v4454_v63 = vld [vmem:[%s6616_s1 + $0x60] sm:$0xf]  ;;  %v5548_v1 = vld [vmem:[%s6616_s1 + $0x6c] sm:$0xf0]  ;;  %v4483_v3 = vor.u32 %v5551_v57, %v4480_v58  ;;  %v5546_v4 = vld [vmem:[%s6616_s1 + $0x64] sm:$0xf] }
 0x26c   : > { %1474 = vmatpush.bf16.msra.mxu0 %v4487_v48  ;;  %1499 = vmatpush.bf16.msra.mxu2 %v4511_v54  ;;  %v4478_v5 = vld [vmem:[%s6616_s1 + $0x88] sm:$0xf]  ;;  %v5553_v6 = vld [vmem:[%s6616_s1 + $0x94] sm:$0xf0]  ;;  %v4456_v7 = vld [vmem:[%s6616_s1 + $0x70] sm:$0xf0]  ;;  %v4455_v10 = vor.u32 %v5548_v1, %v4454_v63 }
 0x26d   : > { %1487 = vmatpush.bf16.msra.mxu1 %v4491_v52  ;;  %1513 = vmatpush.bf16.msra.mxu3 %v4499_v53  ;;  %v5547_v8 = vld [vmem:[%s6616_s1 + $0x6c] sm:$0xf]  ;;  %v4464_v9 = vld [vmem:[%s6616_s1 + $0x78] sm:$0xf0]  ;;  %v4479_v11 = vor.u32 %v5553_v6, %v4478_v5  ;;  %v4438_v12 = vld [vmem:[%s6616_s1 + $0x40] sm:$0xf]  ;;  %v4459_v14 = vor.u32 %v5546_v4, %v4456_v7 }
 0x26e   : > { %v5544_v13 = vld [vmem:[%s6616_s1 + $0x4c] sm:$0xf0]  ;;  %v4467_v15 = vor.u32 %v5547_v8, %v4464_v9  ;;  %v5542_v16 = vld [vmem:[%s6616_s1 + $0x44] sm:$0xf]  ;;  %v4462_v19 = vld [vmem:[%s6616_s1 + $0x68] sm:$0xf] }
 0x26f   : > { %v5549_v20 = vld [vmem:[%s6616_s1 + $0x74] sm:$0xf0]  ;;  %v4440_v21 = vld [vmem:[%s6616_s1 + $0x50] sm:$0xf0]  ;;  %v5543_v22 = vld [vmem:[%s6616_s1 + $0x4c] sm:$0xf]  ;;  %v4439_v18 = vor.u32 %v5544_v13, %v4438_v12 }
 0x270   : > { %1475 = vmatpush.bf16.msra.mxu0 %v4471_v61  ;;  %1500 = vmatpush.bf16.msra.mxu2 %v4495_v62  ;;  %v4448_v17 = vld [vmem:[%s6616_s1 + $0x58] sm:$0xf0]  ;;  %v4463_v23 = vor.u32 %v5549_v20, %v4462_v19  ;;  %v4422_v25 = vld [vmem:[%s6616_s1 + $0x20] sm:$0xf]  ;;  %v5540_v24 = vld [vmem:[%s6616_s1 + $0x2c] sm:$0xf0]  ;;  %v4443_v27 = vor.u32 %v5542_v16, %v4440_v21 }
 0x271   : > { %1488 = vmatpush.bf16.msra.mxu1 %v4475_v2  ;;  %1514 = vmatpush.bf16.msra.mxu3 %v4483_v3  ;;  %v5538_v26 = vld [vmem:[%s6616_s1 + $0x24] sm:$0xf]  ;;  %v4451_v28 = vor.u32 %v5543_v22, %v4448_v17  ;;  %v4446_v29 = vld [vmem:[%s6616_s1 + $0x48] sm:$0xf]  ;;  %v5545_v30 = vld [vmem:[%s6616_s1 + $0x54] sm:$0xf0]  ;;  %v4423_v0 = vor.u32 %v5540_v24, %v4422_v25 }
 0x272   : > { %v4424_v31 = vld [vmem:[%s6616_s1 + $0x30] sm:$0xf0]  ;;  %v5539_v32 = vld [vmem:[%s6616_s1 + $0x2c] sm:$0xf]  ;;  %v4432_v33 = vld [vmem:[%s6616_s1 + $0x38] sm:$0xf0]  ;;  %v4447_v34 = vor.u32 %v5545_v30, %v4446_v29 }
 0x273   : > { %v4406_v35 = vld [vmem:[%s6616_s1] sm:$0xf]  ;;  %v5536_v36 = vld [vmem:[%s6616_s1 + $0xc] sm:$0xf0]  ;;  %v4427_v37 = vor.u32 %v5538_v26, %v4424_v31  ;;  %v4435_v40 = vor.u32 %v5539_v32, %v4432_v33  ;;  %v5534_v41 = vld [vmem:[%s6616_s1 + $0x4] sm:$0xf] }
 0x274   : > { %1476 = vmatpush.bf16.msra.mxu0 %v4455_v10  ;;  %1501 = vmatpush.bf16.msra.mxu2 %v4479_v11  ;;  %v4430_v42 = vld [vmem:[%s6616_s1 + $0x28] sm:$0xf]  ;;  %v5541_v43 = vld [vmem:[%s6616_s1 + $0x34] sm:$0xf0]  ;;  %v4408_v46 = vld [vmem:[%s6616_s1 + $0x10] sm:$0xf0]  ;;  %v4407_v44 = vor.u32 %v5536_v36, %v4406_v35 }
 0x275   : > { %1489 = vmatpush.bf16.msra.mxu1 %v4459_v14  ;;  %1515 = vmatpush.bf16.msra.mxu3 %v4467_v15  ;;  %v5535_v38 = vld [vmem:[%s6616_s1 + $0xc] sm:$0xf]  ;;  %v4416_v39 = vld [vmem:[%s6616_s1 + $0x18] sm:$0xf0]  ;;  %v4431_v47 = vor.u32 %v5541_v43, %v4430_v42  ;;  %v4411_v48 = vor.u32 %v5534_v41, %v4408_v46  ;;  %v4414_v50 = vld [vmem:[%s6616_s1 + $0x8] sm:$0xf] }
 0x276   : > { %v1273_v45 = vld [vmem:[%s403_s11] sm:$0xff]  ;;  %v4419_v49 = vor.u32 %v5535_v38, %v4416_v39  ;;  %v5537_v51 = vld [vmem:[%s6616_s1 + $0x14] sm:$0xf0]  ;;  %v5596_v55 = vld [vmem:[%s6616_s1 + $0xec] sm:$0xf0]  ;;  %s5455_s13 = sshll.u32 %s6501_s12, 3 }
 0x277   : > { %v1279_v52 = vpack.c.bf16 %v1273_v45, %v1273_v45  ;;  %v4415_v53 = vor.u32 %v5537_v51, %v4414_v50  ;;  %v4649_v54 = vld [vmem:[%s6616_s1 + $0xe0] sm:$0xf]  ;;  %v5594_v56 = vld [vmem:[%s6616_s1 + $0xe4] sm:$0xf]  ;;  %v4651_v58 = vld [vmem:[%s6616_s1 + $0xf0] sm:$0xf0]  ;;  %s3858_s8 = scalar_lea.hbm %s7480_s7, %s5455_s13 }
 0x278   : > { %1477 = vmatpush.bf16.msra.mxu0 %v4439_v18  ;;  %1502 = vmatpush.bf16.msra.mxu2 %v4463_v23  ;;  %v4650_v57 = vor.u32 %v5596_v55, %v4649_v54  ;;  %v4657_v59 = vld [vmem:[%s6616_s1 + $0xe8] sm:$0xf]  ;;  %v5597_v60 = vld [vmem:[%s6616_s1 + $0xf4] sm:$0xf0]  ;;  %v4654_v61 = vor.u32 %v5594_v56, %v4651_v58  ;;  %v5595_v63 = vld [vmem:[%s6616_s1 + $0xec] sm:$0xf] }
 0x279   : > { %1490 = vmatpush.bf16.msra.mxu1 %v4443_v27  ;;  %1516 = vmatpush.bf16.msra.mxu3 %v4451_v28  ;;  %v4658_v62 = vor.u32 %v5597_v60, %v4657_v59  ;;  %v4659_v1 = vld [vmem:[%s6616_s1 + $0xf8] sm:$0xf0]  ;;  %v4633_v3 = vld [vmem:[%s6616_s1 + $0xc0] sm:$0xf]  ;;  %v5592_v4 = vld [vmem:[%s6616_s1 + $0xcc] sm:$0xf0] }
 0x27a   : > { %v4662_v2 = vor.u32 %v5595_v63, %v4659_v1  ;;  %v5590_v5 = vld [vmem:[%s6616_s1 + $0xc4] sm:$0xf]  ;;  %v4634_v6 = vor.u32 %v5592_v4, %v4633_v3  ;;  %v4635_v7 = vld [vmem:[%s6616_s1 + $0xd0] sm:$0xf0]  ;;  %v4641_v8 = vld [vmem:[%s6616_s1 + $0xc8] sm:$0xf] }
 0x27b   : > { %v5593_v9 = vld [vmem:[%s6616_s1 + $0xd4] sm:$0xf0]  ;;  %v4638_v10 = vor.u32 %v5590_v5, %v4635_v7  ;;  %v5591_v12 = vld [vmem:[%s6616_s1 + $0xcc] sm:$0xf]  ;;  %v4643_v13 = vld [vmem:[%s6616_s1 + $0xd8] sm:$0xf0] }
 0x27c   : > { %1478 = vmatpush.bf16.msra.mxu0 %v4423_v0  ;;  %1503 = vmatpush.bf16.msra.mxu2 %v4447_v34  ;;  %v4642_v11 = vor.u32 %v5593_v9, %v4641_v8  ;;  %v4646_v14 = vor.u32 %v5591_v12, %v4643_v13  ;;  %v4617_v15 = vld [vmem:[%s6616_s1 + $0xa0] sm:$0xf]  ;;  %v5588_v16 = vld [vmem:[%s6616_s1 + $0xac] sm:$0xf0]  ;;  %v5586_v20 = vld [vmem:[%s6616_s1 + $0xa4] sm:$0xf] }
 0x27d   : > { %1491 = vmatpush.bf16.msra.mxu1 %v4427_v37  ;;  %1517 = vmatpush.bf16.msra.mxu3 %v4435_v40  ;;  %v4618_v19 = vor.u32 %v5588_v16, %v4617_v15  ;;  %v4619_v21 = vld [vmem:[%s6616_s1 + $0xb0] sm:$0xf0]  ;;  %v4625_v22 = vld [vmem:[%s6616_s1 + $0xa8] sm:$0xf]  ;;  %v5589_v18 = vld [vmem:[%s6616_s1 + $0xb4] sm:$0xf0] }
 0x27e   : > { %v4622_v17 = vor.u32 %v5586_v20, %v4619_v21  ;;  %v5587_v23 = vld [vmem:[%s6616_s1 + $0xac] sm:$0xf]  ;;  %v4627_v25 = vld [vmem:[%s6616_s1 + $0xb8] sm:$0xf0]  ;;  %v4626_v24 = vor.u32 %v5589_v18, %v4625_v22  ;;  %v4601_v27 = vld [vmem:[%s6616_s1 + $0x80] sm:$0xf] }
 0x27f   : > { %v4630_v26 = vor.u32 %v5587_v23, %v4627_v25  ;;  %v5584_v28 = vld [vmem:[%s6616_s1 + $0x8c] sm:$0xf0]  ;;  %v5582_v29 = vld [vmem:[%s6616_s1 + $0x84] sm:$0xf]  ;;  %v4603_v31 = vld [vmem:[%s6616_s1 + $0x90] sm:$0xf0] }
 0x280   : > { %1479 = vmatpush.bf16.msra.mxu0 %v4407_v44  ;;  %1504 = vmatpush.bf16.msra.mxu2 %v4431_v47  ;;  %v4602_v30 = vor.u32 %v5584_v28, %v4601_v27  ;;  %v4609_v32 = vld [vmem:[%s6616_s1 + $0x88] sm:$0xf]  ;;  %v5585_v33 = vld [vmem:[%s6616_s1 + $0x94] sm:$0xf0]  ;;  %v4606_v0 = vor.u32 %v5582_v29, %v4603_v31  ;;  %v5583_v35 = vld [vmem:[%s6616_s1 + $0x8c] sm:$0xf] }
 0x281   : > { %1492 = vmatpush.bf16.msra.mxu1 %v4411_v48  ;;  %1518 = vmatpush.bf16.msra.mxu3 %v4419_v49  ;;  %v4610_v34 = vor.u32 %v5585_v33, %v4609_v32  ;;  %v4611_v36 = vld [vmem:[%s6616_s1 + $0x98] sm:$0xf0]  ;;  %v1275_v37 = vld [vmem:[#allocation2 + $0xb0] sm:$0xff]  ;;  %v4585_v41 = vld [vmem:[%s6616_s1 + $0x60] sm:$0xf]  ;;  %s7397_s25 = sshll.u32 %s494_s26, 4  ;;  %s3861_s25 = int_to_ptr.vmem [resolvable:$true] %s7397_s25 }
 0x282   : > { %v4614_v40 = vor.u32 %v5583_v35, %v4611_v36  ;;  %v5580_v42 = vld [vmem:[%s6616_s1 + $0x6c] sm:$0xf0]  ;;  %v5578_v43 = vld [vmem:[%s6616_s1 + $0x64] sm:$0xf]  ;;  %v4587_v39 = vld [vmem:[%s6616_s1 + $0x70] sm:$0xf0] }
 0x283   : > { %1480 = vmatmul.bf16.vlgmr.msra.gmra.mxu0 %v1279_v52  ;;  %v1276_v46 = vld [vmem:[#allocation2] sm:$0xff]  ;;  %v4586_v38 = vor.u32 %v5580_v42, %v4585_v41  ;;  %v4593_v44 = vld [vmem:[%s6616_s1 + $0x68] sm:$0xf]  ;;  %v4590_v47 = vor.u32 %v5578_v43, %v4587_v39  ;;  %v5581_v48 = vld [vmem:[%s6616_s1 + $0x74] sm:$0xf0]  ;;  %s7524_s6 = sld [smem:[#allocation33_spill]] }
 0x284   : > { %1493 = vmatmul.bf16.vlgmr.msra.gmra.mxu1 %v1279_v52  ;;  %1519 = vmatmul.bf16.vlgmr.msra.gmra.mxu3 %v1279_v52  ;;  %v5579_v49 = vld [vmem:[%s6616_s1 + $0x6c] sm:$0xf]  ;;  %v4595_v50 = vld [vmem:[%s6616_s1 + $0x78] sm:$0xf0]  ;;  %v4569_v56 = vld [vmem:[%s6616_s1 + $0x40] sm:$0xf] }
 0x285   : > { %1505 = vmatpush.bf16.msra.mxu2 %v4415_v53  ;;  %1790 = vmatpush.bf16.msrb.mxu0 %v4650_v57  ;;  %v4594_v53 = vor.u32 %v5581_v48, %v4593_v44  ;;  %v4598_v54 = vor.u32 %v5579_v49, %v4595_v50  ;;  %v5576_v57 = vld [vmem:[%s6616_s1 + $0x4c] sm:$0xf0]  ;;  %v5574_v58 = vld [vmem:[%s6616_s1 + $0x44] sm:$0xf]  ;;  %v1278_v60 = vld [vmem:[#allocation2 + $0x18] sm:$0xff]  ;;  %s3862_s19 = sshll.u32 %s3858_s8, 4  ;;  %s3863_s19 = int_to_ptr.hbm [resolvable:$true] %s3862_s19 }
 0x286   : > { %1803 = vmatpush.bf16.msrb.mxu1 %v4654_v61  ;;  %1829 = vmatpush.bf16.msrb.mxu3 %v4662_v2  ;;  %v4570_v61 = vor.u32 %v5576_v57, %v4569_v56  ;;  %v4577_v63 = vld [vmem:[%s6616_s1 + $0x48] sm:$0xf]  ;;  %v5577_v3 = vld [vmem:[%s6616_s1 + $0x54] sm:$0xf0]  ;;  %v5575_v4 = vld [vmem:[%s6616_s1 + $0x4c] sm:$0xf] }
 0x287   : > { %v4578_v5 = vor.u32 %v5577_v3, %v4577_v63  ;;  %v4553_v7 = vld [vmem:[%s6616_s1 + $0x20] sm:$0xf]  ;;  %v5572_v8 = vld [vmem:[%s6616_s1 + $0x2c] sm:$0xf0]  ;;  %v4555_v12 = vld [vmem:[%s6616_s1 + $0x30] sm:$0xf0] }
 0x288   : > { %1506 = vmatmul.bf16.vlgmr.msra.gmra.mxu2 %v1279_v52  ;;  %v4561_v13 = vld [vmem:[%s6616_s1 + $0x28] sm:$0xf]  ;;  %v5573_v16 = vld [vmem:[%s6616_s1 + $0x34] sm:$0xf0]  ;;  %v4563_v20 = vld [vmem:[%s6616_s1 + $0x38] sm:$0xf0] }
 0x289   : > { %1816 = vmatpush.bf16.msrb.mxu2 %v4658_v62  ;;  %1791 = vmatpush.bf16.msrb.mxu0 %v4634_v6  ;;  %v4571_v62 = vld [vmem:[%s6616_s1 + $0x50] sm:$0xf0]  ;;  %v4579_v6 = vld [vmem:[%s6616_s1 + $0x58] sm:$0xf0]  ;;  %v4537_v23 = vld [vmem:[%s6616_s1] sm:$0xf]  ;;  %s3872_s29 = scalar_lea.hbm %s7524_s6, %s5455_s13 }
 0x28a   : > { %1804 = vmatpush.bf16.msrb.mxu1 %v4638_v10  ;;  %1830 = vmatpush.bf16.msrb.mxu3 %v4646_v14  ;;  %v4574_v2 = vor.u32 %v5574_v58, %v4571_v62  ;;  %v4582_v9 = vor.u32 %v5575_v4, %v4579_v6  ;;  %v4554_v10 = vor.u32 %v5572_v8, %v4553_v7  ;;  %v5568_v25 = vld [vmem:[%s6616_s1 + $0xc] sm:$0xf0]  ;;  %v4539_v28 = vld [vmem:[%s6616_s1 + $0x10] sm:$0xf0]  ;;  %v4545_v29 = vld [vmem:[%s6616_s1 + $0x8] sm:$0xf] }
 0x28b   : > { %v4538_v27 = vor.u32 %v5568_v25, %v4537_v23  ;;  %v5567_v33 = vld [vmem:[%s6616_s1 + $0xc] sm:$0xf]  ;;  %v1277_v43 = vld [vmem:[#allocation2 + $0xd8] sm:$0xff]  ;;  %v5628_v23 = vld [vmem:[%s6616_s1 + $0xec] sm:$0xf0]  ;;  %s6338_s23 = smov [#allocation14]  }
 0x28c   : > { %v1274_v3 = vld [vmem:[%s413_s16] sm:$0xff]  ;;  %v5626_v25 = vld [vmem:[%s6616_s1 + $0xe4] sm:$0xf]  ;;  %s7402_s11 = sshll.u32 %s6338_s23, 4  ;;  %s7525_s18 = sld [smem:[#allocation32_spill]]  ;;  %s3844_s11 = int_to_ptr.vmem [resolvable:$true] %s7402_s11 }
 0x28d   : > { %1817 = vmatpush.bf16.msrb.mxu2 %v4642_v11  ;;  %1792 = vmatpush.bf16.msrb.mxu0 %v4618_v19  ;;  %v5570_v11 = vld [vmem:[%s6616_s1 + $0x24] sm:$0xf]  ;;  %v5571_v19 = vld [vmem:[%s6616_s1 + $0x2c] sm:$0xf]  ;;  %s7409_s24 = sshll.u32 %s501_s0, 4  ;;  %s3829_s22 = scalar_lea.sflag [#allocation16], %s6597_s14  ;;  %s3875_s24 = int_to_ptr.vmem [resolvable:$true] %s7409_s24 }
 0x28e   : > { %1805 = vmatpush.bf16.msrb.mxu1 %v4622_v17  ;;  %1831 = vmatpush.bf16.msrb.mxu3 %v4630_v26  ;;  %v4558_v15 = vor.u32 %v5570_v11, %v4555_v12  ;;  %v4562_v17 = vor.u32 %v5573_v16, %v4561_v13  ;;  %v4566_v18 = vor.u32 %v5571_v19, %v4563_v20  ;;  %s6213_s8 = scalar_lea.hbm %s7480_s7, 16 }
 0x291   : > { %1818 = vmatpush.bf16.msrb.mxu2 %v4626_v24  ;;  %1793 = vmatpush.bf16.msrb.mxu0 %v4602_v30  ;;  %v5566_v24 = vld [vmem:[%s6616_s1 + $0x4] sm:$0xf]  ;;  %v5569_v30 = vld [vmem:[%s6616_s1 + $0x14] sm:$0xf0] }
 0x292   : > { %1806 = vmatpush.bf16.msrb.mxu1 %v4606_v0  ;;  %1832 = vmatpush.bf16.msrb.mxu3 %v4614_v40  ;;  %v4542_v32 = vor.u32 %v5566_v24, %v4539_v28  ;;  %v4547_v0 = vld [vmem:[%s6616_s1 + $0x18] sm:$0xf0]  ;;  %v4546_v36 = vor.u32 %v5569_v30, %v4545_v29  ;;  %v5629_v28 = vld [vmem:[%s6616_s1 + $0xf4] sm:$0xf0]  ;;  %s3845_s27 = sshll.u32 %s7525_s18, 4  ;;  %s7413_s27 = int_to_ptr.hbm [resolvable:$true] %s3845_s27 }
 0x293   : > { %v4550_v41 = vor.u32 %v5567_v33, %v4547_v0  ;;  %v4764_v0 = vld [vmem:[%s6616_s1 + $0xc0] sm:$0xf] }
 0x295   : > { %1819 = vmatpush.bf16.msrb.mxu2 %v4610_v34  ;;  %1794 = vmatpush.bf16.msrb.mxu0 %v4586_v38 }
 0x296   : > { %1807 = vmatpush.bf16.msrb.mxu1 %v4590_v47  ;;  %1833 = vmatpush.bf16.msrb.mxu3 %v4598_v54 }
 0x299   : > { %1820 = vmatpush.bf16.msrb.mxu2 %v4594_v53  ;;  %1795 = vmatpush.bf16.msrb.mxu0 %v4570_v61 }
 0x29a   : > { %1808 = vmatpush.bf16.msrb.mxu1 %v4574_v2  ;;  %1834 = vmatpush.bf16.msrb.mxu3 %v4582_v9 }
 0x29d   : > { %1821 = vmatpush.bf16.msrb.mxu2 %v4578_v5  ;;  %1796 = vmatpush.bf16.msrb.mxu0 %v4554_v10 }
 0x29e   : > { %1809 = vmatpush.bf16.msrb.mxu1 %v4558_v15  ;;  %1835 = vmatpush.bf16.msrb.mxu3 %v4566_v18  ;;  %v4780_v18 = vld [vmem:[%s6616_s1 + $0xe0] sm:$0xf] }
 0x29f   : > { %v4781_v24 = vor.u32 %v5628_v23, %v4780_v18 }
 0x2a1   : > { %1822 = vmatpush.bf16.msrb.mxu2 %v4562_v17  ;;  %1797 = vmatpush.bf16.msrb.mxu0 %v4538_v27  ;;  %v4788_v27 = vld [vmem:[%s6616_s1 + $0xe8] sm:$0xf] }
 0x2a2   : > { %1810 = vmatpush.bf16.msrb.mxu1 %v4542_v32  ;;  %1836 = vmatpush.bf16.msrb.mxu3 %v4550_v41  ;;  %v4789_v30 = vor.u32 %v5629_v28, %v4788_v27  ;;  %v4790_v32 = vld [vmem:[%s6616_s1 + $0xf8] sm:$0xf0]  ;;  %v5625_v41 = vld [vmem:[%s6616_s1 + $0xd4] sm:$0xf0]  ;;  %v5606_v27 = vld [vmem:[%s6616_s1 + $0x44] sm:$0xf] }
 0x2a5   : > { %1823 = vmatpush.bf16.msrb.mxu2 %v4546_v36  ;;  %2109 = vmatpush.bf16.msra.mxu0 %v4781_v24  ;;  %v4700_v24 = vld [vmem:[%s6616_s1 + $0x40] sm:$0xf] }
 0x2a9   : > { %2135 = vmatpush.bf16.msra.mxu2 %v4789_v30  ;;  %v1597_v30 = vld [vmem:[#allocation2 + $0x48] sm:$0xff] }
 0x300   : > { %v1481_v45 = vpop.f32.mrf.mxu0 }
 0x301   : > { %v1524_v51 = vadd.f32 %v1481_v45, %v1275_v37  ;;  %v1494_v52 = vpop.f32.mrf.mxu1 }
 0x302   : > { %v1525_v55 = vadd.f32 %v1494_v52, %v1276_v46 }
 0x303   : > { %v4532_v59 = vmul.f32 -1.442695, %v1524_v51 }
 0x304   : > { %v4533_v1 = vmul.f32 -1.442695, %v1525_v55 }
 0x305   : > { %5885 = vpow2.f32 %v4532_v59 }
 0x306   : > { %5887 = vpow2.f32 %v4533_v1 }
 0x307   : > { %v1520_v14 = vpop.f32.mrf.mxu3 }
 0x308   : > { %v1527_v21 = vadd.f32 %v1520_v14, %v1278_v60  ;;  %v1483_v22 = vpop.f32.mrf.mxu0 }
 0x309   : > { %v1496_v26 = vpop.f32.mrf.mxu1 }
 0x30a   : > { %v4534_v31 = vmul.f32 -1.442695, %v1527_v21  ;;  %v4782_v26 = vld [vmem:[%s6616_s1 + $0xf0] sm:$0xf0] }
 0x30b   : > { %v5886_v34 = vpop.eup %5885  ;;  %v1507_v35 = vpop.f32.mrf.mxu2  ;;  %v4785_v29 = vor.u32 %v5626_v25, %v4782_v26  ;;  %v5608_v26 = vld [vmem:[%s6616_s1 + $0x4c] sm:$0xf0] }
 0x30c   : > { %v5888_v37 = vpop.eup %5887  ;;  %v1531_v40 = vadd.f32 1.0, %v5886_v34  ;;  %5889 = vpow2.f32 %v4534_v31  ;;  %v1526_v39 = vadd.f32 %v1507_v35, %v1277_v43  ;;  %v5627_v31 = vld [vmem:[%s6616_s1 + $0xec] sm:$0xf]  ;;  %v5624_v34 = vld [vmem:[%s6616_s1 + $0xcc] sm:$0xf0] }
 0x30d   : > { %v1550_v42 = vadd.f32 1.0, %v5888_v37  ;;  %v4793_v33 = vor.u32 %v5627_v31, %v4790_v32  ;;  %2122 = vmatpush.bf16.msra.mxu1 %v4785_v29  ;;  %v5622_v35 = vld [vmem:[%s6616_s1 + $0xc4] sm:$0xf]  ;;  %v4765_v36 = vor.u32 %v5624_v34, %v4764_v0  ;;  %v4766_v37 = vld [vmem:[%s6616_s1 + $0xd0] sm:$0xf0]  ;;  %v4701_v31 = vor.u32 %v5608_v26, %v4700_v24 }
 0x30e   : > { %5891 = vrcp.f32 %v1531_v40  ;;  %v1543_v53 = vand.u32 2147483648, %v1531_v40  ;;  %v1541_v56 = vand.u32 2147483647, %v1531_v40  ;;  %vm1537_vm2 = vweird.f32 %v1531_v40  ;;  %v4702_v32 = vld [vmem:[%s6616_s1 + $0x50] sm:$0xf0] }
 0x30f   : > { %5893 = vrcp.f32 %v1550_v42  ;;  %v1522_v46 = vpop.f32.mrf.mxu3  ;;  %v1562_v54 = vand.u32 2147483648, %v1550_v42  ;;  %v1560_v58 = vand.u32 2147483647, %v1550_v42  ;;  %vm1556_vm3 = vweird.f32 %v1550_v42  ;;  %2148 = vmatpush.bf16.msra.mxu3 %v4793_v33  ;;  %2110 = vmatpush.bf16.msra.mxu0 %v4765_v36  ;;  %v4708_v0 = vld [vmem:[%s6616_s1 + $0x48] sm:$0xf] }
 0x310   : > { %v1544_v63 = vor.u32 1.1754944e-38, %v1543_v53  ;;  %vm1542_vm6 = vcmp.eq.f32.partialorder %v1541_v56, 8.507059e+37  ;;  %v5623_v46 = vld [vmem:[%s6616_s1 + $0xcc] sm:$0xf]  ;;  %v4705_v33 = vor.u32 %v5606_v27, %v4702_v32  ;;  %v5609_v34 = vld [vmem:[%s6616_s1 + $0x54] sm:$0xf0] }
 0x311   : > { %v1563_v2 = vor.u32 1.1754944e-38, %v1562_v54  ;;  %vm1561_vm7 = vcmp.eq.f32.partialorder %v1560_v58, 8.507059e+37  ;;  %v5619_v54 = vld [vmem:[%s6616_s1 + $0xac] sm:$0xf]  ;;  %v5616_v58 = vld [vmem:[%s6616_s1 + $0x8c] sm:$0xf0]  ;;  %v4709_v36 = vor.u32 %v5609_v34, %v4708_v0 }
 0x312   : > { %v5890_v38 = vpop.eup %5889 }
 0x313   : > { %v1570_v44 = vadd.f32 1.0, %v5890_v38  ;;  %v1509_v45 = vpop.f32.mrf.mxu2  ;;  %v4774_v38 = vld [vmem:[%s6616_s1 + $0xd8] sm:$0xf0] }
 0x314   : > { %v5892_v47 = vpop.eup %5891  ;;  %v5620_v45 = vld [vmem:[%s6616_s1 + $0xac] sm:$0xf0] }
 0x315   : > { %v5894_v48 = vpop.eup %5893  ;;  %v1533_v49 = vmul.f32 %v5892_v47, %v1531_v40  ;;  %5895 = vrcp.f32 %v1570_v44  ;;  %vm1538_vm0 = vweird.f32 %v5892_v47  ;;  %v1582_v14 = vand.u32 2147483648, %v1570_v44  ;;  %v4772_v40 = vld [vmem:[%s6616_s1 + $0xc8] sm:$0xf] }
 0x316   : > { %v1552_v50 = vmul.f32 %v5894_v48, %v1550_v42  ;;  %5897 = vtanh.f32 %v1526_v39  ;;  %vm1557_vm1 = vweird.f32 %v5894_v48  ;;  %vm1539_vm4 = vmor %vm1537_vm2, %vm1538_vm0  ;;  %vm1576_vm9 = vweird.f32 %v1570_v44 }
 0x317   : > { %v1534_v51 = vsub.f32 1.0, %v1533_v49  ;;  %vm1558_vm5 = vmor %vm1556_vm3, %vm1557_vm1  ;;  %v1580_v15 = vand.u32 2147483647, %v1570_v44  ;;  %v1583_v19 = vor.u32 1.1754944e-38, %v1582_v14  ;;  %v4769_v42 = vor.u32 %v5622_v35, %v4766_v37  ;;  %v4750_v49 = vld [vmem:[%s6616_s1 + $0xb0] sm:$0xf0] }
 0x318   : > { %v1553_v52 = vsub.f32 1.0, %v1552_v50  ;;  %v4773_v43 = vor.u32 %v5625_v41, %v4772_v40  ;;  %v4777_v39 = vor.u32 %v5623_v46, %v4774_v38  ;;  %v4756_v50 = vld [vmem:[%s6616_s1 + $0xa8] sm:$0xf]  ;;  %v5607_v35 = vld [vmem:[%s6616_s1 + $0x4c] sm:$0xf] }
 0x319   : > { %v1535_v55 = vmul.f32 %v5892_v47, %v1534_v51  ;;  %vm1581_vm11 = vcmp.eq.f32.partialorder %v1580_v15, 8.507059e+37  ;;  %2123 = vmatpush.bf16.msra.mxu1 %v4769_v42  ;;  %v5621_v51 = vld [vmem:[%s6616_s1 + $0xb4] sm:$0xf0]  ;;  %v4724_v14 = vld [vmem:[%s6616_s1 + $0x68] sm:$0xf] }
 0x31a   : > { %v1554_v57 = vmul.f32 %v5894_v48, %v1553_v52  ;;  %2136 = vmatpush.bf16.msra.mxu2 %v4773_v43  ;;  %2149 = vmatpush.bf16.msra.mxu3 %v4777_v39  ;;  %v4757_v53 = vor.u32 %v5621_v51, %v4756_v50  ;;  %v5613_v15 = vld [vmem:[%s6616_s1 + $0x74] sm:$0xf0]  ;;  %v4710_v37 = vld [vmem:[%s6616_s1 + $0x58] sm:$0xf0]  ;;  %v4684_v40 = vld [vmem:[%s6616_s1 + $0x20] sm:$0xf] }
 0x31b   : > { %v5896_v59 = vpop.eup %5895  ;;  %v1536_v60 = vadd.f32 %v5892_v47, %v1535_v55  ;;  %v4758_v55 = vld [vmem:[%s6616_s1 + $0xb8] sm:$0xf0]  ;;  %v5604_v41 = vld [vmem:[%s6616_s1 + $0x2c] sm:$0xf0]  ;;  %v4713_v42 = vor.u32 %v5607_v35, %v4710_v37  ;;  %v5602_v46 = vld [vmem:[%s6616_s1 + $0x24] sm:$0xf] }
 0x31c   : > { %v5898_v61 = vpop.eup %5897  ;;  %v1572_v62 = vmul.f32 %v5896_v59, %v1570_v44  ;;  %v1555_v1 = vadd.f32 %v5894_v48, %v1554_v57  ;;  %vm1577_vm8 = vweird.f32 %v5896_v59  ;;  %v4748_v44 = vld [vmem:[%s6616_s1 + $0xa0] sm:$0xf]  ;;  %v4761_v56 = vor.u32 %v5619_v54, %v4758_v55  ;;  %v4686_v38 = vld [vmem:[%s6616_s1 + $0x30] sm:$0xf0]  ;;  %v4692_v39 = vld [vmem:[%s6616_s1 + $0x28] sm:$0xf] }
 0x31d   : > { %v1540_v4 = vsel %vm1539_vm4, %v5892_v47, %v1536_v60  ;;  %vm1578_vm10 = vmor %vm1576_vm9, %vm1577_vm8  ;;  %v5618_v47 = vld [vmem:[%s6616_s1 + $0xa4] sm:$0xf]  ;;  %v4732_v57 = vld [vmem:[%s6616_s1 + $0x80] sm:$0xf]  ;;  %v4685_v43 = vor.u32 %v5604_v41, %v4684_v40 }
 0x31e   : > { %v1573_v5 = vsub.f32 1.0, %v1572_v62  ;;  %v1545_v6 = vsel %vm1542_vm6, %v1544_v63, %v1540_v4  ;;  %v1559_v7 = vsel %vm1558_vm5, %v5894_v48, %v1555_v1  ;;  %v4749_v48 = vor.u32 %v5620_v45, %v4748_v44  ;;  %2137 = vmatpush.bf16.msra.mxu2 %v4757_v53  ;;  %2150 = vmatpush.bf16.msra.mxu3 %v4761_v56  ;;  %v4740_v62 = vld [vmem:[%s6616_s1 + $0x88] sm:$0xf]  ;;  %v5617_v63 = vld [vmem:[%s6616_s1 + $0x94] sm:$0xf0] }
 0x31f   : > { %v1564_v8 = vsel %vm1561_vm7, %v1563_v2, %v1559_v7  ;;  %v1587_v9 = vmul.f32 %v5898_v61, %v1545_v6  ;;  %v4753_v52 = vor.u32 %v5618_v47, %v4750_v49  ;;  %v4733_v60 = vor.u32 %v5616_v58, %v4732_v57  ;;  %v4734_v61 = vld [vmem:[%s6616_s1 + $0x90] sm:$0xf0]  ;;  %v4742_v4 = vld [vmem:[%s6616_s1 + $0x98] sm:$0xf0]  ;;  %v1595_v6 = vld [vmem:[#allocation2 + $0x68] sm:$0xff] }
 0x320   : > { %v1574_v10 = vmul.f32 %v5896_v59, %v1573_v5  ;;  %v1586_v11 = vmul.f32 %v1564_v8, %v1274_v3  ;;  %2111 = vmatpush.bf16.msra.mxu0 %v4749_v48  ;;  %v4741_v2 = vor.u32 %v5617_v63, %v4740_v62  ;;  %v5615_v3 = vld [vmem:[%s6616_s1 + $0x8c] sm:$0xf]  ;;  %v1594_v5 = vld [vmem:[#allocation2 + $0x50] sm:$0xff]  ;;  %v4716_v8 = vld [vmem:[%s6616_s1 + $0x60] sm:$0xf]  ;;  %v4689_v47 = vor.u32 %v5602_v46, %v4686_v38 }
 0x321   : > { %2124 = vmatpush.bf16.msra.mxu1 %v4753_v52  ;;  %v4745_v7 = vor.u32 %v5615_v3, %v4742_v4  ;;  %v5605_v48 = vld [vmem:[%s6616_s1 + $0x34] sm:$0xf0]  ;;  %v5603_v49 = vld [vmem:[%s6616_s1 + $0x2c] sm:$0xf]  ;;  %v4694_v50 = vld [vmem:[%s6616_s1 + $0x38] sm:$0xf0] }
 0x322   : > { %v6977_v12 = vadd.f32 %v1587_v9, %v1586_v11  ;;  %v1575_v13 = vadd.f32 %v5896_v59, %v1574_v10  ;;  %2138 = vmatpush.bf16.msra.mxu2 %v4741_v2  ;;  %v5612_v9 = vld [vmem:[%s6616_s1 + $0x6c] sm:$0xf0]  ;;  %v5610_v10 = vld [vmem:[%s6616_s1 + $0x64] sm:$0xf]  ;;  %v4693_v54 = vor.u32 %v5605_v48, %v4692_v39  ;;  %v4697_v55 = vor.u32 %v5603_v49, %v4694_v50  ;;  %v4668_v56 = vld [vmem:[%s6616_s1] sm:$0xf] }
 0x323   : > { %2151 = vmatpush.bf16.msra.mxu3 %v4745_v7  ;;  %v4717_v11 = vor.u32 %v5612_v9, %v4716_v8  ;;  %v5600_v57 = vld [vmem:[%s6616_s1 + $0xc] sm:$0xf0]  ;;  %v5598_v58 = vld [vmem:[%s6616_s1 + $0x4] sm:$0xf]  ;;  %v5601_v62 = vld [vmem:[%s6616_s1 + $0x14] sm:$0xf0] }
 0x324   : > { %5899 = vtanh.f32 %v6977_v12  ;;  %v1579_v16 = vsel %vm1578_vm10, %v5896_v59, %v1575_v13  ;;  %v5614_v59 = vld [vmem:[%s6616_s1 + $0x84] sm:$0xf]  ;;  %2112 = vmatpush.bf16.msra.mxu0 %v4733_v60  ;;  %v4718_v13 = vld [vmem:[%s6616_s1 + $0x70] sm:$0xf0]  ;;  %v5599_v2 = vld [vmem:[%s6616_s1 + $0xc] sm:$0xf] }
 0x325   : > { %v1584_v21 = vsel %vm1581_vm11, %v1583_v19, %v1579_v16  ;;  %v4737_v1 = vor.u32 %v5614_v59, %v4734_v61  ;;  %v4669_v59 = vor.u32 %v5600_v57, %v4668_v56  ;;  %v4670_v60 = vld [vmem:[%s6616_s1 + $0x10] sm:$0xf0]  ;;  %v4676_v61 = vld [vmem:[%s6616_s1 + $0x8] sm:$0xf]  ;;  %v4678_v3 = vld [vmem:[%s6616_s1 + $0x18] sm:$0xf0] }
 0x326   : > { %v4681_v8 = vor.u32 %v5599_v2, %v4678_v3  ;;  %v4913_v56 = vld [vmem:[%s6616_s1 + $0xf0] sm:$0xf0]  ;;  %v4919_v57 = vld [vmem:[%s6616_s1 + $0xe8] sm:$0xf]  ;;  %v5656_v2 = vld [vmem:[%s6616_s1 + $0xcc] sm:$0xf0] }
 0x327   : > { %2125 = vmatpush.bf16.msra.mxu1 %v4737_v1  ;;  %v4673_v1 = vor.u32 %v5598_v58, %v4670_v60  ;;  %v5661_v58 = vld [vmem:[%s6616_s1 + $0xf4] sm:$0xf0]  ;;  %v5654_v3 = vld [vmem:[%s6616_s1 + $0xc4] sm:$0xf] }
 0x328   : > { %2113 = vmatpush.bf16.msra.mxu0 %v4717_v11  ;;  %v4920_v60 = vor.u32 %v5661_v58, %v4919_v57  ;;  %v5638_v57 = vld [vmem:[%s6616_s1 + $0x44] sm:$0xf] }
 0x32a   : > { %v5900_v20 = vpop.eup %5899 }
 0x32b   : > { %v1590_v22 = vmul.f32 %v5900_v20, %v1584_v21  ;;  %v4721_v20 = vor.u32 %v5610_v10, %v4718_v13  ;;  %v4725_v21 = vor.u32 %v5613_v15, %v4724_v14  ;;  %v1596_v13 = vld [vmem:[#allocation2 + $0x30] sm:$0xff] }
 0x32c   : > { %2114 = vmatpush.bf16.msra.mxu0 %v4701_v31 }
 0x32d   : > { %v1591_v17 = vpack.c.bf16 %v1590_v22, %v1590_v22  ;;  %v5611_v22 = vld [vmem:[%s6616_s1 + $0x6c] sm:$0xf]  ;;  %2126 = vmatpush.bf16.msra.mxu1 %v4721_v20  ;;  %2139 = vmatpush.bf16.msra.mxu2 %v4725_v21 }
 0x32f   : > { %1592 = vst [vmem:[#allocation14] sm:$0xf] %v1591_v17  ;;  %1798 = vmatmul.bf16.vlgmr.msrb.gmra.mxu0 %v1591_v17  ;;  %1811 = vmatmul.bf16.vlgmr.msrb.gmra.mxu1 %v1591_v17 }
 0x330   : > { %1824 = vmatmul.bf16.vlgmr.msrb.gmra.mxu2 %v1591_v17  ;;  %1837 = vmatmul.bf16.vlgmr.msrb.gmra.mxu3 %v1591_v17  ;;  %v4726_v17 = vld [vmem:[%s6616_s1 + $0x78] sm:$0xf0] }
 0x331   : > { %v4729_v25 = vor.u32 %v5611_v22, %v4726_v17  ;;  %2127 = vmatpush.bf16.msra.mxu1 %v4705_v33  ;;  %2140 = vmatpush.bf16.msra.mxu2 %v4709_v36 }
 0x332   : > { %2115 = vmatpush.bf16.msra.mxu0 %v4685_v43 }
 0x333   : > { %2152 = vmatpush.bf16.msra.mxu3 %v4729_v25 }
 0x335   : > { %2128 = vmatpush.bf16.msra.mxu1 %v4689_v47  ;;  %2141 = vmatpush.bf16.msra.mxu2 %v4693_v54  ;;  %v5658_v54 = vld [vmem:[%s6616_s1 + $0xe4] sm:$0xf] }
 0x336   : > { %2116 = vmatpush.bf16.msra.mxu0 %v4669_v59  ;;  %v4916_v59 = vor.u32 %v5658_v54, %v4913_v56  ;;  %v5640_v56 = vld [vmem:[%s6616_s1 + $0x4c] sm:$0xf0] }
 0x337   : > { %2153 = vmatpush.bf16.msra.mxu3 %v4713_v42 }
 0x339   : > { %2129 = vmatpush.bf16.msra.mxu1 %v4673_v1  ;;  %v4895_v1 = vld [vmem:[%s6616_s1 + $0xc0] sm:$0xf] }
 0x33b   : > { %2154 = vmatpush.bf16.msra.mxu3 %v4697_v55 }
 0x33d   : > { %2441 = vmatpush.bf16.msrb.mxu1 %v4916_v59 }
 0x33f   : > { %2155 = vmatpush.bf16.msra.mxu3 %v4681_v8 }
 0x3ac   : > { %v1799_v16 = vpop.f32.mrf.mxu0  ;;  %v1812_v19 = vpop.f32.mrf.mxu1 }
 0x3ad   : > { %v1842_v18 = vadd.f32 %v1799_v16, %v1594_v5  ;;  %v1843_v23 = vadd.f32 %v1812_v19, %v1595_v6  ;;  %v4677_v5 = vor.u32 %v5601_v62, %v4676_v61  ;;  %v5659_v61 = vld [vmem:[%s6616_s1 + $0xec] sm:$0xf]  ;;  %v4921_v62 = vld [vmem:[%s6616_s1 + $0xf8] sm:$0xf0] }
 0x3af   : > { %v4663_v28 = vmul.f32 -1.442695, %v1842_v18  ;;  %v4664_v29 = vmul.f32 -1.442695, %v1843_v23  ;;  %2142 = vmatpush.bf16.msra.mxu2 %v4677_v5  ;;  %v4897_v5 = vld [vmem:[%s6616_s1 + $0xd0] sm:$0xf0] }
 0x3b0   : > { %v4900_v8 = vor.u32 %v5654_v3, %v4897_v5  ;;  %v5639_v3 = vld [vmem:[%s6616_s1 + $0x4c] sm:$0xf]  ;;  %v4841_v5 = vld [vmem:[%s6616_s1 + $0x58] sm:$0xf0] }
 0x3b1   : > { %5901 = vpow2.f32 %v4663_v28 }
 0x3b2   : > { %5903 = vpow2.f32 %v4664_v29  ;;  %2442 = vmatpush.bf16.msrb.mxu1 %v4900_v8  ;;  %v4844_v8 = vor.u32 %v5639_v3, %v4841_v5 }
 0x3b3   : > { %v1825_v44 = vpop.f32.mrf.mxu2  ;;  %v1838_v45 = vpop.f32.mrf.mxu3  ;;  %2454 = vmatpush.bf16.msrb.mxu2 %v4920_v60  ;;  %v1916_v60 = vld [vmem:[#allocation2 + $0xb8] sm:$0xff] }
 0x3b4   : > { %v1845_v51 = vadd.f32 %v1838_v45, %v1597_v30  ;;  %v1801_v52 = vpop.f32.mrf.mxu0  ;;  %v1814_v53 = vpop.f32.mrf.mxu1  ;;  %v1844_v19 = vadd.f32 %v1825_v44, %v1596_v13 }
 0x3b5   : > { %v4911_v52 = vld [vmem:[%s6616_s1 + $0xe0] sm:$0xf]  ;;  %v5660_v53 = vld [vmem:[%s6616_s1 + $0xec] sm:$0xf0] }
 0x3b6   : > { %v4665_v63 = vmul.f32 -1.442695, %v1845_v51  ;;  %v4912_v55 = vor.u32 %v5660_v53, %v4911_v52 }
 0x3b7   : > { %v5902_v4 = vpop.eup %5901 }
 0x3b8   : > { %v5904_v6 = vpop.eup %5903  ;;  %v1849_v7 = vadd.f32 1.0, %v5902_v4  ;;  %5905 = vpow2.f32 %v4665_v63  ;;  %2428 = vmatpush.bf16.msrb.mxu0 %v4912_v55  ;;  %v4924_v63 = vor.u32 %v5659_v61, %v4921_v62  ;;  %v4896_v4 = vor.u32 %v5656_v2, %v4895_v1  ;;  %v4831_v55 = vld [vmem:[%s6616_s1 + $0x40] sm:$0xf]  ;;  %v4833_v62 = vld [vmem:[%s6616_s1 + $0x50] sm:$0xf0] }
 0x3b9   : > { %v1868_v9 = vadd.f32 1.0, %v5904_v6  ;;  %v4903_v6 = vld [vmem:[%s6616_s1 + $0xc8] sm:$0xf]  ;;  %v4832_v61 = vor.u32 %v5640_v56, %v4831_v55  ;;  %v5641_v2 = vld [vmem:[%s6616_s1 + $0x54] sm:$0xf0] }
 0x3ba   : > { %5907 = vrcp.f32 %v1849_v7  ;;  %v1861_v23 = vand.u32 2147483648, %v1849_v7  ;;  %v1859_v26 = vand.u32 2147483647, %v1849_v7  ;;  %vm1855_vm14 = vweird.f32 %v1849_v7  ;;  %2467 = vmatpush.bf16.msrb.mxu3 %v4924_v63  ;;  %v4839_v1 = vld [vmem:[%s6616_s1 + $0x48] sm:$0xf] }
 0x3bb   : > { %5909 = vrcp.f32 %v1868_v9  ;;  %v1827_v10 = vpop.f32.mrf.mxu2  ;;  %v1840_v11 = vpop.f32.mrf.mxu3  ;;  %v1880_v25 = vand.u32 2147483648, %v1868_v9  ;;  %v1878_v28 = vand.u32 2147483647, %v1868_v9  ;;  %vm1874_vm15 = vweird.f32 %v1868_v9 }
 0x3bc   : > { %v1862_v31 = vor.u32 1.1754944e-38, %v1861_v23  ;;  %vm1860_vm2 = vcmp.eq.f32.partialorder %v1859_v26, 8.507059e+37  ;;  %v5655_v10 = vld [vmem:[%s6616_s1 + $0xcc] sm:$0xf]  ;;  %v4905_v11 = vld [vmem:[%s6616_s1 + $0xd8] sm:$0xf0]  ;;  %2429 = vmatpush.bf16.msrb.mxu0 %v4896_v4  ;;  %v4836_v63 = vor.u32 %v5638_v57, %v4833_v62  ;;  %v4840_v4 = vor.u32 %v5641_v2, %v4839_v1 }
 0x3bd   : > { %v1881_v0 = vor.u32 1.1754944e-38, %v1880_v25  ;;  %vm1879_vm3 = vcmp.eq.f32.partialorder %v1878_v28, 8.507059e+37  ;;  %v4908_v13 = vor.u32 %v5655_v10, %v4905_v11  ;;  %v5651_v23 = vld [vmem:[%s6616_s1 + $0xac] sm:$0xf]  ;;  %v4889_v25 = vld [vmem:[%s6616_s1 + $0xb8] sm:$0xf0] }
 0x3be   : > { %v5906_v14 = vpop.eup %5905  ;;  %v4863_v26 = vld [vmem:[%s6616_s1 + $0x80] sm:$0xf]  ;;  %v5646_v28 = vld [vmem:[%s6616_s1 + $0x84] sm:$0xf]  ;;  %v4817_v11 = vld [vmem:[%s6616_s1 + $0x30] sm:$0xf0] }
 0x3bf   : > { %v1888_v15 = vadd.f32 1.0, %v5906_v14  ;;  %v4879_v14 = vld [vmem:[%s6616_s1 + $0xa0] sm:$0xf]  ;;  %2468 = vmatpush.bf16.msrb.mxu3 %v4908_v13  ;;  %v5634_v10 = vld [vmem:[%s6616_s1 + $0x24] sm:$0xf] }
 0x3c0   : > { %v5908_v16 = vpop.eup %5907  ;;  %v4823_v13 = vld [vmem:[%s6616_s1 + $0x28] sm:$0xf] }
 0x3c1   : > { %v5910_v20 = vpop.eup %5909  ;;  %v1851_v21 = vmul.f32 %v5908_v16, %v1849_v7  ;;  %5911 = vrcp.f32 %v1888_v15  ;;  %vm1856_vm12 = vweird.f32 %v5908_v16  ;;  %v1900_v44 = vand.u32 2147483648, %v1888_v15  ;;  %v5657_v7 = vld [vmem:[%s6616_s1 + $0xd4] sm:$0xf0] }
 0x3c2   : > { %v1870_v22 = vmul.f32 %v5910_v20, %v1868_v9  ;;  %5913 = vtanh.f32 %v1844_v19  ;;  %vm1875_vm13 = vweird.f32 %v5910_v20  ;;  %vm1857_vm0 = vmor %vm1855_vm14, %vm1856_vm12  ;;  %vm1894_vm5 = vweird.f32 %v1888_v15 }
 0x3c3   : > { %v1852_v17 = vsub.f32 1.0, %v1851_v21  ;;  %vm1876_vm1 = vmor %vm1874_vm15, %vm1875_vm13  ;;  %v1898_v45 = vand.u32 2147483647, %v1888_v15  ;;  %v1901_v48 = vor.u32 1.1754944e-38, %v1900_v44  ;;  %v4904_v9 = vor.u32 %v5657_v7, %v4903_v6  ;;  %v4887_v21 = vld [vmem:[%s6616_s1 + $0xa8] sm:$0xf] }
 0x3c4   : > { %v1871_v18 = vsub.f32 1.0, %v1870_v22  ;;  %v5653_v22 = vld [vmem:[%s6616_s1 + $0xb4] sm:$0xf0]  ;;  %v4855_v44 = vld [vmem:[%s6616_s1 + $0x68] sm:$0xf] }
 0x3c5   : > { %v1853_v24 = vmul.f32 %v5908_v16, %v1852_v17  ;;  %vm1899_vm7 = vcmp.eq.f32.partialorder %v1898_v45, 8.507059e+37  ;;  %2455 = vmatpush.bf16.msrb.mxu2 %v4904_v9  ;;  %v5645_v45 = vld [vmem:[%s6616_s1 + $0x74] sm:$0xf0]  ;;  %v4815_v6 = vld [vmem:[%s6616_s1 + $0x20] sm:$0xf] }
 0x3c6   : > { %v1872_v27 = vmul.f32 %v5910_v20, %v1871_v18  ;;  %v4888_v18 = vor.u32 %v5653_v22, %v4887_v21  ;;  %v5636_v7 = vld [vmem:[%s6616_s1 + $0x2c] sm:$0xf0]  ;;  %v4825_v21 = vld [vmem:[%s6616_s1 + $0x38] sm:$0xf0] }
 0x3c7   : > { %v5912_v29 = vpop.eup %5911  ;;  %v1854_v30 = vadd.f32 %v5908_v16, %v1853_v24  ;;  %v4892_v24 = vor.u32 %v5651_v23, %v4889_v25  ;;  %v4816_v9 = vor.u32 %v5636_v7, %v4815_v6 }
 0x3c8   : > { %v1873_v32 = vadd.f32 %v5910_v20, %v1872_v27  ;;  %v1890_v33 = vmul.f32 %v5912_v29, %v1888_v15  ;;  %v5914_v35 = vpop.eup %5913  ;;  %vm1895_vm4 = vweird.f32 %v5912_v29  ;;  %v5652_v15 = vld [vmem:[%s6616_s1 + $0xac] sm:$0xf0] }
 0x3c9   : > { %v1858_v34 = vsel %vm1857_vm0, %v5908_v16, %v1854_v30  ;;  %vm1896_vm6 = vmor %vm1894_vm5, %vm1895_vm4  ;;  %v5650_v16 = vld [vmem:[%s6616_s1 + $0xa4] sm:$0xf]  ;;  %v4880_v19 = vor.u32 %v5652_v15, %v4879_v14  ;;  %2456 = vmatpush.bf16.msrb.mxu2 %v4888_v18  ;;  %v5648_v27 = vld [vmem:[%s6616_s1 + $0x8c] sm:$0xf0]  ;;  %2469 = vmatpush.bf16.msrb.mxu3 %v4892_v24 }
 0x3ca   : > { %v1863_v36 = vsel %vm1860_vm2, %v1862_v31, %v1858_v34  ;;  %v1877_v37 = vsel %vm1876_vm1, %v5910_v20, %v1873_v32  ;;  %v1891_v40 = vsub.f32 1.0, %v1890_v33  ;;  %v4881_v20 = vld [vmem:[%s6616_s1 + $0xb0] sm:$0xf0]  ;;  %v4871_v31 = vld [vmem:[%s6616_s1 + $0x88] sm:$0xf] }
 0x3cb   : > { %v1882_v41 = vsel %vm1879_vm3, %v1881_v0, %v1877_v37  ;;  %v1905_v42 = vmul.f32 %v5914_v35, %v1863_v36  ;;  %v4884_v17 = vor.u32 %v5650_v16, %v4881_v20  ;;  %2430 = vmatpush.bf16.msrb.mxu0 %v4880_v19  ;;  %v4865_v30 = vld [vmem:[%s6616_s1 + $0x90] sm:$0xf0]  ;;  %v5649_v32 = vld [vmem:[%s6616_s1 + $0x94] sm:$0xf0]  ;;  %v5647_v34 = vld [vmem:[%s6616_s1 + $0x8c] sm:$0xf]  ;;  %v4820_v16 = vor.u32 %v5634_v10, %v4817_v11 }
 0x3cc   : > { %v1904_v43 = vmul.f32 %v1882_v41, %v6977_v12  ;;  %v1892_v46 = vmul.f32 %v5912_v29, %v1891_v40  ;;  %v4868_v33 = vor.u32 %v5646_v28, %v4865_v30  ;;  %v4872_v0 = vor.u32 %v5649_v32, %v4871_v31  ;;  %v4873_v35 = vld [vmem:[%s6616_s1 + $0x98] sm:$0xf0]  ;;  %v1913_v36 = vld [vmem:[#allocation2 + $0x80] sm:$0xff]  ;;  %v1914_v37 = vld [vmem:[#allocation2 + $0x88] sm:$0xff] }
 0x3cd   : > { %2443 = vmatpush.bf16.msrb.mxu1 %v4884_v17  ;;  %v4876_v40 = vor.u32 %v5647_v34, %v4873_v35  ;;  %v4847_v41 = vld [vmem:[%s6616_s1 + $0x60] sm:$0xf]  ;;  %v5637_v19 = vld [vmem:[%s6616_s1 + $0x34] sm:$0xf0]  ;;  %v5635_v20 = vld [vmem:[%s6616_s1 + $0x2c] sm:$0xf] }
 0x3ce   : > { %v7045_v38 = vadd.f32 %v1905_v42, %v1904_v43  ;;  %v1893_v39 = vadd.f32 %v5912_v29, %v1892_v46  ;;  %2457 = vmatpush.bf16.msrb.mxu2 %v4872_v0  ;;  %v5644_v42 = vld [vmem:[%s6616_s1 + $0x6c] sm:$0xf0]  ;;  %v5642_v43 = vld [vmem:[%s6616_s1 + $0x64] sm:$0xf]  ;;  %v4824_v23 = vor.u32 %v5637_v19, %v4823_v13  ;;  %v4828_v25 = vor.u32 %v5635_v20, %v4825_v21  ;;  %v4799_v24 = vld [vmem:[%s6616_s1] sm:$0xf] }
 0x3cf   : > { %2470 = vmatpush.bf16.msrb.mxu3 %v4876_v40  ;;  %v4848_v46 = vor.u32 %v5644_v42, %v4847_v41  ;;  %v4807_v30 = vld [vmem:[%s6616_s1 + $0x8] sm:$0xf]  ;;  %v5633_v31 = vld [vmem:[%s6616_s1 + $0x14] sm:$0xf0]  ;;  %v5631_v0 = vld [vmem:[%s6616_s1 + $0xc] sm:$0xf] }
 0x3d0   : > { %5915 = vtanh.f32 %v7045_v38  ;;  %v1897_v47 = vsel %vm1896_vm6, %v5912_v29, %v1893_v39  ;;  %v4864_v29 = vor.u32 %v5648_v27, %v4863_v26  ;;  %v4849_v39 = vld [vmem:[%s6616_s1 + $0x70] sm:$0xf0]  ;;  %v5632_v26 = vld [vmem:[%s6616_s1 + $0xc] sm:$0xf0]  ;;  %v5630_v27 = vld [vmem:[%s6616_s1 + $0x4] sm:$0xf] }
 0x3d1   : > { %v1902_v49 = vsel %vm1899_vm7, %v1901_v48, %v1897_v47  ;;  %2444 = vmatpush.bf16.msrb.mxu1 %v4868_v33  ;;  %v4800_v28 = vor.u32 %v5632_v26, %v4799_v24  ;;  %v4809_v34 = vld [vmem:[%s6616_s1 + $0x18] sm:$0xf0]  ;;  %v5044_v24 = vld [vmem:[%s6616_s1 + $0xf0] sm:$0xf0]  ;;  %v5050_v26 = vld [vmem:[%s6616_s1 + $0xe8] sm:$0xf] }
 0x3d2   : > { %2431 = vmatpush.bf16.msrb.mxu0 %v4864_v29  ;;  %v4801_v29 = vld [vmem:[%s6616_s1 + $0x10] sm:$0xf0]  ;;  %v4812_v41 = vor.u32 %v5631_v0, %v4809_v34  ;;  %v5688_v0 = vld [vmem:[%s6616_s1 + $0xcc] sm:$0xf0]  ;;  %v5686_v34 = vld [vmem:[%s6616_s1 + $0xc4] sm:$0xf] }
 0x3d3   : > { %v4804_v33 = vor.u32 %v5630_v27, %v4801_v29  ;;  %v5693_v27 = vld [vmem:[%s6616_s1 + $0xf4] sm:$0xf0] }
 0x3d4   : > { %v5051_v29 = vor.u32 %v5693_v27, %v5050_v26  ;;  %v5670_v26 = vld [vmem:[%s6616_s1 + $0x44] sm:$0xf] }
 0x3d6   : > { %v5916_v12 = vpop.eup %5915  ;;  %2432 = vmatpush.bf16.msrb.mxu0 %v4848_v46 }
 0x3d7   : > { %v1908_v50 = vmul.f32 %v5916_v12, %v1902_v49  ;;  %v4852_v12 = vor.u32 %v5642_v43, %v4849_v39  ;;  %v4856_v49 = vor.u32 %v5645_v45, %v4855_v44  ;;  %v1915_v39 = vld [vmem:[#allocation2 + $0xe8] sm:$0xff] }
 0x3d9   : > { %v1909_v51 = vpack.c.bf16 %v1908_v50, %v1908_v50  ;;  %v5643_v50 = vld [vmem:[%s6616_s1 + $0x6c] sm:$0xf]  ;;  %2445 = vmatpush.bf16.msrb.mxu1 %v4852_v12  ;;  %2458 = vmatpush.bf16.msrb.mxu2 %v4856_v49 }
 0x3da   : > { %2433 = vmatpush.bf16.msrb.mxu0 %v4832_v61 }
 0x3db   : > { %1911 = vst [vmem:[#allocation14 + $0x4] sm:$0xf] %v1909_v51  ;;  %2117 = vmatmul.bf16.vlgmr.msra.gmra.mxu0 %v1909_v51  ;;  %2130 = vmatmul.bf16.vlgmr.msra.gmra.mxu1 %v1909_v51 }
 0x3dc   : > { %2143 = vmatmul.bf16.vlgmr.msra.gmra.mxu2 %v1909_v51  ;;  %2156 = vmatmul.bf16.vlgmr.msra.gmra.mxu3 %v1909_v51  ;;  %v4857_v51 = vld [vmem:[%s6616_s1 + $0x78] sm:$0xf0] }
 0x3dd   : > { %v4860_v54 = vor.u32 %v5643_v50, %v4857_v51  ;;  %2446 = vmatpush.bf16.msrb.mxu1 %v4836_v63  ;;  %2459 = vmatpush.bf16.msrb.mxu2 %v4840_v4 }
 0x3de   : > { %2434 = vmatpush.bf16.msrb.mxu0 %v4816_v9 }
 0x3df   : > { %2471 = vmatpush.bf16.msrb.mxu3 %v4860_v54 }
 0x3e1   : > { %2447 = vmatpush.bf16.msrb.mxu1 %v4820_v16  ;;  %2460 = vmatpush.bf16.msrb.mxu2 %v4824_v23  ;;  %v5690_v23 = vld [vmem:[%s6616_s1 + $0xe4] sm:$0xf] }
 0x3e2   : > { %2435 = vmatpush.bf16.msrb.mxu0 %v4800_v28  ;;  %v5047_v28 = vor.u32 %v5690_v23, %v5044_v24  ;;  %v5672_v24 = vld [vmem:[%s6616_s1 + $0x4c] sm:$0xf0] }
 0x3e3   : > { %2472 = vmatpush.bf16.msrb.mxu3 %v4844_v8 }
 0x3e5   : > { %2448 = vmatpush.bf16.msrb.mxu1 %v4804_v33  ;;  %v5026_v33 = vld [vmem:[%s6616_s1 + $0xc0] sm:$0xf] }
 0x3e7   : > { %2473 = vmatpush.bf16.msrb.mxu3 %v4828_v25 }
 0x3e9   : > { %2760 = vmatpush.bf16.msra.mxu1 %v5047_v28 }
 0x3eb   : > { %2474 = vmatpush.bf16.msrb.mxu3 %v4812_v41 }
 0x458   : > { %v2118_v47 = vpop.f32.mrf.mxu0  ;;  %v2131_v48 = vpop.f32.mrf.mxu1 }
 0x459   : > { %v2161_v52 = vadd.f32 %v2118_v47, %v1913_v36  ;;  %v2162_v53 = vadd.f32 %v2131_v48, %v1914_v37  ;;  %v4808_v36 = vor.u32 %v5633_v31, %v4807_v30  ;;  %v5691_v30 = vld [vmem:[%s6616_s1 + $0xec] sm:$0xf]  ;;  %v5052_v31 = vld [vmem:[%s6616_s1 + $0xf8] sm:$0xf0] }
 0x45b   : > { %v4794_v58 = vmul.f32 -1.442695, %v2161_v52  ;;  %v4795_v59 = vmul.f32 -1.442695, %v2162_v53  ;;  %2461 = vmatpush.bf16.msrb.mxu2 %v4808_v36  ;;  %v5028_v36 = vld [vmem:[%s6616_s1 + $0xd0] sm:$0xf0] }
 0x45c   : > { %v5031_v41 = vor.u32 %v5686_v34, %v5028_v36  ;;  %v5671_v34 = vld [vmem:[%s6616_s1 + $0x4c] sm:$0xf]  ;;  %v4972_v36 = vld [vmem:[%s6616_s1 + $0x58] sm:$0xf0] }
 0x45d   : > { %5917 = vpow2.f32 %v4794_v58 }
 0x45e   : > { %5919 = vpow2.f32 %v4795_v59  ;;  %2761 = vmatpush.bf16.msra.mxu1 %v5031_v41  ;;  %v4975_v41 = vor.u32 %v5671_v34, %v4972_v36 }
 0x45f   : > { %v2144_v14 = vpop.f32.mrf.mxu2  ;;  %v2157_v15 = vpop.f32.mrf.mxu3  ;;  %2773 = vmatpush.bf16.msra.mxu2 %v5051_v29  ;;  %v2235_v29 = vld [vmem:[#allocation2 + $0x78] sm:$0xff] }
 0x460   : > { %v2164_v22 = vadd.f32 %v2157_v15, %v1916_v60  ;;  %v2120_v17 = vpop.f32.mrf.mxu0  ;;  %v2133_v18 = vpop.f32.mrf.mxu1  ;;  %v2163_v48 = vadd.f32 %v2144_v14, %v1915_v39 }
 0x461   : > { %v5042_v17 = vld [vmem:[%s6616_s1 + $0xe0] sm:$0xf]  ;;  %v5692_v18 = vld [vmem:[%s6616_s1 + $0xec] sm:$0xf0] }
 0x462   : > { %v4796_v32 = vmul.f32 -1.442695, %v2164_v22  ;;  %v5043_v25 = vor.u32 %v5692_v18, %v5042_v17 }
 0x463   : > { %v5918_v35 = vpop.eup %5917 }
 0x464   : > { %v5920_v37 = vpop.eup %5919  ;;  %v2168_v40 = vadd.f32 1.0, %v5918_v35  ;;  %5921 = vpow2.f32 %v4796_v32  ;;  %2747 = vmatpush.bf16.msra.mxu0 %v5043_v25  ;;  %v5055_v32 = vor.u32 %v5691_v30, %v5052_v31  ;;  %v5027_v35 = vor.u32 %v5688_v0, %v5026_v33  ;;  %v4962_v25 = vld [vmem:[%s6616_s1 + $0x40] sm:$0xf]  ;;  %v4964_v31 = vld [vmem:[%s6616_s1 + $0x50] sm:$0xf0] }
 0x465   : > { %v2187_v42 = vadd.f32 1.0, %v5920_v37  ;;  %v5034_v37 = vld [vmem:[%s6616_s1 + $0xc8] sm:$0xf]  ;;  %v4963_v30 = vor.u32 %v5672_v24, %v4962_v25  ;;  %v5673_v0 = vld [vmem:[%s6616_s1 + $0x54] sm:$0xf0] }
 0x466   : > { %5923 = vrcp.f32 %v2168_v40  ;;  %v2180_v53 = vand.u32 2147483648, %v2168_v40  ;;  %v2178_v56 = vand.u32 2147483647, %v2168_v40  ;;  %vm2174_vm10 = vweird.f32 %v2168_v40  ;;  %2786 = vmatpush.bf16.msra.mxu3 %v5055_v32  ;;  %v4970_v33 = vld [vmem:[%s6616_s1 + $0x48] sm:$0xf] }
 0x467   : > { %5925 = vrcp.f32 %v2187_v42  ;;  %v2146_v43 = vpop.f32.mrf.mxu2  ;;  %v2159_v46 = vpop.f32.mrf.mxu3  ;;  %v2199_v54 = vand.u32 2147483648, %v2187_v42  ;;  %v2197_v58 = vand.u32 2147483647, %v2187_v42  ;;  %vm2193_vm11 = vweird.f32 %v2187_v42 }
 0x468   : > { %v2181_v61 = vor.u32 1.1754944e-38, %v2180_v53  ;;  %vm2179_vm14 = vcmp.eq.f32.partialorder %v2178_v56, 8.507059e+37  ;;  %v5687_v43 = vld [vmem:[%s6616_s1 + $0xcc] sm:$0xf]  ;;  %v5036_v46 = vld [vmem:[%s6616_s1 + $0xd8] sm:$0xf0]  ;;  %2748 = vmatpush.bf16.msra.mxu0 %v5027_v35  ;;  %v4967_v32 = vor.u32 %v5670_v26, %v4964_v31  ;;  %v4971_v35 = vor.u32 %v5673_v0, %v4970_v33 }
 0x469   : > { %v2200_v1 = vor.u32 1.1754944e-38, %v2199_v54  ;;  %vm2198_vm15 = vcmp.eq.f32.partialorder %v2197_v58, 8.507059e+37  ;;  %v5039_v39 = vor.u32 %v5687_v43, %v5036_v46  ;;  %v5683_v53 = vld [vmem:[%s6616_s1 + $0xac] sm:$0xf]  ;;  %v5020_v54 = vld [vmem:[%s6616_s1 + $0xb8] sm:$0xf0] }
 0x46a   : > { %v5922_v44 = vpop.eup %5921  ;;  %v4994_v56 = vld [vmem:[%s6616_s1 + $0x80] sm:$0xf]  ;;  %v5678_v58 = vld [vmem:[%s6616_s1 + $0x84] sm:$0xf]  ;;  %v4948_v46 = vld [vmem:[%s6616_s1 + $0x30] sm:$0xf0] }
 0x46b   : > { %v2207_v45 = vadd.f32 1.0, %v5922_v44  ;;  %v5010_v44 = vld [vmem:[%s6616_s1 + $0xa0] sm:$0xf]  ;;  %2787 = vmatpush.bf16.msra.mxu3 %v5039_v39  ;;  %v5666_v43 = vld [vmem:[%s6616_s1 + $0x24] sm:$0xf] }
 0x46c   : > { %v5924_v47 = vpop.eup %5923  ;;  %v4954_v39 = vld [vmem:[%s6616_s1 + $0x28] sm:$0xf] }
 0x46d   : > { %v5926_v12 = vpop.eup %5925  ;;  %v2170_v49 = vmul.f32 %v5924_v47, %v2168_v40  ;;  %5927 = vrcp.f32 %v2207_v45  ;;  %vm2175_vm8 = vweird.f32 %v5924_v47  ;;  %v2219_v14 = vand.u32 2147483648, %v2207_v45  ;;  %v5689_v40 = vld [vmem:[%s6616_s1 + $0xd4] sm:$0xf0] }
 0x46e   : > { %v2189_v50 = vmul.f32 %v5926_v12, %v2187_v42  ;;  %5929 = vtanh.f32 %v2163_v48  ;;  %vm2194_vm9 = vweird.f32 %v5926_v12  ;;  %vm2176_vm12 = vmor %vm2174_vm10, %vm2175_vm8  ;;  %vm2213_vm1 = vweird.f32 %v2207_v45 }
 0x46f   : > { %v2171_v51 = vsub.f32 1.0, %v2170_v49  ;;  %vm2195_vm13 = vmor %vm2193_vm11, %vm2194_vm9  ;;  %v2217_v15 = vand.u32 2147483647, %v2207_v45  ;;  %v2220_v19 = vor.u32 1.1754944e-38, %v2219_v14  ;;  %v5035_v42 = vor.u32 %v5689_v40, %v5034_v37  ;;  %v5018_v49 = vld [vmem:[%s6616_s1 + $0xa8] sm:$0xf] }
 0x470   : > { %v2190_v52 = vsub.f32 1.0, %v2189_v50  ;;  %v5685_v50 = vld [vmem:[%s6616_s1 + $0xb4] sm:$0xf0]  ;;  %v4986_v14 = vld [vmem:[%s6616_s1 + $0x68] sm:$0xf] }
 0x471   : > { %v2172_v55 = vmul.f32 %v5924_v47, %v2171_v51  ;;  %vm2218_vm3 = vcmp.eq.f32.partialorder %v2217_v15, 8.507059e+37  ;;  %2774 = vmatpush.bf16.msra.mxu2 %v5035_v42  ;;  %v5677_v15 = vld [vmem:[%s6616_s1 + $0x74] sm:$0xf0]  ;;  %v4946_v37 = vld [vmem:[%s6616_s1 + $0x20] sm:$0xf] }
 0x472   : > { %v2191_v57 = vmul.f32 %v5926_v12, %v2190_v52  ;;  %v5019_v52 = vor.u32 %v5685_v50, %v5018_v49  ;;  %v5668_v40 = vld [vmem:[%s6616_s1 + $0x2c] sm:$0xf0]  ;;  %v4956_v49 = vld [vmem:[%s6616_s1 + $0x38] sm:$0xf0] }
 0x473   : > { %v5928_v59 = vpop.eup %5927  ;;  %v2173_v60 = vadd.f32 %v5924_v47, %v2172_v55  ;;  %v5023_v55 = vor.u32 %v5683_v53, %v5020_v54  ;;  %v4947_v42 = vor.u32 %v5668_v40, %v4946_v37 }
 0x474   : > { %v2192_v62 = vadd.f32 %v5926_v12, %v2191_v57  ;;  %v2209_v63 = vmul.f32 %v5928_v59, %v2207_v45  ;;  %v5930_v3 = vpop.eup %5929  ;;  %vm2214_vm0 = vweird.f32 %v5928_v59  ;;  %v5684_v45 = vld [vmem:[%s6616_s1 + $0xac] sm:$0xf0] }
 0x475   : > { %v2177_v2 = vsel %vm2176_vm12, %v5924_v47, %v2173_v60  ;;  %vm2215_vm2 = vmor %vm2213_vm1, %vm2214_vm0  ;;  %v5682_v47 = vld [vmem:[%s6616_s1 + $0xa4] sm:$0xf]  ;;  %v5011_v48 = vor.u32 %v5684_v45, %v5010_v44  ;;  %2775 = vmatpush.bf16.msra.mxu2 %v5019_v52  ;;  %v5680_v57 = vld [vmem:[%s6616_s1 + $0x8c] sm:$0xf0]  ;;  %2788 = vmatpush.bf16.msra.mxu3 %v5023_v55 }
 0x476   : > { %v2182_v4 = vsel %vm2179_vm14, %v2181_v61, %v2177_v2  ;;  %v2196_v5 = vsel %vm2195_vm13, %v5926_v12, %v2192_v62  ;;  %v2210_v6 = vsub.f32 1.0, %v2209_v63  ;;  %v5012_v12 = vld [vmem:[%s6616_s1 + $0xb0] sm:$0xf0]  ;;  %v5002_v61 = vld [vmem:[%s6616_s1 + $0x88] sm:$0xf] }
 0x477   : > { %v2201_v7 = vsel %vm2198_vm15, %v2200_v1, %v2196_v5  ;;  %v2224_v8 = vmul.f32 %v5930_v3, %v2182_v4  ;;  %v5015_v51 = vor.u32 %v5682_v47, %v5012_v12  ;;  %2749 = vmatpush.bf16.msra.mxu0 %v5011_v48  ;;  %v4996_v60 = vld [vmem:[%s6616_s1 + $0x90] sm:$0xf0]  ;;  %v5681_v62 = vld [vmem:[%s6616_s1 + $0x94] sm:$0xf0]  ;;  %v5679_v2 = vld [vmem:[%s6616_s1 + $0x8c] sm:$0xf]  ;;  %v4951_v47 = vor.u32 %v5666_v43, %v4948_v46 }
 0x478   : > { %v2223_v9 = vmul.f32 %v2201_v7, %v7045_v38  ;;  %v2211_v10 = vmul.f32 %v5928_v59, %v2210_v6  ;;  %v4999_v63 = vor.u32 %v5678_v58, %v4996_v60  ;;  %v5003_v1 = vor.u32 %v5681_v62, %v5002_v61  ;;  %v5004_v3 = vld [vmem:[%s6616_s1 + $0x98] sm:$0xf0]  ;;  %v2232_v4 = vld [vmem:[#allocation2 + $0x60] sm:$0xff]  ;;  %v2233_v5 = vld [vmem:[#allocation2 + $0xf0] sm:$0xff] }
 0x479   : > { %2762 = vmatpush.bf16.msra.mxu1 %v5015_v51  ;;  %v5007_v6 = vor.u32 %v5679_v2, %v5004_v3  ;;  %v4978_v7 = vld [vmem:[%s6616_s1 + $0x60] sm:$0xf]  ;;  %v5669_v48 = vld [vmem:[%s6616_s1 + $0x34] sm:$0xf0]  ;;  %v5667_v12 = vld [vmem:[%s6616_s1 + $0x2c] sm:$0xf] }
 0x47a   : > { %v7113_v11 = vadd.f32 %v2224_v8, %v2223_v9  ;;  %v2212_v13 = vadd.f32 %v5928_v59, %v2211_v10  ;;  %2776 = vmatpush.bf16.msra.mxu2 %v5003_v1  ;;  %v5676_v8 = vld [vmem:[%s6616_s1 + $0x6c] sm:$0xf0]  ;;  %v5674_v9 = vld [vmem:[%s6616_s1 + $0x64] sm:$0xf]  ;;  %v4955_v53 = vor.u32 %v5669_v48, %v4954_v39  ;;  %v4959_v54 = vor.u32 %v5667_v12, %v4956_v49  ;;  %v4930_v55 = vld [vmem:[%s6616_s1] sm:$0xf] }
 0x47b   : > { %2789 = vmatpush.bf16.msra.mxu3 %v5007_v6  ;;  %v4979_v10 = vor.u32 %v5676_v8, %v4978_v7  ;;  %v4938_v60 = vld [vmem:[%s6616_s1 + $0x8] sm:$0xf]  ;;  %v5665_v61 = vld [vmem:[%s6616_s1 + $0x14] sm:$0xf0]  ;;  %v5663_v1 = vld [vmem:[%s6616_s1 + $0xc] sm:$0xf] }
 0x47c   : > { %5931 = vtanh.f32 %v7113_v11  ;;  %v2216_v16 = vsel %vm2215_vm2, %v5928_v59, %v2212_v13  ;;  %v4995_v59 = vor.u32 %v5680_v57, %v4994_v56  ;;  %v4980_v13 = vld [vmem:[%s6616_s1 + $0x70] sm:$0xf0]  ;;  %v5664_v56 = vld [vmem:[%s6616_s1 + $0xc] sm:$0xf0]  ;;  %v5662_v57 = vld [vmem:[%s6616_s1 + $0x4] sm:$0xf] }
 0x47d   : > { %v2221_v20 = vsel %vm2218_vm3, %v2220_v19, %v2216_v16  ;;  %2763 = vmatpush.bf16.msra.mxu1 %v4999_v63  ;;  %v4931_v58 = vor.u32 %v5664_v56, %v4930_v55  ;;  %v4940_v2 = vld [vmem:[%s6616_s1 + $0x18] sm:$0xf0]  ;;  %v5175_v55 = vld [vmem:[%s6616_s1 + $0xf0] sm:$0xf0]  ;;  %v5181_v56 = vld [vmem:[%s6616_s1 + $0xe8] sm:$0xf] }
 0x47e   : > { %2750 = vmatpush.bf16.msra.mxu0 %v4995_v59  ;;  %v4932_v59 = vld [vmem:[%s6616_s1 + $0x10] sm:$0xf0]  ;;  %v4943_v7 = vor.u32 %v5663_v1, %v4940_v2  ;;  %v5720_v1 = vld [vmem:[%s6616_s1 + $0xcc] sm:$0xf0]  ;;  %v5718_v2 = vld [vmem:[%s6616_s1 + $0xc4] sm:$0xf] }
 0x47f   : > { %v4935_v63 = vor.u32 %v5662_v57, %v4932_v59  ;;  %v5725_v57 = vld [vmem:[%s6616_s1 + $0xf4] sm:$0xf0] }
 0x480   : > { %v5182_v59 = vor.u32 %v5725_v57, %v5181_v56  ;;  %v5702_v56 = vld [vmem:[%s6616_s1 + $0x44] sm:$0xf] }
 0x482   : > { %v5932_v38 = vpop.eup %5931  ;;  %2751 = vmatpush.bf16.msra.mxu0 %v4979_v10 }
 0x483   : > { %v2227_v21 = vmul.f32 %v5932_v38, %v2221_v20  ;;  %v4983_v38 = vor.u32 %v5674_v9, %v4980_v13  ;;  %v4987_v20 = vor.u32 %v5677_v15, %v4986_v14  ;;  %v2234_v13 = vld [vmem:[#allocation2 + $0x8] sm:$0xff] }
 0x485   : > { %v2228_v22 = vpack.c.bf16 %v2227_v21, %v2227_v21  ;;  %v5675_v21 = vld [vmem:[%s6616_s1 + $0x6c] sm:$0xf]  ;;  %2764 = vmatpush.bf16.msra.mxu1 %v4983_v38  ;;  %2777 = vmatpush.bf16.msra.mxu2 %v4987_v20 }
 0x486   : > { %2752 = vmatpush.bf16.msra.mxu0 %v4963_v30 }
 0x487   : > { %2230 = vst [vmem:[#allocation14 + $0x8] sm:$0xf] %v2228_v22  ;;  %2436 = vmatmul.bf16.vlgmr.msrb.gmra.mxu0 %v2228_v22  ;;  %2449 = vmatmul.bf16.vlgmr.msrb.gmra.mxu1 %v2228_v22 }
 0x488   : > { %2462 = vmatmul.bf16.vlgmr.msrb.gmra.mxu2 %v2228_v22  ;;  %2475 = vmatmul.bf16.vlgmr.msrb.gmra.mxu3 %v2228_v22  ;;  %v4988_v22 = vld [vmem:[%s6616_s1 + $0x78] sm:$0xf0] }
 0x489   : > { %v4991_v23 = vor.u32 %v5675_v21, %v4988_v22  ;;  %2765 = vmatpush.bf16.msra.mxu1 %v4967_v32  ;;  %2778 = vmatpush.bf16.msra.mxu2 %v4971_v35 }
 0x48a   : > { %2753 = vmatpush.bf16.msra.mxu0 %v4947_v42 }
 0x48b   : > { %2790 = vmatpush.bf16.msra.mxu3 %v4991_v23 }
 0x48d   : > { %2766 = vmatpush.bf16.msra.mxu1 %v4951_v47  ;;  %2779 = vmatpush.bf16.msra.mxu2 %v4955_v53  ;;  %v5722_v53 = vld [vmem:[%s6616_s1 + $0xe4] sm:$0xf] }
 0x48e   : > { %2754 = vmatpush.bf16.msra.mxu0 %v4931_v58  ;;  %v5178_v58 = vor.u32 %v5722_v53, %v5175_v55  ;;  %v5704_v55 = vld [vmem:[%s6616_s1 + $0x4c] sm:$0xf0] }
 0x48f   : > { %2791 = vmatpush.bf16.msra.mxu3 %v4975_v41 }
 0x491   : > { %2767 = vmatpush.bf16.msra.mxu1 %v4935_v63  ;;  %v5157_v63 = vld [vmem:[%s6616_s1 + $0xc0] sm:$0xf] }
 0x493   : > { %2792 = vmatpush.bf16.msra.mxu3 %v4959_v54 }
 0x495   : > { %3079 = vmatpush.bf16.msrb.mxu1 %v5178_v58 }
 0x497   : > { %2793 = vmatpush.bf16.msra.mxu3 %v4943_v7 }
 0x504   : > { %v2437_v16 = vpop.f32.mrf.mxu0  ;;  %v2450_v19 = vpop.f32.mrf.mxu1 }
 0x505   : > { %v2480_v17 = vadd.f32 %v2437_v16, %v2232_v4  ;;  %v2481_v18 = vadd.f32 %v2450_v19, %v2233_v5  ;;  %v4939_v4 = vor.u32 %v5665_v61, %v4938_v60  ;;  %v5723_v60 = vld [vmem:[%s6616_s1 + $0xec] sm:$0xf]  ;;  %v5183_v61 = vld [vmem:[%s6616_s1 + $0xf8] sm:$0xf0] }
 0x507   : > { %v4925_v27 = vmul.f32 -1.442695, %v2480_v17  ;;  %v4926_v28 = vmul.f32 -1.442695, %v2481_v18  ;;  %2780 = vmatpush.bf16.msra.mxu2 %v4939_v4  ;;  %v5159_v4 = vld [vmem:[%s6616_s1 + $0xd0] sm:$0xf0] }
 0x508   : > { %v5162_v7 = vor.u32 %v5718_v2, %v5159_v4  ;;  %v5703_v2 = vld [vmem:[%s6616_s1 + $0x4c] sm:$0xf]  ;;  %v5103_v4 = vld [vmem:[%s6616_s1 + $0x58] sm:$0xf0] }
 0x509   : > { %5933 = vpow2.f32 %v4925_v27 }
 0x50a   : > { %5935 = vpow2.f32 %v4926_v28  ;;  %3080 = vmatpush.bf16.msrb.mxu1 %v5162_v7  ;;  %v5106_v7 = vor.u32 %v5703_v2, %v5103_v4 }
 0x50b   : > { %v2463_v44 = vpop.f32.mrf.mxu2  ;;  %v2476_v45 = vpop.f32.mrf.mxu3  ;;  %3092 = vmatpush.bf16.msrb.mxu2 %v5182_v59  ;;  %v2554_v59 = vld [vmem:[#allocation2 + $0xc8] sm:$0xff] }
 0x50c   : > { %v2483_v50 = vadd.f32 %v2476_v45, %v2235_v29  ;;  %v2439_v51 = vpop.f32.mrf.mxu0  ;;  %v2452_v52 = vpop.f32.mrf.mxu1  ;;  %v2482_v19 = vadd.f32 %v2463_v44, %v2234_v13 }
 0x50d   : > { %v5173_v51 = vld [vmem:[%s6616_s1 + $0xe0] sm:$0xf]  ;;  %v5724_v52 = vld [vmem:[%s6616_s1 + $0xec] sm:$0xf0] }
 0x50e   : > { %v4927_v62 = vmul.f32 -1.442695, %v2483_v50  ;;  %v5174_v54 = vor.u32 %v5724_v52, %v5173_v51 }
 0x50f   : > { %v5934_v3 = vpop.eup %5933 }
 0x510   : > { %v5936_v5 = vpop.eup %5935  ;;  %v2487_v6 = vadd.f32 1.0, %v5934_v3  ;;  %5937 = vpow2.f32 %v4927_v62  ;;  %3066 = vmatpush.bf16.msrb.mxu0 %v5174_v54  ;;  %v5186_v62 = vor.u32 %v5723_v60, %v5183_v61  ;;  %v5158_v3 = vor.u32 %v5720_v1, %v5157_v63  ;;  %v5093_v54 = vld [vmem:[%s6616_s1 + $0x40] sm:$0xf]  ;;  %v5095_v61 = vld [vmem:[%s6616_s1 + $0x50] sm:$0xf0] }
 0x511   : > { %v2506_v8 = vadd.f32 1.0, %v5936_v5  ;;  %v5165_v5 = vld [vmem:[%s6616_s1 + $0xc8] sm:$0xf]  ;;  %v5094_v60 = vor.u32 %v5704_v55, %v5093_v54  ;;  %v5705_v1 = vld [vmem:[%s6616_s1 + $0x54] sm:$0xf0] }
 0x512   : > { %5939 = vrcp.f32 %v2487_v6  ;;  %v2499_v18 = vand.u32 2147483648, %v2487_v6  ;;  %v2497_v24 = vand.u32 2147483647, %v2487_v6  ;;  %vm2493_vm6 = vweird.f32 %v2487_v6  ;;  %3105 = vmatpush.bf16.msrb.mxu3 %v5186_v62  ;;  %v5101_v63 = vld [vmem:[%s6616_s1 + $0x48] sm:$0xf] }
 0x513   : > { %5941 = vrcp.f32 %v2506_v8  ;;  %v2465_v9 = vpop.f32.mrf.mxu2  ;;  %v2478_v10 = vpop.f32.mrf.mxu3  ;;  %v2518_v23 = vand.u32 2147483648, %v2506_v8  ;;  %v2516_v27 = vand.u32 2147483647, %v2506_v8  ;;  %vm2512_vm7 = vweird.f32 %v2506_v8 }
 0x514   : > { %v2500_v30 = vor.u32 1.1754944e-38, %v2499_v18  ;;  %vm2498_vm10 = vcmp.eq.f32.partialorder %v2497_v24, 8.507059e+37  ;;  %v5719_v9 = vld [vmem:[%s6616_s1 + $0xcc] sm:$0xf]  ;;  %v5167_v10 = vld [vmem:[%s6616_s1 + $0xd8] sm:$0xf0]  ;;  %3067 = vmatpush.bf16.msrb.mxu0 %v5158_v3  ;;  %v5098_v62 = vor.u32 %v5702_v56, %v5095_v61  ;;  %v5102_v3 = vor.u32 %v5705_v1, %v5101_v63 }
 0x515   : > { %v2519_v33 = vor.u32 1.1754944e-38, %v2518_v23  ;;  %vm2517_vm11 = vcmp.eq.f32.partialorder %v2516_v27, 8.507059e+37  ;;  %v5170_v13 = vor.u32 %v5719_v9, %v5167_v10  ;;  %v5715_v18 = vld [vmem:[%s6616_s1 + $0xac] sm:$0xf]  ;;  %v5151_v23 = vld [vmem:[%s6616_s1 + $0xb8] sm:$0xf0] }
 0x516   : > { %v5938_v14 = vpop.eup %5937  ;;  %v5125_v24 = vld [vmem:[%s6616_s1 + $0x80] sm:$0xf]  ;;  %v5710_v27 = vld [vmem:[%s6616_s1 + $0x84] sm:$0xf]  ;;  %v5079_v10 = vld [vmem:[%s6616_s1 + $0x30] sm:$0xf0] }
 0x517   : > { %v2526_v15 = vadd.f32 1.0, %v5938_v14  ;;  %v5141_v14 = vld [vmem:[%s6616_s1 + $0xa0] sm:$0xf]  ;;  %3106 = vmatpush.bf16.msrb.mxu3 %v5170_v13  ;;  %v5698_v9 = vld [vmem:[%s6616_s1 + $0x24] sm:$0xf] }
 0x518   : > { %v5940_v16 = vpop.eup %5939  ;;  %v5085_v13 = vld [vmem:[%s6616_s1 + $0x28] sm:$0xf] }
 0x519   : > { %v5942_v38 = vpop.eup %5941  ;;  %v2489_v20 = vmul.f32 %v5940_v16, %v2487_v6  ;;  %5943 = vrcp.f32 %v2526_v15  ;;  %vm2494_vm4 = vweird.f32 %v5940_v16  ;;  %v2538_v44 = vand.u32 2147483648, %v2526_v15  ;;  %v5721_v6 = vld [vmem:[%s6616_s1 + $0xd4] sm:$0xf0] }
 0x51a   : > { %v2508_v21 = vmul.f32 %v5942_v38, %v2506_v8  ;;  %5945 = vtanh.f32 %v2482_v19  ;;  %vm2513_vm5 = vweird.f32 %v5942_v38  ;;  %vm2495_vm8 = vmor %vm2493_vm6, %vm2494_vm4  ;;  %vm2532_vm13 = vweird.f32 %v2526_v15 }
 0x51b   : > { %v2490_v22 = vsub.f32 1.0, %v2489_v20  ;;  %vm2514_vm9 = vmor %vm2512_vm7, %vm2513_vm5  ;;  %v2536_v45 = vand.u32 2147483647, %v2526_v15  ;;  %v2539_v48 = vor.u32 1.1754944e-38, %v2538_v44  ;;  %v5166_v8 = vor.u32 %v5721_v6, %v5165_v5  ;;  %v5149_v20 = vld [vmem:[%s6616_s1 + $0xa8] sm:$0xf] }
 0x51c   : > { %v2509_v17 = vsub.f32 1.0, %v2508_v21  ;;  %v5717_v21 = vld [vmem:[%s6616_s1 + $0xb4] sm:$0xf0]  ;;  %v5117_v44 = vld [vmem:[%s6616_s1 + $0x68] sm:$0xf] }
 0x51d   : > { %v2491_v25 = vmul.f32 %v5940_v16, %v2490_v22  ;;  %vm2537_vm15 = vcmp.eq.f32.partialorder %v2536_v45, 8.507059e+37  ;;  %3093 = vmatpush.bf16.msrb.mxu2 %v5166_v8  ;;  %v5709_v45 = vld [vmem:[%s6616_s1 + $0x74] sm:$0xf0]  ;;  %v5077_v5 = vld [vmem:[%s6616_s1 + $0x20] sm:$0xf] }
 0x51e   : > { %v2510_v26 = vmul.f32 %v5942_v38, %v2509_v17  ;;  %v5150_v17 = vor.u32 %v5717_v21, %v5149_v20  ;;  %v5700_v6 = vld [vmem:[%s6616_s1 + $0x2c] sm:$0xf0]  ;;  %v5087_v20 = vld [vmem:[%s6616_s1 + $0x38] sm:$0xf0] }
 0x51f   : > { %v5944_v28 = vpop.eup %5943  ;;  %v2492_v29 = vadd.f32 %v5940_v16, %v2491_v25  ;;  %v5154_v25 = vor.u32 %v5715_v18, %v5151_v23  ;;  %v5078_v8 = vor.u32 %v5700_v6, %v5077_v5 }
 0x520   : > { %v2511_v31 = vadd.f32 %v5942_v38, %v2510_v26  ;;  %v2528_v32 = vmul.f32 %v5944_v28, %v2526_v15  ;;  %v5946_v34 = vpop.eup %5945  ;;  %vm2533_vm12 = vweird.f32 %v5944_v28  ;;  %v5716_v15 = vld [vmem:[%s6616_s1 + $0xac] sm:$0xf0] }
 0x521   : > { %v2496_v0 = vsel %vm2495_vm8, %v5940_v16, %v2492_v29  ;;  %vm2534_vm14 = vmor %vm2532_vm13, %vm2533_vm12  ;;  %v5714_v16 = vld [vmem:[%s6616_s1 + $0xa4] sm:$0xf]  ;;  %v5142_v19 = vor.u32 %v5716_v15, %v5141_v14  ;;  %3094 = vmatpush.bf16.msrb.mxu2 %v5150_v17  ;;  %v5712_v26 = vld [vmem:[%s6616_s1 + $0x8c] sm:$0xf0]  ;;  %3107 = vmatpush.bf16.msrb.mxu3 %v5154_v25 }
 0x522   : > { %v2501_v35 = vsel %vm2498_vm10, %v2500_v30, %v2496_v0  ;;  %v2515_v36 = vsel %vm2514_vm9, %v5942_v38, %v2511_v31  ;;  %v2529_v37 = vsub.f32 1.0, %v2528_v32  ;;  %v5143_v38 = vld [vmem:[%s6616_s1 + $0xb0] sm:$0xf0]  ;;  %v5133_v30 = vld [vmem:[%s6616_s1 + $0x88] sm:$0xf] }
 0x523   : > { %v2520_v40 = vsel %vm2517_vm11, %v2519_v33, %v2515_v36  ;;  %v2543_v41 = vmul.f32 %v5946_v34, %v2501_v35  ;;  %v5146_v22 = vor.u32 %v5714_v16, %v5143_v38  ;;  %3068 = vmatpush.bf16.msrb.mxu0 %v5142_v19  ;;  %v5127_v29 = vld [vmem:[%s6616_s1 + $0x90] sm:$0xf0]  ;;  %v5713_v31 = vld [vmem:[%s6616_s1 + $0x94] sm:$0xf0]  ;;  %v5711_v0 = vld [vmem:[%s6616_s1 + $0x8c] sm:$0xf]  ;;  %v5082_v16 = vor.u32 %v5698_v9, %v5079_v10 }
 0x524   : > { %v2542_v42 = vmul.f32 %v2520_v40, %v7113_v11  ;;  %v2530_v43 = vmul.f32 %v5944_v28, %v2529_v37  ;;  %v5130_v32 = vor.u32 %v5710_v27, %v5127_v29  ;;  %v5134_v33 = vor.u32 %v5713_v31, %v5133_v30  ;;  %v5135_v34 = vld [vmem:[%s6616_s1 + $0x98] sm:$0xf0]  ;;  %v5109_v40 = vld [vmem:[%s6616_s1 + $0x60] sm:$0xf]  ;;  %v5701_v19 = vld [vmem:[%s6616_s1 + $0x34] sm:$0xf0] }
 0x525   : > { %3081 = vmatpush.bf16.msrb.mxu1 %v5146_v22  ;;  %v2551_v35 = vld [vmem:[#allocation2 + $0x38] sm:$0xff]  ;;  %v5138_v37 = vor.u32 %v5711_v0, %v5135_v34  ;;  %v5699_v38 = vld [vmem:[%s6616_s1 + $0x2c] sm:$0xf]  ;;  %v5086_v18 = vor.u32 %v5701_v19, %v5085_v13  ;;  %v5061_v25 = vld [vmem:[%s6616_s1] sm:$0xf] }
 0x526   : > { %v7181_v46 = vadd.f32 %v2543_v41, %v2542_v42  ;;  %v2531_v39 = vadd.f32 %v5944_v28, %v2530_v43  ;;  %v2552_v36 = vld [vmem:[#allocation2 + $0x58] sm:$0xff]  ;;  %3095 = vmatpush.bf16.msrb.mxu2 %v5134_v33  ;;  %v5708_v41 = vld [vmem:[%s6616_s1 + $0x6c] sm:$0xf0]  ;;  %v5706_v42 = vld [vmem:[%s6616_s1 + $0x64] sm:$0xf]  ;;  %v5090_v23 = vor.u32 %v5699_v38, %v5087_v20 }
 0x527   : > { %3108 = vmatpush.bf16.msrb.mxu3 %v5138_v37  ;;  %v5110_v43 = vor.u32 %v5708_v41, %v5109_v40  ;;  %v5069_v29 = vld [vmem:[%s6616_s1 + $0x8] sm:$0xf]  ;;  %v5697_v30 = vld [vmem:[%s6616_s1 + $0x14] sm:$0xf0]  ;;  %v5695_v33 = vld [vmem:[%s6616_s1 + $0xc] sm:$0xf] }
 0x528   : > { %5947 = vtanh.f32 %v7181_v46  ;;  %v2535_v47 = vsel %vm2534_vm14, %v5944_v28, %v2531_v39  ;;  %v5126_v28 = vor.u32 %v5712_v26, %v5125_v24  ;;  %v5111_v39 = vld [vmem:[%s6616_s1 + $0x70] sm:$0xf0]  ;;  %v5696_v24 = vld [vmem:[%s6616_s1 + $0xc] sm:$0xf0]  ;;  %v5694_v26 = vld [vmem:[%s6616_s1 + $0x4] sm:$0xf] }
 0x529   : > { %v2540_v12 = vsel %vm2537_vm15, %v2539_v48, %v2535_v47  ;;  %3082 = vmatpush.bf16.msrb.mxu1 %v5130_v32  ;;  %v5062_v27 = vor.u32 %v5696_v24, %v5061_v25  ;;  %v5071_v0 = vld [vmem:[%s6616_s1 + $0x18] sm:$0xf0]  ;;  %v5306_v25 = vld [vmem:[%s6616_s1 + $0xf0] sm:$0xf0]  ;;  %v5312_v24 = vld [vmem:[%s6616_s1 + $0xe8] sm:$0xf] }
 0x52a   : > { %3069 = vmatpush.bf16.msrb.mxu0 %v5126_v28  ;;  %v5063_v28 = vld [vmem:[%s6616_s1 + $0x10] sm:$0xf0]  ;;  %v5074_v40 = vor.u32 %v5695_v33, %v5071_v0  ;;  %v5752_v33 = vld [vmem:[%s6616_s1 + $0xcc] sm:$0xf0]  ;;  %v5750_v0 = vld [vmem:[%s6616_s1 + $0xc4] sm:$0xf] }
 0x52b   : > { %v5066_v32 = vor.u32 %v5694_v26, %v5063_v28  ;;  %v5757_v26 = vld [vmem:[%s6616_s1 + $0xf4] sm:$0xf0] }
 0x52c   : > { %v5313_v28 = vor.u32 %v5757_v26, %v5312_v24  ;;  %v5734_v24 = vld [vmem:[%s6616_s1 + $0x44] sm:$0xf] }
 0x52e   : > { %v5948_v11 = vpop.eup %5947  ;;  %3070 = vmatpush.bf16.msrb.mxu0 %v5110_v43 }
 0x52f   : > { %v2546_v49 = vmul.f32 %v5948_v11, %v2540_v12  ;;  %v5114_v11 = vor.u32 %v5706_v42, %v5111_v39  ;;  %v5118_v12 = vor.u32 %v5709_v45, %v5117_v44  ;;  %v2553_v39 = vld [vmem:[#allocation2 + $0x40] sm:$0xff] }
 0x531   : > { %v2547_v50 = vpack.c.bf16 %v2546_v49, %v2546_v49  ;;  %v5707_v49 = vld [vmem:[%s6616_s1 + $0x6c] sm:$0xf]  ;;  %3083 = vmatpush.bf16.msrb.mxu1 %v5114_v11  ;;  %3096 = vmatpush.bf16.msrb.mxu2 %v5118_v12 }
 0x532   : > { %3071 = vmatpush.bf16.msrb.mxu0 %v5094_v60 }
 0x533   : > { %2549 = vst [vmem:[#allocation14 + $0xc] sm:$0xf] %v2547_v50  ;;  %2755 = vmatmul.bf16.vlgmr.msra.gmra.mxu0 %v2547_v50  ;;  %2768 = vmatmul.bf16.vlgmr.msra.gmra.mxu1 %v2547_v50 }
 0x534   : > { %2781 = vmatmul.bf16.vlgmr.msra.gmra.mxu2 %v2547_v50  ;;  %2794 = vmatmul.bf16.vlgmr.msra.gmra.mxu3 %v2547_v50  ;;  %v5119_v50 = vld [vmem:[%s6616_s1 + $0x78] sm:$0xf0] }
 0x535   : > { %v5122_v53 = vor.u32 %v5707_v49, %v5119_v50  ;;  %3084 = vmatpush.bf16.msrb.mxu1 %v5098_v62  ;;  %3097 = vmatpush.bf16.msrb.mxu2 %v5102_v3 }
 0x536   : > { %3072 = vmatpush.bf16.msrb.mxu0 %v5078_v8 }
 0x537   : > { %3109 = vmatpush.bf16.msrb.mxu3 %v5122_v53 }
 0x539   : > { %3085 = vmatpush.bf16.msrb.mxu1 %v5082_v16  ;;  %3098 = vmatpush.bf16.msrb.mxu2 %v5086_v18  ;;  %v5754_v18 = vld [vmem:[%s6616_s1 + $0xe4] sm:$0xf] }
 0x53a   : > { %3073 = vmatpush.bf16.msrb.mxu0 %v5062_v27  ;;  %v5309_v27 = vor.u32 %v5754_v18, %v5306_v25  ;;  %v5736_v25 = vld [vmem:[%s6616_s1 + $0x4c] sm:$0xf0] }
 0x53b   : > { %3110 = vmatpush.bf16.msrb.mxu3 %v5106_v7 }
 0x53d   : > { %3086 = vmatpush.bf16.msrb.mxu1 %v5066_v32  ;;  %v5288_v32 = vld [vmem:[%s6616_s1 + $0xc0] sm:$0xf] }
 0x53f   : > { %3111 = vmatpush.bf16.msrb.mxu3 %v5090_v23 }
 0x541   : > { %3398 = vmatpush.bf16.msra.mxu1 %v5309_v27 }
 0x543   : > { %3112 = vmatpush.bf16.msrb.mxu3 %v5074_v40 }
 0x5b0   : > { %v2756_v47 = vpop.f32.mrf.mxu0  ;;  %v2769_v48 = vpop.f32.mrf.mxu1 }
 0x5b1   : > { %v2799_v51 = vadd.f32 %v2756_v47, %v2551_v35  ;;  %v2800_v52 = vadd.f32 %v2769_v48, %v2552_v36  ;;  %v5070_v35 = vor.u32 %v5697_v30, %v5069_v29  ;;  %v5755_v29 = vld [vmem:[%s6616_s1 + $0xec] sm:$0xf]  ;;  %v5314_v30 = vld [vmem:[%s6616_s1 + $0xf8] sm:$0xf0] }
 0x5b3   : > { %v5056_v57 = vmul.f32 -1.442695, %v2799_v51  ;;  %v5057_v58 = vmul.f32 -1.442695, %v2800_v52  ;;  %3099 = vmatpush.bf16.msrb.mxu2 %v5070_v35  ;;  %v5290_v35 = vld [vmem:[%s6616_s1 + $0xd0] sm:$0xf0] }
 0x5b4   : > { %v5293_v40 = vor.u32 %v5750_v0, %v5290_v35  ;;  %v5735_v0 = vld [vmem:[%s6616_s1 + $0x4c] sm:$0xf]  ;;  %v5234_v35 = vld [vmem:[%s6616_s1 + $0x58] sm:$0xf0] }
 0x5b5   : > { %5949 = vpow2.f32 %v5056_v57 }
 0x5b6   : > { %5951 = vpow2.f32 %v5057_v58  ;;  %3399 = vmatpush.bf16.msra.mxu1 %v5293_v40  ;;  %v5237_v40 = vor.u32 %v5735_v0, %v5234_v35 }
 0x5b7   : > { %v2782_v14 = vpop.f32.mrf.mxu2  ;;  %v2795_v15 = vpop.f32.mrf.mxu3  ;;  %3411 = vmatpush.bf16.msra.mxu2 %v5313_v28  ;;  %v2873_v28 = vld [vmem:[#allocation2 + $0xc0] sm:$0xff] }
 0x5b8   : > { %v2802_v21 = vadd.f32 %v2795_v15, %v2554_v59  ;;  %v2758_v22 = vpop.f32.mrf.mxu0  ;;  %v2771_v17 = vpop.f32.mrf.mxu1  ;;  %v2801_v48 = vadd.f32 %v2782_v14, %v2553_v39 }
 0x5b9   : > { %v5304_v22 = vld [vmem:[%s6616_s1 + $0xe0] sm:$0xf]  ;;  %v5756_v17 = vld [vmem:[%s6616_s1 + $0xec] sm:$0xf0] }
 0x5ba   : > { %v5058_v31 = vmul.f32 -1.442695, %v2802_v21  ;;  %v5305_v23 = vor.u32 %v5756_v17, %v5304_v22 }
 0x5bb   : > { %v5950_v34 = vpop.eup %5949 }
 0x5bc   : > { %v5952_v36 = vpop.eup %5951  ;;  %v2806_v37 = vadd.f32 1.0, %v5950_v34  ;;  %5953 = vpow2.f32 %v5058_v31  ;;  %3385 = vmatpush.bf16.msra.mxu0 %v5305_v23  ;;  %v5317_v31 = vor.u32 %v5755_v29, %v5314_v30  ;;  %v5289_v34 = vor.u32 %v5752_v33, %v5288_v32  ;;  %v5224_v23 = vld [vmem:[%s6616_s1 + $0x40] sm:$0xf]  ;;  %v5226_v30 = vld [vmem:[%s6616_s1 + $0x50] sm:$0xf0] }
 0x5bd   : > { %v2825_v41 = vadd.f32 1.0, %v5952_v36  ;;  %v5296_v36 = vld [vmem:[%s6616_s1 + $0xc8] sm:$0xf]  ;;  %v5225_v29 = vor.u32 %v5736_v25, %v5224_v23  ;;  %v5737_v33 = vld [vmem:[%s6616_s1 + $0x54] sm:$0xf0] }
 0x5be   : > { %5955 = vrcp.f32 %v2806_v37  ;;  %v2818_v52 = vand.u32 2147483648, %v2806_v37  ;;  %v2816_v55 = vand.u32 2147483647, %v2806_v37  ;;  %vm2812_vm2 = vweird.f32 %v2806_v37  ;;  %3424 = vmatpush.bf16.msra.mxu3 %v5317_v31  ;;  %v5232_v32 = vld [vmem:[%s6616_s1 + $0x48] sm:$0xf] }
 0x5bf   : > { %5957 = vrcp.f32 %v2825_v41  ;;  %v2784_v42 = vpop.f32.mrf.mxu2  ;;  %v2797_v43 = vpop.f32.mrf.mxu3  ;;  %v2837_v53 = vand.u32 2147483648, %v2825_v41  ;;  %v2835_v57 = vand.u32 2147483647, %v2825_v41  ;;  %vm2831_vm3 = vweird.f32 %v2825_v41 }
 0x5c0   : > { %v2819_v60 = vor.u32 1.1754944e-38, %v2818_v52  ;;  %vm2817_vm6 = vcmp.eq.f32.partialorder %v2816_v55, 8.507059e+37  ;;  %v5751_v42 = vld [vmem:[%s6616_s1 + $0xcc] sm:$0xf]  ;;  %v5298_v43 = vld [vmem:[%s6616_s1 + $0xd8] sm:$0xf0]  ;;  %3386 = vmatpush.bf16.msra.mxu0 %v5289_v34  ;;  %v5229_v31 = vor.u32 %v5734_v24, %v5226_v30  ;;  %v5233_v34 = vor.u32 %v5737_v33, %v5232_v32 }
 0x5c1   : > { %v2838_v63 = vor.u32 1.1754944e-38, %v2837_v53  ;;  %vm2836_vm7 = vcmp.eq.f32.partialorder %v2835_v57, 8.507059e+37  ;;  %v5301_v39 = vor.u32 %v5751_v42, %v5298_v43  ;;  %v5747_v52 = vld [vmem:[%s6616_s1 + $0xac] sm:$0xf]  ;;  %v5282_v53 = vld [vmem:[%s6616_s1 + $0xb8] sm:$0xf0] }
 0x5c2   : > { %v5954_v44 = vpop.eup %5953  ;;  %v5256_v55 = vld [vmem:[%s6616_s1 + $0x80] sm:$0xf]  ;;  %v5742_v57 = vld [vmem:[%s6616_s1 + $0x84] sm:$0xf]  ;;  %v5210_v43 = vld [vmem:[%s6616_s1 + $0x30] sm:$0xf0] }
 0x5c3   : > { %v2845_v45 = vadd.f32 1.0, %v5954_v44  ;;  %v5272_v44 = vld [vmem:[%s6616_s1 + $0xa0] sm:$0xf]  ;;  %3425 = vmatpush.bf16.msra.mxu3 %v5301_v39  ;;  %v5730_v42 = vld [vmem:[%s6616_s1 + $0x24] sm:$0xf] }
 0x5c4   : > { %v5956_v47 = vpop.eup %5955  ;;  %v5216_v39 = vld [vmem:[%s6616_s1 + $0x28] sm:$0xf] }
 0x5c5   : > { %v5958_v11 = vpop.eup %5957  ;;  %v2808_v12 = vmul.f32 %v5956_v47, %v2806_v37  ;;  %5959 = vrcp.f32 %v2845_v45  ;;  %vm2813_vm0 = vweird.f32 %v5956_v47  ;;  %v2857_v14 = vand.u32 2147483648, %v2845_v45  ;;  %v5753_v37 = vld [vmem:[%s6616_s1 + $0xd4] sm:$0xf0] }
 0x5c6   : > { %v2827_v49 = vmul.f32 %v5958_v11, %v2825_v41  ;;  %5961 = vtanh.f32 %v2801_v48  ;;  %vm2832_vm1 = vweird.f32 %v5958_v11  ;;  %vm2814_vm4 = vmor %vm2812_vm2, %vm2813_vm0  ;;  %vm2851_vm9 = vweird.f32 %v2845_v45 }
 0x5c7   : > { %v2809_v50 = vsub.f32 1.0, %v2808_v12  ;;  %vm2833_vm5 = vmor %vm2831_vm3, %vm2832_vm1  ;;  %v2855_v15 = vand.u32 2147483647, %v2845_v45  ;;  %v2858_v19 = vor.u32 1.1754944e-38, %v2857_v14  ;;  %v5297_v41 = vor.u32 %v5753_v37, %v5296_v36  ;;  %v5280_v12 = vld [vmem:[%s6616_s1 + $0xa8] sm:$0xf] }
 0x5c8   : > { %v2828_v51 = vsub.f32 1.0, %v2827_v49  ;;  %v5749_v49 = vld [vmem:[%s6616_s1 + $0xb4] sm:$0xf0]  ;;  %v5248_v14 = vld [vmem:[%s6616_s1 + $0x68] sm:$0xf] }
 0x5c9   : > { %v2810_v54 = vmul.f32 %v5956_v47, %v2809_v50  ;;  %vm2856_vm11 = vcmp.eq.f32.partialorder %v2855_v15, 8.507059e+37  ;;  %3412 = vmatpush.bf16.msra.mxu2 %v5297_v41  ;;  %v5741_v15 = vld [vmem:[%s6616_s1 + $0x74] sm:$0xf0]  ;;  %v5208_v36 = vld [vmem:[%s6616_s1 + $0x20] sm:$0xf] }
 0x5ca   : > { %v2829_v56 = vmul.f32 %v5958_v11, %v2828_v51  ;;  %v5281_v51 = vor.u32 %v5749_v49, %v5280_v12  ;;  %v5732_v37 = vld [vmem:[%s6616_s1 + $0x2c] sm:$0xf0]  ;;  %v5218_v12 = vld [vmem:[%s6616_s1 + $0x38] sm:$0xf0] }
 0x5cb   : > { %v5960_v58 = vpop.eup %5959  ;;  %v2811_v59 = vadd.f32 %v5956_v47, %v2810_v54  ;;  %v5285_v54 = vor.u32 %v5747_v52, %v5282_v53  ;;  %v5209_v41 = vor.u32 %v5732_v37, %v5208_v36 }
 0x5cc   : > { %v2830_v61 = vadd.f32 %v5958_v11, %v2829_v56  ;;  %v2847_v62 = vmul.f32 %v5960_v58, %v2845_v45  ;;  %v5962_v2 = vpop.eup %5961  ;;  %vm2852_vm8 = vweird.f32 %v5960_v58  ;;  %v5748_v45 = vld [vmem:[%s6616_s1 + $0xac] sm:$0xf0] }
 0x5cd   : > { %v2815_v1 = vsel %vm2814_vm4, %v5956_v47, %v2811_v59  ;;  %vm2853_vm10 = vmor %vm2851_vm9, %vm2852_vm8  ;;  %v5746_v47 = vld [vmem:[%s6616_s1 + $0xa4] sm:$0xf]  ;;  %v5273_v48 = vor.u32 %v5748_v45, %v5272_v44  ;;  %3413 = vmatpush.bf16.msra.mxu2 %v5281_v51  ;;  %v5744_v56 = vld [vmem:[%s6616_s1 + $0x8c] sm:$0xf0]  ;;  %3426 = vmatpush.bf16.msra.mxu3 %v5285_v54 }
 0x5ce   : > { %v2820_v3 = vsel %vm2817_vm6, %v2819_v60, %v2815_v1  ;;  %v2834_v4 = vsel %vm2833_vm5, %v5958_v11, %v2830_v61  ;;  %v2848_v5 = vsub.f32 1.0, %v2847_v62  ;;  %v5274_v11 = vld [vmem:[%s6616_s1 + $0xb0] sm:$0xf0]  ;;  %v5264_v60 = vld [vmem:[%s6616_s1 + $0x88] sm:$0xf] }
 0x5cf   : > { %v2839_v6 = vsel %vm2836_vm7, %v2838_v63, %v2834_v4  ;;  %v2862_v7 = vmul.f32 %v5962_v2, %v2820_v3  ;;  %v5277_v50 = vor.u32 %v5746_v47, %v5274_v11  ;;  %3387 = vmatpush.bf16.msra.mxu0 %v5273_v48  ;;  %v5258_v59 = vld [vmem:[%s6616_s1 + $0x90] sm:$0xf0]  ;;  %v5745_v61 = vld [vmem:[%s6616_s1 + $0x94] sm:$0xf0]  ;;  %v5743_v1 = vld [vmem:[%s6616_s1 + $0x8c] sm:$0xf]  ;;  %v5213_v47 = vor.u32 %v5730_v42, %v5210_v43 }
 0x5d0   : > { %v2861_v8 = vmul.f32 %v2839_v6, %v7181_v46  ;;  %v2849_v9 = vmul.f32 %v5960_v58, %v2848_v5  ;;  %v5261_v62 = vor.u32 %v5742_v57, %v5258_v59  ;;  %v5265_v63 = vor.u32 %v5745_v61, %v5264_v60  ;;  %v5266_v2 = vld [vmem:[%s6616_s1 + $0x98] sm:$0xf0]  ;;  %v2870_v3 = vld [vmem:[#allocation2 + $0xe0] sm:$0xff]  ;;  %v2871_v4 = vld [vmem:[#allocation2 + $0x90] sm:$0xff] }
 0x5d1   : > { %3400 = vmatpush.bf16.msra.mxu1 %v5277_v50  ;;  %v5269_v5 = vor.u32 %v5743_v1, %v5266_v2  ;;  %v5240_v6 = vld [vmem:[%s6616_s1 + $0x60] sm:$0xf]  ;;  %v5733_v48 = vld [vmem:[%s6616_s1 + $0x34] sm:$0xf0]  ;;  %v5731_v11 = vld [vmem:[%s6616_s1 + $0x2c] sm:$0xf] }
 0x5d2   : > { %v7249_v10 = vadd.f32 %v2862_v7, %v2861_v8  ;;  %v2850_v13 = vadd.f32 %v5960_v58, %v2849_v9  ;;  %3414 = vmatpush.bf16.msra.mxu2 %v5265_v63  ;;  %v5740_v7 = vld [vmem:[%s6616_s1 + $0x6c] sm:$0xf0]  ;;  %v5738_v8 = vld [vmem:[%s6616_s1 + $0x64] sm:$0xf]  ;;  %v5217_v52 = vor.u32 %v5733_v48, %v5216_v39  ;;  %v5221_v53 = vor.u32 %v5731_v11, %v5218_v12  ;;  %v5192_v54 = vld [vmem:[%s6616_s1] sm:$0xf] }
 0x5d3   : > { %3427 = vmatpush.bf16.msra.mxu3 %v5269_v5  ;;  %v5241_v9 = vor.u32 %v5740_v7, %v5240_v6  ;;  %v5200_v59 = vld [vmem:[%s6616_s1 + $0x8] sm:$0xf]  ;;  %v5729_v60 = vld [vmem:[%s6616_s1 + $0x14] sm:$0xf0]  ;;  %v5727_v63 = vld [vmem:[%s6616_s1 + $0xc] sm:$0xf] }
 0x5d4   : > { %5963 = vtanh.f32 %v7249_v10  ;;  %v2854_v16 = vsel %vm2853_vm10, %v5960_v58, %v2850_v13  ;;  %v5257_v58 = vor.u32 %v5744_v56, %v5256_v55  ;;  %v5242_v13 = vld [vmem:[%s6616_s1 + $0x70] sm:$0xf0]  ;;  %v5728_v55 = vld [vmem:[%s6616_s1 + $0xc] sm:$0xf0]  ;;  %v5726_v56 = vld [vmem:[%s6616_s1 + $0x4] sm:$0xf] }
 0x5d5   : > { %v2859_v38 = vsel %vm2856_vm11, %v2858_v19, %v2854_v16  ;;  %3401 = vmatpush.bf16.msra.mxu1 %v5261_v62  ;;  %v5193_v57 = vor.u32 %v5728_v55, %v5192_v54  ;;  %v5202_v1 = vld [vmem:[%s6616_s1 + $0x18] sm:$0xf0]  ;;  %v5437_v54 = vld [vmem:[%s6616_s1 + $0xf0] sm:$0xf0]  ;;  %v5443_v55 = vld [vmem:[%s6616_s1 + $0xe8] sm:$0xf] }
 0x5d6   : > { %3388 = vmatpush.bf16.msra.mxu0 %v5257_v58  ;;  %v5194_v58 = vld [vmem:[%s6616_s1 + $0x10] sm:$0xf0]  ;;  %v5205_v6 = vor.u32 %v5727_v63, %v5202_v1  ;;  %v5784_v63 = vld [vmem:[%s6616_s1 + $0xcc] sm:$0xf0]  ;;  %v5782_v1 = vld [vmem:[%s6616_s1 + $0xc4] sm:$0xf] }
 0x5d7   : > { %v5197_v62 = vor.u32 %v5726_v56, %v5194_v58  ;;  %v5789_v56 = vld [vmem:[%s6616_s1 + $0xf4] sm:$0xf0] }
 0x5d8   : > { %v5444_v58 = vor.u32 %v5789_v56, %v5443_v55  ;;  %v5766_v55 = vld [vmem:[%s6616_s1 + $0x44] sm:$0xf] }
 0x5da   : > { %v5964_v46 = vpop.eup %5963  ;;  %3389 = vmatpush.bf16.msra.mxu0 %v5241_v9 }
 0x5db   : > { %v2865_v20 = vmul.f32 %v5964_v46, %v2859_v38  ;;  %v5245_v46 = vor.u32 %v5738_v8, %v5242_v13  ;;  %v5249_v38 = vor.u32 %v5741_v15, %v5248_v14  ;;  %v2872_v13 = vld [vmem:[#allocation2 + $0x70] sm:$0xff] }
 0x5dd   : > { %v2866_v21 = vpack.c.bf16 %v2865_v20, %v2865_v20  ;;  %v5739_v20 = vld [vmem:[%s6616_s1 + $0x6c] sm:$0xf]  ;;  %3402 = vmatpush.bf16.msra.mxu1 %v5245_v46  ;;  %3415 = vmatpush.bf16.msra.mxu2 %v5249_v38 }
 0x5de   : > { %3390 = vmatpush.bf16.msra.mxu0 %v5225_v29 }
 0x5df   : > { %2868 = vst [vmem:[#allocation14 + $0x10] sm:$0xf] %v2866_v21  ;;  %3074 = vmatmul.bf16.vlgmr.msrb.gmra.mxu0 %v2866_v21  ;;  %3087 = vmatmul.bf16.vlgmr.msrb.gmra.mxu1 %v2866_v21 }
 0x5e0   : > { %3100 = vmatmul.bf16.vlgmr.msrb.gmra.mxu2 %v2866_v21  ;;  %3113 = vmatmul.bf16.vlgmr.msrb.gmra.mxu3 %v2866_v21  ;;  %v5250_v21 = vld [vmem:[%s6616_s1 + $0x78] sm:$0xf0] }
 0x5e1   : > { %v5253_v18 = vor.u32 %v5739_v20, %v5250_v21  ;;  %3403 = vmatpush.bf16.msra.mxu1 %v5229_v31  ;;  %3416 = vmatpush.bf16.msra.mxu2 %v5233_v34 }
 0x5e2   : > { %3391 = vmatpush.bf16.msra.mxu0 %v5209_v41 }
 0x5e3   : > { %3428 = vmatpush.bf16.msra.mxu3 %v5253_v18 }
 0x5e5   : > { %3404 = vmatpush.bf16.msra.mxu1 %v5213_v47  ;;  %3417 = vmatpush.bf16.msra.mxu2 %v5217_v52  ;;  %v5786_v52 = vld [vmem:[%s6616_s1 + $0xe4] sm:$0xf] }
 0x5e6   : > { %3392 = vmatpush.bf16.msra.mxu0 %v5193_v57  ;;  %v5440_v57 = vor.u32 %v5786_v52, %v5437_v54  ;;  %v5768_v54 = vld [vmem:[%s6616_s1 + $0x4c] sm:$0xf0] }
 0x5e7   : > { %3429 = vmatpush.bf16.msra.mxu3 %v5237_v40 }
 0x5e9   : > { %3405 = vmatpush.bf16.msra.mxu1 %v5197_v62  ;;  %v5419_v62 = vld [vmem:[%s6616_s1 + $0xc0] sm:$0xf] }
 0x5eb   : > { %3430 = vmatpush.bf16.msra.mxu3 %v5221_v53 }
 0x5ed   : > { %3717 = vmatpush.bf16.msrb.mxu1 %v5440_v57 }
 0x5ef   : > { %3431 = vmatpush.bf16.msra.mxu3 %v5205_v6 }
 0x65c   : > { %v3075_v16 = vpop.f32.mrf.mxu0  ;;  %v3088_v19 = vpop.f32.mrf.mxu1 }
 0x65d   : > { %v3118_v22 = vadd.f32 %v3075_v16, %v2870_v3  ;;  %v3119_v17 = vadd.f32 %v3088_v19, %v2871_v4  ;;  %v5201_v3 = vor.u32 %v5729_v60, %v5200_v59  ;;  %v5787_v59 = vld [vmem:[%s6616_s1 + $0xec] sm:$0xf]  ;;  %v5445_v60 = vld [vmem:[%s6616_s1 + $0xf8] sm:$0xf0] }
 0x65f   : > { %v5187_v26 = vmul.f32 -1.442695, %v3118_v22  ;;  %v5188_v27 = vmul.f32 -1.442695, %v3119_v17  ;;  %3418 = vmatpush.bf16.msra.mxu2 %v5201_v3  ;;  %v5421_v3 = vld [vmem:[%s6616_s1 + $0xd0] sm:$0xf0] }
 0x660   : > { %v5424_v6 = vor.u32 %v5782_v1, %v5421_v3  ;;  %v5767_v1 = vld [vmem:[%s6616_s1 + $0x4c] sm:$0xf]  ;;  %v5365_v3 = vld [vmem:[%s6616_s1 + $0x58] sm:$0xf0] }
 0x661   : > { %5965 = vpow2.f32 %v5187_v26 }
 0x662   : > { %5967 = vpow2.f32 %v5188_v27  ;;  %3718 = vmatpush.bf16.msrb.mxu1 %v5424_v6  ;;  %v5368_v6 = vor.u32 %v5767_v1, %v5365_v3 }
 0x663   : > { %v3101_v44 = vpop.f32.mrf.mxu2  ;;  %v3114_v45 = vpop.f32.mrf.mxu3  ;;  %3730 = vmatpush.bf16.msrb.mxu2 %v5444_v58  ;;  %v3192_v58 = vld [vmem:[#allocation2 + $0x28] sm:$0xff] }
 0x664   : > { %v3121_v49 = vadd.f32 %v3114_v45, %v2873_v28  ;;  %v3077_v50 = vpop.f32.mrf.mxu0  ;;  %v3090_v51 = vpop.f32.mrf.mxu1  ;;  %v3120_v19 = vadd.f32 %v3101_v44, %v2872_v13 }
 0x665   : > { %v5435_v50 = vld [vmem:[%s6616_s1 + $0xe0] sm:$0xf]  ;;  %v5788_v51 = vld [vmem:[%s6616_s1 + $0xec] sm:$0xf0] }
 0x666   : > { %v5189_v61 = vmul.f32 -1.442695, %v3121_v49  ;;  %v5436_v53 = vor.u32 %v5788_v51, %v5435_v50 }
 0x667   : > { %v5966_v2 = vpop.eup %5965 }
 0x668   : > { %v5968_v4 = vpop.eup %5967  ;;  %v3125_v5 = vadd.f32 1.0, %v5966_v2  ;;  %5969 = vpow2.f32 %v5189_v61  ;;  %3704 = vmatpush.bf16.msrb.mxu0 %v5436_v53  ;;  %v5448_v61 = vor.u32 %v5787_v59, %v5445_v60  ;;  %v5420_v2 = vor.u32 %v5784_v63, %v5419_v62  ;;  %v5355_v53 = vld [vmem:[%s6616_s1 + $0x40] sm:$0xf]  ;;  %v5357_v60 = vld [vmem:[%s6616_s1 + $0x50] sm:$0xf0] }
 0x669   : > { %v3144_v7 = vadd.f32 1.0, %v5968_v4  ;;  %v5427_v4 = vld [vmem:[%s6616_s1 + $0xc8] sm:$0xf]  ;;  %v5356_v59 = vor.u32 %v5768_v54, %v5355_v53  ;;  %v5769_v63 = vld [vmem:[%s6616_s1 + $0x54] sm:$0xf0] }
 0x66a   : > { %5971 = vrcp.f32 %v3125_v5  ;;  %v3137_v17 = vand.u32 2147483648, %v3125_v5  ;;  %v3135_v25 = vand.u32 2147483647, %v3125_v5  ;;  %vm3131_vm14 = vweird.f32 %v3125_v5  ;;  %3743 = vmatpush.bf16.msrb.mxu3 %v5448_v61  ;;  %v5363_v62 = vld [vmem:[%s6616_s1 + $0x48] sm:$0xf] }
 0x66b   : > { %5973 = vrcp.f32 %v3144_v7  ;;  %v3103_v8 = vpop.f32.mrf.mxu2  ;;  %v3116_v9 = vpop.f32.mrf.mxu3  ;;  %v3156_v18 = vand.u32 2147483648, %v3144_v7  ;;  %v3154_v26 = vand.u32 2147483647, %v3144_v7  ;;  %vm3150_vm15 = vweird.f32 %v3144_v7 }
 0x66c   : > { %v3138_v29 = vor.u32 1.1754944e-38, %v3137_v17  ;;  %vm3136_vm2 = vcmp.eq.f32.partialorder %v3135_v25, 8.507059e+37  ;;  %v5783_v8 = vld [vmem:[%s6616_s1 + $0xcc] sm:$0xf]  ;;  %v5429_v9 = vld [vmem:[%s6616_s1 + $0xd8] sm:$0xf0]  ;;  %3705 = vmatpush.bf16.msrb.mxu0 %v5420_v2  ;;  %v5360_v61 = vor.u32 %v5766_v55, %v5357_v60  ;;  %v5364_v2 = vor.u32 %v5769_v63, %v5363_v62 }
 0x66d   : > { %v3157_v32 = vor.u32 1.1754944e-38, %v3156_v18  ;;  %vm3155_vm3 = vcmp.eq.f32.partialorder %v3154_v26, 8.507059e+37  ;;  %v5432_v13 = vor.u32 %v5783_v8, %v5429_v9  ;;  %v5779_v17 = vld [vmem:[%s6616_s1 + $0xac] sm:$0xf]  ;;  %v5413_v18 = vld [vmem:[%s6616_s1 + $0xb8] sm:$0xf0] }
 0x66e   : > { %v5970_v14 = vpop.eup %5969  ;;  %v5387_v25 = vld [vmem:[%s6616_s1 + $0x80] sm:$0xf]  ;;  %v5774_v26 = vld [vmem:[%s6616_s1 + $0x84] sm:$0xf]  ;;  %v5341_v9 = vld [vmem:[%s6616_s1 + $0x30] sm:$0xf0] }
 0x66f   : > { %v3164_v15 = vadd.f32 1.0, %v5970_v14  ;;  %v5403_v14 = vld [vmem:[%s6616_s1 + $0xa0] sm:$0xf]  ;;  %3744 = vmatpush.bf16.msrb.mxu3 %v5432_v13  ;;  %v5762_v8 = vld [vmem:[%s6616_s1 + $0x24] sm:$0xf] }
 0x670   : > { %v5972_v16 = vpop.eup %5971  ;;  %v5347_v13 = vld [vmem:[%s6616_s1 + $0x28] sm:$0xf] }
 0x671   : > { %v5974_v46 = vpop.eup %5973  ;;  %v3127_v38 = vmul.f32 %v5972_v16, %v3125_v5  ;;  %5975 = vrcp.f32 %v3164_v15  ;;  %vm3132_vm12 = vweird.f32 %v5972_v16  ;;  %v3176_v44 = vand.u32 2147483648, %v3164_v15  ;;  %v5785_v5 = vld [vmem:[%s6616_s1 + $0xd4] sm:$0xf0] }
 0x672   : > { %v3146_v20 = vmul.f32 %v5974_v46, %v3144_v7  ;;  %5977 = vtanh.f32 %v3120_v19  ;;  %vm3151_vm13 = vweird.f32 %v5974_v46  ;;  %vm3133_vm0 = vmor %vm3131_vm14, %vm3132_vm12  ;;  %vm3170_vm5 = vweird.f32 %v3164_v15 }
 0x673   : > { %v3128_v21 = vsub.f32 1.0, %v3127_v38  ;;  %vm3152_vm1 = vmor %vm3150_vm15, %vm3151_vm13  ;;  %v3174_v45 = vand.u32 2147483647, %v3164_v15  ;;  %v3177_v48 = vor.u32 1.1754944e-38, %v3176_v44  ;;  %v5428_v7 = vor.u32 %v5785_v5, %v5427_v4  ;;  %v5411_v38 = vld [vmem:[%s6616_s1 + $0xa8] sm:$0xf] }
 0x674   : > { %v3147_v22 = vsub.f32 1.0, %v3146_v20  ;;  %v5781_v20 = vld [vmem:[%s6616_s1 + $0xb4] sm:$0xf0]  ;;  %v5379_v44 = vld [vmem:[%s6616_s1 + $0x68] sm:$0xf] }
 0x675   : > { %v3129_v23 = vmul.f32 %v5972_v16, %v3128_v21  ;;  %vm3175_vm7 = vcmp.eq.f32.partialorder %v3174_v45, 8.507059e+37  ;;  %3731 = vmatpush.bf16.msrb.mxu2 %v5428_v7  ;;  %v5773_v45 = vld [vmem:[%s6616_s1 + $0x74] sm:$0xf0]  ;;  %v5339_v4 = vld [vmem:[%s6616_s1 + $0x20] sm:$0xf] }
 0x676   : > { %v3148_v24 = vmul.f32 %v5974_v46, %v3147_v22  ;;  %v5412_v22 = vor.u32 %v5781_v20, %v5411_v38  ;;  %v5764_v5 = vld [vmem:[%s6616_s1 + $0x2c] sm:$0xf0]  ;;  %v5349_v38 = vld [vmem:[%s6616_s1 + $0x38] sm:$0xf0] }
 0x677   : > { %v5976_v27 = vpop.eup %5975  ;;  %v3130_v28 = vadd.f32 %v5972_v16, %v3129_v23  ;;  %v5416_v23 = vor.u32 %v5779_v17, %v5413_v18  ;;  %v5340_v7 = vor.u32 %v5764_v5, %v5339_v4 }
 0x678   : > { %v3149_v30 = vadd.f32 %v5974_v46, %v3148_v24  ;;  %v3166_v31 = vmul.f32 %v5976_v27, %v3164_v15  ;;  %v5978_v0 = vpop.eup %5977  ;;  %vm3171_vm4 = vweird.f32 %v5976_v27  ;;  %v5780_v15 = vld [vmem:[%s6616_s1 + $0xac] sm:$0xf0] }
 0x679   : > { %v3134_v33 = vsel %vm3133_vm0, %v5972_v16, %v3130_v28  ;;  %vm3172_vm6 = vmor %vm3170_vm5, %vm3171_vm4  ;;  %v5778_v16 = vld [vmem:[%s6616_s1 + $0xa4] sm:$0xf]  ;;  %v5404_v19 = vor.u32 %v5780_v15, %v5403_v14  ;;  %3732 = vmatpush.bf16.msrb.mxu2 %v5412_v22  ;;  %v5776_v24 = vld [vmem:[%s6616_s1 + $0x8c] sm:$0xf0]  ;;  %3745 = vmatpush.bf16.msrb.mxu3 %v5416_v23 }
 0x67a   : > { %v3139_v34 = vsel %vm3136_vm2, %v3138_v29, %v3134_v33  ;;  %v3153_v35 = vsel %vm3152_vm1, %v5974_v46, %v3149_v30  ;;  %v3167_v36 = vsub.f32 1.0, %v3166_v31  ;;  %v5405_v46 = vld [vmem:[%s6616_s1 + $0xb0] sm:$0xf0]  ;;  %v5395_v29 = vld [vmem:[%s6616_s1 + $0x88] sm:$0xf] }
 0x67b   : > { %v3158_v37 = vsel %vm3155_vm3, %v3157_v32, %v3153_v35  ;;  %v3181_v40 = vmul.f32 %v5978_v0, %v3139_v34  ;;  %v5408_v21 = vor.u32 %v5778_v16, %v5405_v46  ;;  %3706 = vmatpush.bf16.msrb.mxu0 %v5404_v19  ;;  %v5389_v28 = vld [vmem:[%s6616_s1 + $0x90] sm:$0xf0]  ;;  %v5777_v30 = vld [vmem:[%s6616_s1 + $0x94] sm:$0xf0]  ;;  %v5775_v33 = vld [vmem:[%s6616_s1 + $0x8c] sm:$0xf]  ;;  %v5344_v16 = vor.u32 %v5762_v8, %v5341_v9 }
 0x67c   : > { %v3180_v41 = vmul.f32 %v3158_v37, %v7249_v10  ;;  %v3168_v42 = vmul.f32 %v5976_v27, %v3167_v36  ;;  %v5392_v31 = vor.u32 %v5774_v26, %v5389_v28  ;;  %v5396_v32 = vor.u32 %v5777_v30, %v5395_v29  ;;  %v5397_v0 = vld [vmem:[%s6616_s1 + $0x98] sm:$0xf0]  ;;  %v3189_v34 = vld [vmem:[#allocation2 + $0xa8] sm:$0xff]  ;;  %v3190_v35 = vld [vmem:[#allocation2 + $0xd0] sm:$0xff] }
 0x67d   : > { %3719 = vmatpush.bf16.msrb.mxu1 %v5408_v21  ;;  %v5400_v36 = vor.u32 %v5775_v33, %v5397_v0  ;;  %v5371_v37 = vld [vmem:[%s6616_s1 + $0x60] sm:$0xf]  ;;  %v5765_v19 = vld [vmem:[%s6616_s1 + $0x34] sm:$0xf0]  ;;  %v5763_v46 = vld [vmem:[%s6616_s1 + $0x2c] sm:$0xf] }
 0x67e   : > { %v7317_v43 = vadd.f32 %v3181_v40, %v3180_v41  ;;  %v3169_v39 = vadd.f32 %v5976_v27, %v3168_v42  ;;  %3733 = vmatpush.bf16.msrb.mxu2 %v5396_v32  ;;  %v5772_v40 = vld [vmem:[%s6616_s1 + $0x6c] sm:$0xf0]  ;;  %v5770_v41 = vld [vmem:[%s6616_s1 + $0x64] sm:$0xf]  ;;  %v5348_v17 = vor.u32 %v5765_v19, %v5347_v13  ;;  %v5352_v18 = vor.u32 %v5763_v46, %v5349_v38  ;;  %v5323_v23 = vld [vmem:[%s6616_s1] sm:$0xf] }
 0x67f   : > { %3746 = vmatpush.bf16.msrb.mxu3 %v5400_v36  ;;  %v5372_v42 = vor.u32 %v5772_v40, %v5371_v37  ;;  %v5331_v28 = vld [vmem:[%s6616_s1 + $0x8] sm:$0xf]  ;;  %v5761_v29 = vld [vmem:[%s6616_s1 + $0x14] sm:$0xf0]  ;;  %v5759_v32 = vld [vmem:[%s6616_s1 + $0xc] sm:$0xf] }
 0x680   : > { %5979 = vtanh.f32 %v7317_v43  ;;  %v3173_v47 = vsel %vm3172_vm6, %v5976_v27, %v3169_v39  ;;  %v5388_v27 = vor.u32 %v5776_v24, %v5387_v25  ;;  %v5373_v39 = vld [vmem:[%s6616_s1 + $0x70] sm:$0xf0]  ;;  %v5760_v25 = vld [vmem:[%s6616_s1 + $0xc] sm:$0xf0]  ;;  %v5758_v24 = vld [vmem:[%s6616_s1 + $0x4] sm:$0xf] }
 0x681   : > { %v3178_v11 = vsel %vm3175_vm7, %v3177_v48, %v3173_v47  ;;  %3720 = vmatpush.bf16.msrb.mxu1 %v5392_v31  ;;  %v5324_v26 = vor.u32 %v5760_v25, %v5323_v23  ;;  %v5333_v33 = vld [vmem:[%s6616_s1 + $0x18] sm:$0xf0] }
 0x682   : > { %3707 = vmatpush.bf16.msrb.mxu0 %v5388_v27  ;;  %v5325_v27 = vld [vmem:[%s6616_s1 + $0x10] sm:$0xf0]  ;;  %v5336_v37 = vor.u32 %v5759_v32, %v5333_v33 }
 0x683   : > { %v5328_v31 = vor.u32 %v5758_v24, %v5325_v27  ;;  %v3511_v27 = vld [vmem:[#allocation2 + $0x98] sm:$0xff] }
 0x686   : > { %v5980_v10 = vpop.eup %5979  ;;  %3708 = vmatpush.bf16.msrb.mxu0 %v5372_v42 }
 0x687   : > { %v3184_v12 = vmul.f32 %v5980_v10, %v3178_v11  ;;  %v5376_v10 = vor.u32 %v5770_v41, %v5373_v39  ;;  %v5380_v11 = vor.u32 %v5773_v45, %v5379_v44  ;;  %v3191_v39 = vld [vmem:[#allocation2 + $0x10] sm:$0xff] }
 0x689   : > { %v3185_v49 = vpack.c.bf16 %v3184_v12, %v3184_v12  ;;  %v5771_v12 = vld [vmem:[%s6616_s1 + $0x6c] sm:$0xf]  ;;  %3721 = vmatpush.bf16.msrb.mxu1 %v5376_v10  ;;  %3734 = vmatpush.bf16.msrb.mxu2 %v5380_v11 }
 0x68a   : > { %3709 = vmatpush.bf16.msrb.mxu0 %v5356_v59 }
 0x68b   : > { %3187 = vst [vmem:[#allocation14 + $0x14] sm:$0xf] %v3185_v49  ;;  %3393 = vmatmul.bf16.vlgmr.msra.gmra.mxu0 %v3185_v49  ;;  %3406 = vmatmul.bf16.vlgmr.msra.gmra.mxu1 %v3185_v49 }
 0x68c   : > { %3419 = vmatmul.bf16.vlgmr.msra.gmra.mxu2 %v3185_v49  ;;  %3432 = vmatmul.bf16.vlgmr.msra.gmra.mxu3 %v3185_v49  ;;  %v5381_v49 = vld [vmem:[%s6616_s1 + $0x78] sm:$0xf0]  ;;  %s3876_s1 = sshll.u32 %s3872_s29, 4  ;;  %s7416_s1 = int_to_ptr.hbm [resolvable:$true] %s3876_s1 }
 0x68d   : > { %v5384_v52 = vor.u32 %v5771_v12, %v5381_v49  ;;  %3722 = vmatpush.bf16.msrb.mxu1 %v5360_v61  ;;  %3735 = vmatpush.bf16.msrb.mxu2 %v5364_v2 }
 0x68e   : > { %3710 = vmatpush.bf16.msrb.mxu0 %v5340_v7 }
 0x68f   : > { %3747 = vmatpush.bf16.msrb.mxu3 %v5384_v52 }
 0x691   : > { %3723 = vmatpush.bf16.msrb.mxu1 %v5344_v16  ;;  %3736 = vmatpush.bf16.msrb.mxu2 %v5348_v17 }
 0x692   : > { %3711 = vmatpush.bf16.msrb.mxu0 %v5324_v26 }
 0x693   : > { %3748 = vmatpush.bf16.msrb.mxu3 %v5368_v6 }
 0x695   : > { %3724 = vmatpush.bf16.msrb.mxu1 %v5328_v31 }
 0x697   : > { %3749 = vmatpush.bf16.msrb.mxu3 %v5352_v18 }
 0x69b   : > { %3750 = vmatpush.bf16.msrb.mxu3 %v5336_v37 }
 0x708   : > { %v3394_v47 = vpop.f32.mrf.mxu0  ;;  %v3407_v48 = vpop.f32.mrf.mxu1 }
 0x709   : > { %v3437_v50 = vadd.f32 %v3394_v47, %v3189_v34  ;;  %v3438_v51 = vadd.f32 %v3407_v48, %v3190_v35  ;;  %v5332_v34 = vor.u32 %v5761_v29, %v5331_v28 }
 0x70b   : > { %v5318_v56 = vmul.f32 -1.442695, %v3437_v50  ;;  %v5319_v57 = vmul.f32 -1.442695, %v3438_v51  ;;  %3737 = vmatpush.bf16.msrb.mxu2 %v5332_v34 }
 0x70d   : > { %5981 = vpow2.f32 %v5318_v56 }
 0x70e   : > { %5983 = vpow2.f32 %v5319_v57 }
 0x70f   : > { %v3420_v14 = vpop.f32.mrf.mxu2  ;;  %v3433_v15 = vpop.f32.mrf.mxu3 }
 0x710   : > { %v3440_v20 = vadd.f32 %v3433_v15, %v3192_v58  ;;  %v3396_v21 = vpop.f32.mrf.mxu0  ;;  %v3409_v22 = vpop.f32.mrf.mxu1  ;;  %v3439_v48 = vadd.f32 %v3420_v14, %v3191_v39 }
 0x711   : > { %v3509_v22 = vld [vmem:[#allocation2 + $0xf8] sm:$0xff] }
 0x712   : > { %v5320_v30 = vmul.f32 -1.442695, %v3440_v20 }
 0x713   : > { %v5982_v0 = vpop.eup %5981 }
 0x714   : > { %v5984_v35 = vpop.eup %5983  ;;  %v3444_v36 = vadd.f32 1.0, %v5982_v0  ;;  %5985 = vpow2.f32 %v5320_v30 }
 0x715   : > { %v3463_v40 = vadd.f32 1.0, %v5984_v35 }
 0x716   : > { %5987 = vrcp.f32 %v3444_v36  ;;  %v3456_v51 = vand.u32 2147483648, %v3444_v36  ;;  %v3454_v54 = vand.u32 2147483647, %v3444_v36  ;;  %vm3450_vm10 = vweird.f32 %v3444_v36 }
 0x717   : > { %5989 = vrcp.f32 %v3463_v40  ;;  %v3422_v41 = vpop.f32.mrf.mxu2  ;;  %v3435_v42 = vpop.f32.mrf.mxu3  ;;  %v3475_v52 = vand.u32 2147483648, %v3463_v40  ;;  %v3473_v56 = vand.u32 2147483647, %v3463_v40  ;;  %vm3469_vm11 = vweird.f32 %v3463_v40 }
 0x718   : > { %v3457_v59 = vor.u32 1.1754944e-38, %v3456_v51  ;;  %vm3455_vm14 = vcmp.eq.f32.partialorder %v3454_v54, 8.507059e+37  ;;  %v3510_v41 = vld [vmem:[#allocation2 + $0x20] sm:$0xff] }
 0x719   : > { %v3476_v62 = vor.u32 1.1754944e-38, %v3475_v52  ;;  %vm3474_vm15 = vcmp.eq.f32.partialorder %v3473_v56, 8.507059e+37 }
 0x71a   : > { %v5986_v44 = vpop.eup %5985 }
 0x71b   : > { %v3483_v45 = vadd.f32 1.0, %v5986_v44 }
 0x71c   : > { %v5988_v47 = vpop.eup %5987 }
 0x71d   : > { %v5990_v10 = vpop.eup %5989  ;;  %v3446_v11 = vmul.f32 %v5988_v47, %v3444_v36  ;;  %5991 = vrcp.f32 %v3483_v45  ;;  %vm3451_vm8 = vweird.f32 %v5988_v47  ;;  %v3495_v14 = vand.u32 2147483648, %v3483_v45 }
 0x71e   : > { %v3465_v12 = vmul.f32 %v5990_v10, %v3463_v40  ;;  %5993 = vtanh.f32 %v3439_v48  ;;  %vm3470_vm9 = vweird.f32 %v5990_v10  ;;  %vm3452_vm12 = vmor %vm3450_vm10, %vm3451_vm8  ;;  %vm3489_vm1 = vweird.f32 %v3483_v45 }
 0x71f   : > { %v3447_v49 = vsub.f32 1.0, %v3446_v11  ;;  %vm3471_vm13 = vmor %vm3469_vm11, %vm3470_vm9  ;;  %v3493_v15 = vand.u32 2147483647, %v3483_v45  ;;  %v3496_v19 = vor.u32 1.1754944e-38, %v3495_v14 }
 0x720   : > { %v3466_v50 = vsub.f32 1.0, %v3465_v12 }
 0x721   : > { %v3448_v53 = vmul.f32 %v5988_v47, %v3447_v49  ;;  %vm3494_vm3 = vcmp.eq.f32.partialorder %v3493_v15, 8.507059e+37 }
 0x722   : > { %v3467_v55 = vmul.f32 %v5990_v10, %v3466_v50 }
 0x723   : > { %v5992_v57 = vpop.eup %5991  ;;  %v3449_v58 = vadd.f32 %v5988_v47, %v3448_v53 }
 0x724   : > { %v3468_v60 = vadd.f32 %v5990_v10, %v3467_v55  ;;  %v3485_v61 = vmul.f32 %v5992_v57, %v3483_v45  ;;  %v5994_v1 = vpop.eup %5993  ;;  %vm3490_vm0 = vweird.f32 %v5992_v57 }
 0x725   : > { %v3453_v63 = vsel %vm3452_vm12, %v5988_v47, %v3449_v58  ;;  %vm3491_vm2 = vmor %vm3489_vm1, %vm3490_vm0 }
 0x726   : > { %v3458_v2 = vsel %vm3455_vm14, %v3457_v59, %v3453_v63  ;;  %v3472_v3 = vsel %vm3471_vm13, %v5990_v10, %v3468_v60  ;;  %v3486_v4 = vsub.f32 1.0, %v3485_v61 }
 0x727   : > { %v3477_v5 = vsel %vm3474_vm15, %v3476_v62, %v3472_v3  ;;  %v3500_v6 = vmul.f32 %v5994_v1, %v3458_v2 }
 0x728   : > { %v3499_v7 = vmul.f32 %v3477_v5, %v7317_v43  ;;  %v3487_v8 = vmul.f32 %v5992_v57, %v3486_v4  ;;  %v3508_v43 = vld [vmem:[#allocation2 + $0xa0] sm:$0xff] }
 0x72a   : > { %v7385_v9 = vadd.f32 %v3500_v6, %v3499_v7  ;;  %v3488_v13 = vadd.f32 %v5992_v57, %v3487_v8 }
 0x72c   : > { %5995 = vtanh.f32 %v7385_v9  ;;  %v3492_v16 = vsel %vm3491_vm2, %v5992_v57, %v3488_v13 }
 0x72d   : > { %v3497_v38 = vsel %vm3494_vm3, %v3496_v19, %v3492_v16 }
 0x732   : > { %v5996_v46 = vpop.eup %5995 }
 0x733   : > { %v3503_v20 = vmul.f32 %v5996_v46, %v3497_v38 }
 0x735   : > { %v3504_v21 = vpack.c.bf16 %v3503_v20, %v3503_v20 }
 0x737   : > { %3506 = vst [vmem:[#allocation14 + $0x18] sm:$0xf] %v3504_v21  ;;  %3712 = vmatmul.bf16.vlgmr.msrb.gmra.mxu0 %v3504_v21  ;;  %3725 = vmatmul.bf16.vlgmr.msrb.gmra.mxu1 %v3504_v21 }
 0x738   : > { %3738 = vmatmul.bf16.vlgmr.msrb.gmra.mxu2 %v3504_v21  ;;  %3751 = vmatmul.bf16.vlgmr.msrb.gmra.mxu3 %v3504_v21 }
 0x7b4   : > { %v3713_v17 = vpop.f32.mrf.mxu0  ;;  %v3726_v18 = vpop.f32.mrf.mxu1 }
 0x7b5   : > { %v3756_v23 = vadd.f32 %v3713_v17, %v3508_v43  ;;  %v3757_v25 = vadd.f32 %v3726_v18, %v3509_v22 }
 0x7b7   : > { %v5449_v24 = vmul.f32 -1.442695, %v3756_v23  ;;  %v5450_v26 = vmul.f32 -1.442695, %v3757_v25 }
 0x7b9   : > { %5997 = vpow2.f32 %v5449_v24 }
 0x7ba   : > { %5999 = vpow2.f32 %v5450_v26 }
 0x7bb   : > { %v3739_v28 = vpop.f32.mrf.mxu2  ;;  %v3752_v29 = vpop.f32.mrf.mxu3 }
 0x7bc   : > { %v3759_v30 = vadd.f32 %v3752_v29, %v3511_v27  ;;  %v3715_v31 = vpop.f32.mrf.mxu0  ;;  %v3728_v32 = vpop.f32.mrf.mxu1  ;;  %v3758_v45 = vadd.f32 %v3739_v28, %v3510_v41 }
 0x7be   : > { %v5451_v33 = vmul.f32 -1.442695, %v3759_v30 }
 0x7bf   : > { %v5998_v0 = vpop.eup %5997 }
 0x7c0   : > { %v6000_v34 = vpop.eup %5999  ;;  %v3763_v35 = vadd.f32 1.0, %v5998_v0  ;;  %6001 = vpow2.f32 %v5451_v33 }
 0x7c1   : > { %v3782_v36 = vadd.f32 1.0, %v6000_v34 }
 0x7c2   : > { %6003 = vrcp.f32 %v3763_v35  ;;  %v3775_v49 = vand.u32 2147483648, %v3763_v35  ;;  %v3773_v52 = vand.u32 2147483647, %v3763_v35  ;;  %vm3769_vm6 = vweird.f32 %v3763_v35 }
 0x7c3   : > { %6005 = vrcp.f32 %v3782_v36  ;;  %v3741_v37 = vpop.f32.mrf.mxu2  ;;  %v3754_v40 = vpop.f32.mrf.mxu3  ;;  %v3794_v50 = vand.u32 2147483648, %v3782_v36  ;;  %v3792_v54 = vand.u32 2147483647, %v3782_v36  ;;  %vm3788_vm7 = vweird.f32 %v3782_v36 }
 0x7c4   : > { %v3776_v57 = vor.u32 1.1754944e-38, %v3775_v49  ;;  %vm3774_vm10 = vcmp.eq.f32.partialorder %v3773_v52, 8.507059e+37 }
 0x7c5   : > { %v3795_v60 = vor.u32 1.1754944e-38, %v3794_v50  ;;  %vm3793_vm11 = vcmp.eq.f32.partialorder %v3792_v54, 8.507059e+37 }
 0x7c6   : > { %v6002_v42 = vpop.eup %6001 }
 0x7c7   : > { %v3802_v39 = vadd.f32 1.0, %v6002_v42 }
 0x7c8   : > { %v6004_v44 = vpop.eup %6003 }
 0x7c9   : > { %v6006_v47 = vpop.eup %6005  ;;  %v3765_v48 = vmul.f32 %v6004_v44, %v3763_v35  ;;  %6007 = vrcp.f32 %v3802_v39  ;;  %vm3770_vm4 = vweird.f32 %v6004_v44  ;;  %v3814_v13 = vand.u32 2147483648, %v3802_v39 }
 0x7ca   : > { %v3784_v10 = vmul.f32 %v6006_v47, %v3782_v36  ;;  %6009 = vtanh.f32 %v3758_v45  ;;  %vm3789_vm5 = vweird.f32 %v6006_v47  ;;  %vm3771_vm8 = vmor %vm3769_vm6, %vm3770_vm4  ;;  %vm3808_vm13 = vweird.f32 %v3802_v39 }
 0x7cb   : > { %v3766_v11 = vsub.f32 1.0, %v3765_v48  ;;  %vm3790_vm9 = vmor %vm3788_vm7, %vm3789_vm5  ;;  %v3812_v14 = vand.u32 2147483647, %v3802_v39  ;;  %v3815_v15 = vor.u32 1.1754944e-38, %v3814_v13 }
 0x7cc   : > { %v3785_v12 = vsub.f32 1.0, %v3784_v10 }
 0x7cd   : > { %v3767_v51 = vmul.f32 %v6004_v44, %v3766_v11  ;;  %vm3813_vm15 = vcmp.eq.f32.partialorder %v3812_v14, 8.507059e+37 }
 0x7ce   : > { %v3786_v53 = vmul.f32 %v6006_v47, %v3785_v12 }
 0x7cf   : > { %v6008_v55 = vpop.eup %6007  ;;  %v3768_v56 = vadd.f32 %v6004_v44, %v3767_v51 }
 0x7d0   : > { %v3787_v58 = vadd.f32 %v6006_v47, %v3786_v53  ;;  %v3804_v59 = vmul.f32 %v6008_v55, %v3802_v39  ;;  %v6010_v62 = vpop.eup %6009  ;;  %vm3809_vm12 = vweird.f32 %v6008_v55 }
 0x7d1   : > { %v3772_v61 = vsel %vm3771_vm8, %v6004_v44, %v3768_v56  ;;  %vm3810_vm14 = vmor %vm3808_vm13, %vm3809_vm12 }
 0x7d2   : > { %v3777_v63 = vsel %vm3774_vm10, %v3776_v57, %v3772_v61  ;;  %v3791_v1 = vsel %vm3790_vm9, %v6006_v47, %v3787_v58  ;;  %v3805_v2 = vsub.f32 1.0, %v3804_v59 }
 0x7d3   : > { %v3796_v3 = vsel %vm3793_vm11, %v3795_v60, %v3791_v1  ;;  %v3819_v4 = vmul.f32 %v6010_v62, %v3777_v63 }
 0x7d4   : > { %v3818_v5 = vmul.f32 %v3796_v3, %v7385_v9  ;;  %v3806_v6 = vmul.f32 %v6008_v55, %v3805_v2 }
 0x7d6   : > { %v3820_v7 = vadd.f32 %v3819_v4, %v3818_v5  ;;  %v3807_v8 = vadd.f32 %v6008_v55, %v3806_v6 }
 0x7d8   : > { %6011 = vtanh.f32 %v3820_v7  ;;  %3827 = vst [vmem:[%s501_s0] sm:$0xff] %v3820_v7  ;;  %v3811_v9 = vsel %vm3810_vm14, %v6008_v55, %v3807_v8  ;;  %s6207_s0 = sshra.s32 %s3863_s19, 4  ;;  %s6208_s0 = int_to_ptr.hbm [resolvable:$true] %s6207_s0 }
 0x7d9   : > { %v3816_v19 = vsel %vm3813_vm15, %v3815_v15, %v3811_v9  ;;  %s6209_s13 = scalar_lea.hbm %s6208_s0, 8  ;;  %p6214_p2 = scmp.lt.s32.totalorder %s6208_s0, %s7480_s7 }
 0x7da   : > { %p6210_p5 = scmp.ne.s32.totalorder %s6208_s0, %s6209_s13  ;;  %p6215_p4 = scmp.lt.s32.totalorder %s6213_s8, %s6209_s13 }
 0x7dc   : > { %p6211_p0 = pnand %p6210_p5, %p6522_p7  ;;  %p6216_p13 = por %p6215_p4, %p6214_p2 }
 0x7de   : > { %v6012_v16 = vpop.eup %6011  ;;  %p6212_p12 = pneg %p6211_p0 }
 0x7df   : > { %v3822_v46 = vmul.f32 %v6012_v16, %v3816_v19 }
 0x7e0   : > { %p6217_p1 = pnand %p6216_p13, %p6212_p12 }
 0x7e1   : > { %v3823_v38 = vpack.c.bf16 %v3822_v46, %v3822_v46  ;;  %3826 = vst [vmem:[%s494_s26] sm:$0xff] %v3822_v46 }
 0x7e2   : > { %6220 = shalt.err (!%p6217_p1)
}
 0x7e3   : > { %5806 = dma.vmem_to_hbm [thread:$0]  (%p6522_p7), %s3861_s25, 128, %s3863_s19, %s3829_s22   ;;  %3825 = vst [vmem:[#allocation14 + $0x1c] sm:$0xf] %v3823_v38 }
 0x7e4   : > { %s6235_s14 = sshra.s32 %s7416_s1, 4  ;;  %s6241_s23 = scalar_lea.hbm %s7524_s6, 16  ;;  %s6236_s14 = int_to_ptr.hbm [resolvable:$true] %s6235_s14 }
 0x7e5   : > { %s6237_s17 = scalar_lea.hbm %s6236_s14, 8  ;;  %p6242_p3 = scmp.lt.s32.totalorder %s6236_s14, %s7524_s6 }
 0x7e6   : > { %p6238_p11 = scmp.ne.s32.totalorder %s6236_s14, %s6237_s17  ;;  %p6243_p6 = scmp.lt.s32.totalorder %s6241_s23, %s6237_s17 }
 0x7e8   : > { %p6239_p8 = pnand %p6238_p11, %p6522_p7  ;;  %p6244_p5 = por %p6243_p6, %p6242_p3 }
 0x7ea   : > { %p6240_p10 = pneg %p6239_p8 }
 0x7ec   : > { %p6245_p0 = pnand %p6244_p5, %p6240_p10 }
 0x7ee   : > { %6248 = shalt.err (!%p6245_p0)
}
 0x7ef   : > { %5807 = dma.vmem_to_hbm [thread:$0]  (%p6522_p7), %s3875_s24, 128, %s7416_s1, %s3829_s22  }
 0x7f0   : > { %s6339_s25 = smov 64   ;;  %s6340_s19 = smov 4  }
 0x7f1   : > { %p7527_p12 = scmp.eq.s32.totalorder %s6501_s12, 1 }
 0x7f3   : > { %5805 = dma.vmem_to_hbm [thread:$0]  (%p7527_p12), %s3844_s11, 512, %s7413_s27, [#allocation5], %s6339_s25, %s6339_s25, %s6340_s19  }
 0x7f4   : > { %p7528_p2 = pmov %p7527_p12 }
 0x7f6   : > { %6310 = dma.done.wait (%p7528_p2), [#allocation5], 512   ;;  %p7529_p4 = pmov %p7528_p2 }
 0x7f8   : > { %6312 = vsyncadd (%p7529_p4), [#allocation5], 4294966784 }
 0x7f9 PF: > { %s7530_s18 = sadd.s32 4294967294, %s6331_s30   ;;  %p7532_p13 = scmp.ge.s32.totalorder %s6331_s30, 2 }
 0x7fa   : > { %s3893_s0 = sand.u32 1, %s7530_s18  }
 0x7fb   : > { %p5833_p1 = pnand %p7532_p13, %p6526_p9  ;;  %s3894_s24 = scalar_lea.sflag [#allocation16], %s3893_s0 }
 0x7fd   : > { %p5834_p7 = pneg %p5833_p1 }
 0x7ff   : > { %6314 = dma.done.wait (%p5834_p7), %s3894_s24, 256  }
 0x800   : > { %6316 = vsyncadd (%p5834_p7), %s3894_s24, 4294967040  ;;  %s7533_s30 = sld [smem:[#allocation25_spill]]  ;;  %s7536_s27 = smov %s6323_s28 }
 0x801   : > { %s7534_s11 = sld [smem:[#allocation24_spill]] }
 0x802   : > { %s7535_s29 = sld [smem:[#allocation26_spill]] }
 0x806   : > { %p30_p11 = scmp.ge.s32.totalorder %s7533_s30, 4  }
 0x807   : > { %s7537_s28 = smov %s7534_s11 }
 0x808   :  { %32 = sbr.rel (!%p30_p11) target bundleno = 17 (0x11), region = 188 }
 0x80d   :  { %3910 = vsyncpa [#allocation4], 1 }
 0x80e   :  { %3912 = vsyncpa [#allocation4 + $0x1], 1 }
 0x80f   :  { %3913 = vsyncpa [#allocation7], 1 }
 0x810   :  { %3915 = vsyncpa [#allocation7 + $0x1], 1 }
 0x811   :  { %3916 = vsyncpa [#allocation10], 1 }
 0x812   :  { %3918 = vsyncpa [#allocation10 + $0x1], 1 }
 0x813   :  { %3919 = vsyncpa [#allocation13], 1 }
 0x814   :  { %3921 = vsyncpa [#allocation13 + $0x1], 1 }
 0x815   :  { %3922 = vsyncpa [#allocation5], 1 }
 0x816   :  { %3924 = vsyncpa [#allocation5 + $0x1], 1 }
 0x817   :  { %3925 = vsyncpa [#allocation16], 1 }
 0x818   :  { %3927 = vsyncpa [#allocation16 + $0x1], 1 }

</bundles_post_ra>
